<compile_context>
chip_gen: v5e
topology: v5e:2x2
jax: 0.10.0
libtpu: 0.0.40
codegen_flags: <defaults>
</compile_context>

<pallas_src>
from functools import partial

import jax
import jax.numpy as jnp
import numpy as np
from jax.experimental import pallas as pl
from jax.experimental.pallas import tpu as pltpu


def _round_up(x, m):
    return ((x + m - 1) // m) * m


def adact_kernel(consts_ref, slope_ref, icept_ref, x_ref, o_ref, *, num_segments):
    """consts_ref (SMEM, 5): [r, s, 1/delta, a[0], a[-1]]
    slope_ref / icept_ref (SMEM, H-1): per-segment line parameters."""
    x = x_ref[...].astype(jnp.float32)      # (tile_m, tile_n) tile in VMEM

    r = consts_ref[0]
    s = consts_ref[1]
    inv_delta = consts_ref[2]
    a_first = consts_ref[3]
    a_last = consts_ref[4]

    # Segment index: m1 = ceil(x/delta) - 1, clamped to a valid segment.
    # (Clamping also removes the NaN/Inf hazard of the unclamped reference
    # math for out-of-range x; those elements are overwritten by the masks
    # below anyway.)
    seg = jnp.ceil(x * inv_delta).astype(jnp.int32) - 1
    seg = jnp.clip(seg, 0, num_segments - 1)

    # One-hot gather of the two small per-segment tables (H is tiny, fully
    # unrolled; one compare + two selects per segment, pure VPU).
    slope = jnp.zeros_like(x)
    icept = jnp.zeros_like(x)
    for k in range(num_segments):
        hit = seg == k
        slope = jnp.where(hit, slope_ref[k], slope)
        icept = jnp.where(hit, icept_ref[k], icept)

    interp = icept + slope * x

    # if x > s: a[-1] ; elif x < r: a[0] ; else: interpolation
    out = jnp.where(x > s, a_last, jnp.where(x < r, a_first, interp))
    o_ref[...] = out.astype(o_ref.dtype)


def adact_forward(x, ns, a, *, tile_m=512, tile_n=1024):
    N, M = x.shape
    H = ns.shape[0]

    # Tiny (H,)-sized parameter preprocessing in the wrapper (one-time, not
    # per-element work): per-segment slope/intercept tables + scalar consts.
    ns32 = ns.astype(jnp.float32)
    a32 = a.astype(jnp.float32)
    delta = ns32[1] - ns32[0]
    inv_delta = 1.0 / delta
    slope = (a32[1:] - a32[:-1]) * inv_delta              # (H-1,)
    icept = a32[:-1] - slope * ns32[:-1]                  # (H-1,)
    consts = jnp.stack([ns32[0], ns32[-1], inv_delta, a32[0], a32[-1]])

    # Clamp the (large, lane-dense) default tiles to the (8,128)-rounded array
    # size so small inputs stay a single block; pl.cdiv handles the remainder
    # blocks (Pallas pads edge tiles, padded outputs are discarded).
    tm = min(tile_m, _round_up(N, 8))
    tn = min(tile_n, _round_up(M, 128))
    grid = (pl.cdiv(N, tm), pl.cdiv(M, tn))

    kernel = partial(adact_kernel, num_segments=H - 1)
    return pl.pallas_call(
        kernel,
        out_shape=jax.ShapeDtypeStruct((N, M), x.dtype),
        grid=grid,
        in_specs=[
            pl.BlockSpec(memory_space=pltpu.MemorySpace.SMEM),   # consts (5,)
            pl.BlockSpec(memory_space=pltpu.MemorySpace.SMEM),   # slope  (H-1,)
            pl.BlockSpec(memory_space=pltpu.MemorySpace.SMEM),   # icept  (H-1,)
            pl.BlockSpec((tm, tn), lambda i, j: (i, j)),          # x tile
        ],
        out_specs=pl.BlockSpec((tm, tn), lambda i, j: (i, j)),
        compiler_params=pltpu.CompilerParams(
            dimension_semantics=("parallel", "parallel")),
    )(consts, slope, icept, x)


def adact_ref(x, ns, a):
    """Vectorized pure-JAX reference of the PyTorch forward."""
    H = ns.shape[0]
    r, s = ns[0], ns[-1]
    delta = ns[1] - ns[0]
    m1 = jnp.ceil(x / delta).astype(jnp.int32) - 1
    m2 = m1 + 1
    m1 = jnp.maximum(m1, 0)
    m2 = jnp.minimum(m2, H - 1)
    m1c = jnp.clip(m1, 0, H - 1)
    m2c = jnp.clip(m2, 0, H - 1)
    ns1, ns2 = ns[m1c], ns[m2c]
    a1, a2 = a[m1c], a[m2c]
    w1 = (ns2 - x) / (ns2 - ns1)
    w2 = (x - ns1) / (ns2 - ns1)
    interp = w1 * a1 + w2 * a2
    return jnp.where(x > s, a[-1], jnp.where(x < r, a[0], interp))


if __name__ == "__main__":
    # Deterministic parameter init, mirroring AdAct.__init__
    num_hinges = 16
    net_input_range = (0.0, 4.0)            # (r, s)
    ns = jnp.linspace(net_input_range[0], net_input_range[1],
                      num_hinges, dtype=jnp.float32)
    a = jnp.tanh(ns)                         # reference_activation='tanh'

    # Small 2-D input (rows, features), covering all three branches.
    key = jax.random.PRNGKey(0)
    N, M = 72, 640
    x = jax.random.uniform(key, (N, M), dtype=jnp.float32,
                           minval=-2.0, maxval=6.0)
    expected = adact_ref(x, ns, a)

    # 1) Default large lane-dense tiles (clamped to the array size).
    out = jax.block_until_ready(adact_forward(x, ns, a))
    np.testing.assert_allclose(np.asarray(out), np.asarray(expected),
                               rtol=1e-5, atol=1e-6)

    # 2) Tiles that do not divide (N, M): exercises pl.cdiv + padded edge blocks.
    out_small = jax.block_until_ready(adact_forward(x, ns, a,
                                                    tile_m=32, tile_n=256))
    np.testing.assert_allclose(np.asarray(out_small), np.asarray(expected),
                               rtol=1e-5, atol=1e-6)

    # 3) bfloat16 activations (math still f32 in-kernel).
    x_bf16 = x.astype(jnp.bfloat16)
    out_bf16 = jax.block_until_ready(adact_forward(x_bf16, ns, a))
    expected_bf16 = adact_ref(x_bf16.astype(jnp.float32), ns, a)
    np.testing.assert_allclose(np.asarray(out_bf16, dtype=np.float32),
                               np.asarray(expected_bf16),
                               rtol=2e-2, atol=2e-2)

    print("KERNEL_OK")
</pallas_src>

<mosaic_0001>
module attributes {stable_mosaic.version = 11 : i64} {
  func.func @adact_kernel(%arg0: i32, %arg1: i32, %arg2: memref<5xf32, #tpu.memory_space<smem>>, %arg3: memref<15xf32, #tpu.memory_space<smem>>, %arg4: memref<15xf32, #tpu.memory_space<smem>>, %arg5: memref<72x640xf32, #tpu.memory_space<vmem>>, %arg6: memref<72x640xf32, #tpu.memory_space<vmem>>) attributes {dimension_semantics = [#tpu.dimension_semantics<parallel>, #tpu.dimension_semantics<parallel>], iteration_bounds = array<i64: 1, 1>, scalar_prefetch = 0 : i64, scratch_operands = 0 : i64, tpu.core_type = #tpu.core_type<tc>, window_params = [{transform_indices = @transform_0, window_bounds = array<i64: 5>}, {transform_indices = @transform_1, window_bounds = array<i64: 15>}, {transform_indices = @transform_2, window_bounds = array<i64: 15>}, {transform_indices = @transform_3, window_bounds = array<i64: 72, 640>}, {transform_indices = @transform_4, window_bounds = array<i64: 72, 640>}]} {
    %c0 = arith.constant 0 : index
    %c0_0 = arith.constant 0 : index
    %0 = vector.load %arg5[%c0, %c0_0] : memref<72x640xf32, #tpu.memory_space<vmem>>, vector<72x640xf32>
    %c0_1 = arith.constant 0 : index
    %1 = memref.load %arg2[%c0_1] : memref<5xf32, #tpu.memory_space<smem>>
    %c1 = arith.constant 1 : index
    %2 = memref.load %arg2[%c1] : memref<5xf32, #tpu.memory_space<smem>>
    %c2 = arith.constant 2 : index
    %3 = memref.load %arg2[%c2] : memref<5xf32, #tpu.memory_space<smem>>
    %c3 = arith.constant 3 : index
    %4 = memref.load %arg2[%c3] : memref<5xf32, #tpu.memory_space<smem>>
    %c4 = arith.constant 4 : index
    %5 = memref.load %arg2[%c4] : memref<5xf32, #tpu.memory_space<smem>>
    %6 = vector.broadcast %3 : f32 to vector<72x640xf32>
    %7 = arith.mulf %0, %6 : vector<72x640xf32>
    %8 = math.ceil %7 : vector<72x640xf32>
    %9 = arith.fptosi %8 : vector<72x640xf32> to vector<72x640xi32>
    %c1_i32 = arith.constant 1 : i32
    %10 = vector.broadcast %c1_i32 : i32 to vector<72x640xi32>
    %11 = arith.subi %9, %10 : vector<72x640xi32>
    %c0_i32 = arith.constant 0 : i32
    %c14_i32 = arith.constant 14 : i32
    %12 = vector.broadcast %c0_i32 : i32 to vector<72x640xi32>
    %13 = arith.maxsi %12, %11 : vector<72x640xi32>
    %14 = vector.broadcast %c14_i32 : i32 to vector<72x640xi32>
    %15 = arith.minsi %14, %13 : vector<72x640xi32>
    %cst = arith.constant 0.000000e+00 : f32
    %16 = vector.broadcast %cst : f32 to vector<72x640xf32>
    %cst_2 = arith.constant 0.000000e+00 : f32
    %17 = vector.broadcast %cst_2 : f32 to vector<72x640xf32>
    %c0_i32_3 = arith.constant 0 : i32
    %18 = vector.broadcast %c0_i32_3 : i32 to vector<72x640xi32>
    %19 = arith.cmpi eq, %15, %18 : vector<72x640xi32>
    %c0_4 = arith.constant 0 : index
    %20 = memref.load %arg3[%c0_4] : memref<15xf32, #tpu.memory_space<smem>>
    %21 = vector.broadcast %20 : f32 to vector<72x640xf32>
    %22 = arith.select %19, %21, %16 : vector<72x640xi1>, vector<72x640xf32>
    %c0_5 = arith.constant 0 : index
    %23 = memref.load %arg4[%c0_5] : memref<15xf32, #tpu.memory_space<smem>>
    %24 = vector.broadcast %23 : f32 to vector<72x640xf32>
    %25 = arith.select %19, %24, %17 : vector<72x640xi1>, vector<72x640xf32>
    %c1_i32_6 = arith.constant 1 : i32
    %26 = vector.broadcast %c1_i32_6 : i32 to vector<72x640xi32>
    %27 = arith.cmpi eq, %15, %26 : vector<72x640xi32>
    %c1_7 = arith.constant 1 : index
    %28 = memref.load %arg3[%c1_7] : memref<15xf32, #tpu.memory_space<smem>>
    %29 = vector.broadcast %28 : f32 to vector<72x640xf32>
    %30 = arith.select %27, %29, %22 : vector<72x640xi1>, vector<72x640xf32>
    %c1_8 = arith.constant 1 : index
    %31 = memref.load %arg4[%c1_8] : memref<15xf32, #tpu.memory_space<smem>>
    %32 = vector.broadcast %31 : f32 to vector<72x640xf32>
    %33 = arith.select %27, %32, %25 : vector<72x640xi1>, vector<72x640xf32>
    %c2_i32 = arith.constant 2 : i32
    %34 = vector.broadcast %c2_i32 : i32 to vector<72x640xi32>
    %35 = arith.cmpi eq, %15, %34 : vector<72x640xi32>
    %c2_9 = arith.constant 2 : index
    %36 = memref.load %arg3[%c2_9] : memref<15xf32, #tpu.memory_space<smem>>
    %37 = vector.broadcast %36 : f32 to vector<72x640xf32>
    %38 = arith.select %35, %37, %30 : vector<72x640xi1>, vector<72x640xf32>
    %c2_10 = arith.constant 2 : index
    %39 = memref.load %arg4[%c2_10] : memref<15xf32, #tpu.memory_space<smem>>
    %40 = vector.broadcast %39 : f32 to vector<72x640xf32>
    %41 = arith.select %35, %40, %33 : vector<72x640xi1>, vector<72x640xf32>
    %c3_i32 = arith.constant 3 : i32
    %42 = vector.broadcast %c3_i32 : i32 to vector<72x640xi32>
    %43 = arith.cmpi eq, %15, %42 : vector<72x640xi32>
    %c3_11 = arith.constant 3 : index
    %44 = memref.load %arg3[%c3_11] : memref<15xf32, #tpu.memory_space<smem>>
    %45 = vector.broadcast %44 : f32 to vector<72x640xf32>
    %46 = arith.select %43, %45, %38 : vector<72x640xi1>, vector<72x640xf32>
    %c3_12 = arith.constant 3 : index
    %47 = memref.load %arg4[%c3_12] : memref<15xf32, #tpu.memory_space<smem>>
    %48 = vector.broadcast %47 : f32 to vector<72x640xf32>
    %49 = arith.select %43, %48, %41 : vector<72x640xi1>, vector<72x640xf32>
    %c4_i32 = arith.constant 4 : i32
    %50 = vector.broadcast %c4_i32 : i32 to vector<72x640xi32>
    %51 = arith.cmpi eq, %15, %50 : vector<72x640xi32>
    %c4_13 = arith.constant 4 : index
    %52 = memref.load %arg3[%c4_13] : memref<15xf32, #tpu.memory_space<smem>>
    %53 = vector.broadcast %52 : f32 to vector<72x640xf32>
    %54 = arith.select %51, %53, %46 : vector<72x640xi1>, vector<72x640xf32>
    %c4_14 = arith.constant 4 : index
    %55 = memref.load %arg4[%c4_14] : memref<15xf32, #tpu.memory_space<smem>>
    %56 = vector.broadcast %55 : f32 to vector<72x640xf32>
    %57 = arith.select %51, %56, %49 : vector<72x640xi1>, vector<72x640xf32>
    %c5_i32 = arith.constant 5 : i32
    %58 = vector.broadcast %c5_i32 : i32 to vector<72x640xi32>
    %59 = arith.cmpi eq, %15, %58 : vector<72x640xi32>
    %c5 = arith.constant 5 : index
    %60 = memref.load %arg3[%c5] : memref<15xf32, #tpu.memory_space<smem>>
    %61 = vector.broadcast %60 : f32 to vector<72x640xf32>
    %62 = arith.select %59, %61, %54 : vector<72x640xi1>, vector<72x640xf32>
    %c5_15 = arith.constant 5 : index
    %63 = memref.load %arg4[%c5_15] : memref<15xf32, #tpu.memory_space<smem>>
    %64 = vector.broadcast %63 : f32 to vector<72x640xf32>
    %65 = arith.select %59, %64, %57 : vector<72x640xi1>, vector<72x640xf32>
    %c6_i32 = arith.constant 6 : i32
    %66 = vector.broadcast %c6_i32 : i32 to vector<72x640xi32>
    %67 = arith.cmpi eq, %15, %66 : vector<72x640xi32>
    %c6 = arith.constant 6 : index
    %68 = memref.load %arg3[%c6] : memref<15xf32, #tpu.memory_space<smem>>
    %69 = vector.broadcast %68 : f32 to vector<72x640xf32>
    %70 = arith.select %67, %69, %62 : vector<72x640xi1>, vector<72x640xf32>
    %c6_16 = arith.constant 6 : index
    %71 = memref.load %arg4[%c6_16] : memref<15xf32, #tpu.memory_space<smem>>
    %72 = vector.broadcast %71 : f32 to vector<72x640xf32>
    %73 = arith.select %67, %72, %65 : vector<72x640xi1>, vector<72x640xf32>
    %c7_i32 = arith.constant 7 : i32
    %74 = vector.broadcast %c7_i32 : i32 to vector<72x640xi32>
    %75 = arith.cmpi eq, %15, %74 : vector<72x640xi32>
    %c7 = arith.constant 7 : index
    %76 = memref.load %arg3[%c7] : memref<15xf32, #tpu.memory_space<smem>>
    %77 = vector.broadcast %76 : f32 to vector<72x640xf32>
    %78 = arith.select %75, %77, %70 : vector<72x640xi1>, vector<72x640xf32>
    %c7_17 = arith.constant 7 : index
    %79 = memref.load %arg4[%c7_17] : memref<15xf32, #tpu.memory_space<smem>>
    %80 = vector.broadcast %79 : f32 to vector<72x640xf32>
    %81 = arith.select %75, %80, %73 : vector<72x640xi1>, vector<72x640xf32>
    %c8_i32 = arith.constant 8 : i32
    %82 = vector.broadcast %c8_i32 : i32 to vector<72x640xi32>
    %83 = arith.cmpi eq, %15, %82 : vector<72x640xi32>
    %c8 = arith.constant 8 : index
    %84 = memref.load %arg3[%c8] : memref<15xf32, #tpu.memory_space<smem>>
    %85 = vector.broadcast %84 : f32 to vector<72x640xf32>
    %86 = arith.select %83, %85, %78 : vector<72x640xi1>, vector<72x640xf32>
    %c8_18 = arith.constant 8 : index
    %87 = memref.load %arg4[%c8_18] : memref<15xf32, #tpu.memory_space<smem>>
    %88 = vector.broadcast %87 : f32 to vector<72x640xf32>
    %89 = arith.select %83, %88, %81 : vector<72x640xi1>, vector<72x640xf32>
    %c9_i32 = arith.constant 9 : i32
    %90 = vector.broadcast %c9_i32 : i32 to vector<72x640xi32>
    %91 = arith.cmpi eq, %15, %90 : vector<72x640xi32>
    %c9 = arith.constant 9 : index
    %92 = memref.load %arg3[%c9] : memref<15xf32, #tpu.memory_space<smem>>
    %93 = vector.broadcast %92 : f32 to vector<72x640xf32>
    %94 = arith.select %91, %93, %86 : vector<72x640xi1>, vector<72x640xf32>
    %c9_19 = arith.constant 9 : index
    %95 = memref.load %arg4[%c9_19] : memref<15xf32, #tpu.memory_space<smem>>
    %96 = vector.broadcast %95 : f32 to vector<72x640xf32>
    %97 = arith.select %91, %96, %89 : vector<72x640xi1>, vector<72x640xf32>
    %c10_i32 = arith.constant 10 : i32
    %98 = vector.broadcast %c10_i32 : i32 to vector<72x640xi32>
    %99 = arith.cmpi eq, %15, %98 : vector<72x640xi32>
    %c10 = arith.constant 10 : index
    %100 = memref.load %arg3[%c10] : memref<15xf32, #tpu.memory_space<smem>>
    %101 = vector.broadcast %100 : f32 to vector<72x640xf32>
    %102 = arith.select %99, %101, %94 : vector<72x640xi1>, vector<72x640xf32>
    %c10_20 = arith.constant 10 : index
    %103 = memref.load %arg4[%c10_20] : memref<15xf32, #tpu.memory_space<smem>>
    %104 = vector.broadcast %103 : f32 to vector<72x640xf32>
    %105 = arith.select %99, %104, %97 : vector<72x640xi1>, vector<72x640xf32>
    %c11_i32 = arith.constant 11 : i32
    %106 = vector.broadcast %c11_i32 : i32 to vector<72x640xi32>
    %107 = arith.cmpi eq, %15, %106 : vector<72x640xi32>
    %c11 = arith.constant 11 : index
    %108 = memref.load %arg3[%c11] : memref<15xf32, #tpu.memory_space<smem>>
    %109 = vector.broadcast %108 : f32 to vector<72x640xf32>
    %110 = arith.select %107, %109, %102 : vector<72x640xi1>, vector<72x640xf32>
    %c11_21 = arith.constant 11 : index
    %111 = memref.load %arg4[%c11_21] : memref<15xf32, #tpu.memory_space<smem>>
    %112 = vector.broadcast %111 : f32 to vector<72x640xf32>
    %113 = arith.select %107, %112, %105 : vector<72x640xi1>, vector<72x640xf32>
    %c12_i32 = arith.constant 12 : i32
    %114 = vector.broadcast %c12_i32 : i32 to vector<72x640xi32>
    %115 = arith.cmpi eq, %15, %114 : vector<72x640xi32>
    %c12 = arith.constant 12 : index
    %116 = memref.load %arg3[%c12] : memref<15xf32, #tpu.memory_space<smem>>
    %117 = vector.broadcast %116 : f32 to vector<72x640xf32>
    %118 = arith.select %115, %117, %110 : vector<72x640xi1>, vector<72x640xf32>
    %c12_22 = arith.constant 12 : index
    %119 = memref.load %arg4[%c12_22] : memref<15xf32, #tpu.memory_space<smem>>
    %120 = vector.broadcast %119 : f32 to vector<72x640xf32>
    %121 = arith.select %115, %120, %113 : vector<72x640xi1>, vector<72x640xf32>
    %c13_i32 = arith.constant 13 : i32
    %122 = vector.broadcast %c13_i32 : i32 to vector<72x640xi32>
    %123 = arith.cmpi eq, %15, %122 : vector<72x640xi32>
    %c13 = arith.constant 13 : index
    %124 = memref.load %arg3[%c13] : memref<15xf32, #tpu.memory_space<smem>>
    %125 = vector.broadcast %124 : f32 to vector<72x640xf32>
    %126 = arith.select %123, %125, %118 : vector<72x640xi1>, vector<72x640xf32>
    %c13_23 = arith.constant 13 : index
    %127 = memref.load %arg4[%c13_23] : memref<15xf32, #tpu.memory_space<smem>>
    %128 = vector.broadcast %127 : f32 to vector<72x640xf32>
    %129 = arith.select %123, %128, %121 : vector<72x640xi1>, vector<72x640xf32>
    %c14_i32_24 = arith.constant 14 : i32
    %130 = vector.broadcast %c14_i32_24 : i32 to vector<72x640xi32>
    %131 = arith.cmpi eq, %15, %130 : vector<72x640xi32>
    %c14 = arith.constant 14 : index
    %132 = memref.load %arg3[%c14] : memref<15xf32, #tpu.memory_space<smem>>
    %133 = vector.broadcast %132 : f32 to vector<72x640xf32>
    %134 = arith.select %131, %133, %126 : vector<72x640xi1>, vector<72x640xf32>
    %c14_25 = arith.constant 14 : index
    %135 = memref.load %arg4[%c14_25] : memref<15xf32, #tpu.memory_space<smem>>
    %136 = vector.broadcast %135 : f32 to vector<72x640xf32>
    %137 = arith.select %131, %136, %129 : vector<72x640xi1>, vector<72x640xf32>
    %138 = arith.mulf %134, %0 : vector<72x640xf32>
    %139 = arith.addf %137, %138 : vector<72x640xf32>
    %140 = vector.broadcast %2 : f32 to vector<72x640xf32>
    %141 = arith.cmpf ogt, %0, %140 : vector<72x640xf32>
    %142 = vector.broadcast %1 : f32 to vector<72x640xf32>
    %143 = arith.cmpf olt, %0, %142 : vector<72x640xf32>
    %144 = vector.broadcast %4 : f32 to vector<72x640xf32>
    %145 = arith.select %143, %144, %139 : vector<72x640xi1>, vector<72x640xf32>
    %146 = vector.broadcast %5 : f32 to vector<72x640xf32>
    %147 = arith.select %141, %146, %145 : vector<72x640xi1>, vector<72x640xf32>
    %c0_26 = arith.constant 0 : index
    %c0_27 = arith.constant 0 : index
    %148 = vector.load %arg6[%c0_26, %c0_27] : memref<72x640xf32, #tpu.memory_space<vmem>>, vector<72x640xf32>
    tpu.vector_store %arg6[%c0_26, %c0_27], %147 {strides = array<i32>} : memref<72x640xf32, #tpu.memory_space<vmem>>, vector<72x640xf32>,
    return
  }
  func.func @transform_0(%arg0: i32, %arg1: i32) -> i32 {
    %c0_i32 = arith.constant 0 : i32
    %c0_i32_0 = arith.constant 0 : i32
    return %c0_i32 : i32
  }
  func.func @transform_1(%arg0: i32, %arg1: i32) -> i32 {
    %c0_i32 = arith.constant 0 : i32
    %c0_i32_0 = arith.constant 0 : i32
    return %c0_i32 : i32
  }
  func.func @transform_2(%arg0: i32, %arg1: i32) -> i32 {
    %c0_i32 = arith.constant 0 : i32
    %c0_i32_0 = arith.constant 0 : i32
    return %c0_i32 : i32
  }
  func.func @transform_3(%arg0: i32, %arg1: i32) -> (i32, i32) {
    %c0_i32 = arith.constant 0 : i32
    return %arg0, %arg1 : i32, i32
  }
  func.func @transform_4(%arg0: i32, %arg1: i32) -> (i32, i32) {
    %c0_i32 = arith.constant 0 : i32
    return %arg0, %arg1 : i32, i32
  }
}

</mosaic_0001>

<bundles_post_ra>
// kernel: tpu_custom_call.1
= control target key start
LH: loop header
LB: loop body
LE: loop exit
PB: predicated region body
PF: predicated region fallthrough
CT: control target
= control target key end

     0   :  { %9 = vsyncpa [#allocation5], 0  ;;  %s6628_s0 = inlined_call_operand.hbm [shape: f32[5], index: 0, kind: input, shape index: {}]   ;;  %s6629_s1 = inlined_call_operand.hbm [shape: f32[15], index: 1, kind: input, shape index: {}]   ;;  %s6630_s2 = inlined_call_operand.vmem [shape: f32[15], index: 2, kind: input, shape index: {}]   ;;  %s6631_s3 = inlined_call_operand.hbm [shape: f32[72,640], index: 3, kind: input, shape index: {}]   ;;  %s6632_s4 = inlined_call_operand.hbm [shape: f32[72,640], index: 4, kind: output, shape index: {}]  }
   0x1   :  { %10 = vsyncpa [#allocation8], 0 }
   0x2   :  { %11 = vsyncpa [#allocation6], 0 }
   0x3   :  { %12 = vsyncpa [#allocation3], 0 }
   0x4   :  { %13 = vsyncpa [#allocation4], 0  ;;  %s19_s17 = sshll.u32 %s6628_s0, 4  ;;  %s28_s20 = sshll.u32 %s6629_s1, 4  ;;  %s20_s17 = int_to_ptr.hbm [resolvable:$true] %s19_s17  ;;  %s29_s20 = int_to_ptr.hbm [resolvable:$true] %s28_s20 }
   0x5   :  { %s3176_s21 = smov [#allocation2]   ;;  %s3177_s22 = smov [#allocation7]  }
   0x6   :  { %22 = dma.hbm_to_smem %s20_s17, 16, %s3176_s21, [#allocation5]  }
   0x7   :  { %31 = dma.hbm_to_smem %s29_s20, 16, %s3177_s22, [#allocation8]  }
   0x8   :  { %s37_s25 = sshll.u32 %s6630_s2, 4  ;;  %s45_s28 = sshll.u32 %s6631_s3, 4  ;;  %s38_s25 = int_to_ptr.vmem [resolvable:$true] %s37_s25  ;;  %s46_s28 = int_to_ptr.hbm [resolvable:$true] %s45_s28 }
   0x9   :  { %s3178_s0 = smov [#allocation9]   ;;  %s3179_s29 = smov [#allocation10]  }
   0xa   :  { %40 = dma.vmem_to_smem %s38_s25, 16, %s3178_s0, [#allocation6]  }
   0xb   :  { %s47_s30 = sshll.u32 %s3179_s29, 4  ;;  %s3180_s1 = smov 640   ;;  %s48_s30 = int_to_ptr.vmem [resolvable:$true] %s47_s30 }
   0xc   :  { %s3181_s5 = smov 40  }
   0xd   :  { %53 = dma.hbm_to_vmem [thread:$0]  %s46_s28, 5760, %s48_s30, [#allocation3], %s3180_s1, %s3180_s1, %s3181_s5  }
   0xe   :  { %3166 = dma.done.wait [#allocation5], 16  }
   0xf   :  { %3167 = vsyncadd [#allocation5], 4294967280 }
  0x10   :  { %3168 = dma.done.wait [#allocation8], 16  }
  0x11   :  { %3169 = vsyncadd [#allocation8], 4294967280 }
  0x12   :  { %3170 = dma.done.wait [#allocation6], 16  }
  0x13   :  { %3171 = vsyncadd [#allocation6], 4294967280 }
  0x14   :  { %3172 = dma.done.wait [#allocation3], 5760  }
  0x15   :  { %3173 = vsyncadd [#allocation3], 4294961536 }
  0x16   :  { %70 = sfence }
  0x17   :  { %s3223_s2 = sld [smem:[#allocation2]]  ;;  %v3231_v0 = vld [vmem:[#allocation10] sm:$0xff]  ;;  %v3233_v1 = vld [vmem:[#allocation10 + $0x8] sm:$0xff]  ;;  %v3235_v2 = vld [vmem:[#allocation10 + $0x10] sm:$0xff] }
  0x18   :  { %s3225_s3 = sld [smem:[#allocation2 + $0x1]]  ;;  %v3237_v3 = vld [vmem:[#allocation10 + $0x18] sm:$0xff] }
  0x19   :  { %s2909_s6 = sld [smem:[#allocation2 + $0x2]] }
  0x1a   :  { %s3227_s7 = sld [smem:[#allocation2 + $0x3]] }
  0x1b   :  { %s3229_s8 = sld [smem:[#allocation2 + $0x4]] }
  0x1c   :  { %s527_s9 = sld [smem:[#allocation7]] }
  0x1d   :  { %s574_s10 = sld [smem:[#allocation9]]  ;;  %v3265_v17 = vstv %s3223_s2 }
  0x1e   :  { %s2957_s11 = sld [smem:[#allocation7 + $0x1]]  ;;  %v3262_v16 = vstv %s3225_s3 }
  0x1f   :  { %v3239_v4 = vstv %s2909_s6  ;;  %s2958_s12 = sld [smem:[#allocation9 + $0x1]] }
  0x20   :  { %v122_v5 = vmul.f32 %v3239_v4, %v3231_v0  ;;  %s3243_s13 = sld [smem:[#allocation7 + $0x2]]  ;;  %v123_v6 = vmul.f32 %v3239_v4, %v3233_v1  ;;  %v124_v7 = vmul.f32 %v3239_v4, %v3235_v2  ;;  %v125_v8 = vmul.f32 %v3239_v4, %v3237_v3 }
  0x21   :  { %s3247_s14 = sld [smem:[#allocation9 + $0x2]]  ;;  %v3274_v21 = vstv %s3227_s7  ;;  %v3281_v24 = vstv %s3229_s8 }
  0x22   :  { %v167_v9 = vceil.f32 %v122_v5  ;;  %s2961_s15 = sld [smem:[#allocation7 + $0x3]]  ;;  %v168_v11 = vceil.f32 %v123_v6  ;;  %v3255_v12 = vstv %s527_s9  ;;  %v169_v13 = vceil.f32 %v124_v7 }
  0x23   :  { %s2962_s16 = sld [smem:[#allocation9 + $0x3]]  ;;  %v170_v14 = vceil.f32 %v125_v8  ;;  %v3267_v19 = vstv %s574_s10 }
  0x24   :  { %v2986_v10 = vcvt.f32.s32 %v167_v9  ;;  %s3253_s17 = sld [smem:[#allocation7 + $0x4]]  ;;  %v2988_v18 = vcvt.f32.s32 %v168_v11  ;;  %v3269_v20 = vstv %s2957_s11  ;;  %v2990_v22 = vcvt.f32.s32 %v169_v13  ;;  %s3182_s11 = smov [#allocation11]  }
  0x25   :  { %s3257_s18 = sld [smem:[#allocation9 + $0x4]]  ;;  %v3276_v23 = vstv %s2958_s12  ;;  %v3293_v29 = vcvt.f32.s32 %v170_v14  ;;  %s2890_s12 = sshll.u32 %s3182_s11, 4  ;;  %s2891_s12 = int_to_ptr.vmem [resolvable:$true] %s2890_s12 }
  0x26   :  { %v2912_v15 = vadd.s32 4294967295, %v2986_v10  ;;  %s3259_s19 = sld [smem:[#allocation7 + $0x5]]  ;;  %v3283_v25 = vadd.s32 4294967295, %v2988_v18  ;;  %v3286_v27 = vstv %s3243_s13  ;;  %v3301_v32 = vadd.s32 4294967295, %v2990_v22 }
  0x27   :  { %s3271_s20 = sld [smem:[#allocation9 + $0x5]]  ;;  %v3289_v28 = vstv %s3247_s14  ;;  %v3404_v11 = vadd.s32 4294967295, %v3293_v29 }
  0x28   :  { %vm302_vm0 = vcmp.gt.s32.totalorder %v2912_v15, 0  ;;  %s3278_s21 = sld [smem:[#allocation7 + $0x6]]  ;;  %v3295_v30 = vstv %s2961_s15  ;;  %vm304_vm2 = vcmp.gt.s32.totalorder %v3283_v25, 0  ;;  %s2892_s15 = sshll.u32 %s6632_s4, 4  ;;  %s2893_s15 = int_to_ptr.hbm [resolvable:$true] %s2892_s15 }
  0x29   :  { %v303_v26 = vsel %vm302_vm0, %v2912_v15, 0  ;;  %s3291_s22 = sld [smem:[#allocation9 + $0x6]]  ;;  %v3297_v31 = vstv %s2962_s16  ;;  %v305_v5 = vsel %vm304_vm2, %v3283_v25, 0 }
  0x2a   :  { %vm392_vm1 = vcmp.lt.s32.totalorder %v303_v26, 14  ;;  %s3299_s23 = sld [smem:[#allocation7 + $0x7]]  ;;  %v3306_v34 = vstv %s3253_s17 }
  0x2b   :  { %v3303_v33 = vsel %vm392_vm1, %v303_v26, 14  ;;  %v3309_v35 = vstv %s3257_s18  ;;  %s3311_s24 = sld [smem:[#allocation9 + $0x7]]  ;;  %vm394_vm1 = vcmp.lt.s32.totalorder %v305_v5, 14 }
  0x2c   :  { %vm482_vm3 = vcmp.eq.s32.totalorder %v3303_v33, 0  ;;  %vm621_vm4 = vcmp.eq.s32.totalorder %v3303_v33, 1  ;;  %vm760_vm5 = vcmp.eq.s32.totalorder %v3303_v33, 2  ;;  %vm899_vm6 = vcmp.eq.s32.totalorder %v3303_v33, 3  ;;  %s2971_s25 = sld [smem:[#allocation7 + $0x8]] }
  0x2d   :  { %v529_v36 = vsel %vm482_vm3, %v3255_v12, 0.0  ;;  %v576_v37 = vsel %vm482_vm3, %v3267_v19, 0.0  ;;  %vm1038_vm7 = vcmp.eq.s32.totalorder %v3303_v33, 4  ;;  %vm1177_vm8 = vcmp.eq.s32.totalorder %v3303_v33, 5  ;;  %s2972_s26 = sld [smem:[#allocation9 + $0x8]] }
  0x2e   :  { %v668_v38 = vsel %vm621_vm4, %v3269_v20, %v529_v36  ;;  %v715_v39 = vsel %vm621_vm4, %v3276_v23, %v576_v37  ;;  %v3325_v40 = vstv %s3259_s19  ;;  %v3328_v41 = vstv %s3271_s20  ;;  %s2973_s27 = sld [smem:[#allocation7 + $0x9]] }
  0x2f   :  { %v807_v42 = vsel %vm760_vm5, %v3286_v27, %v668_v38  ;;  %v854_v43 = vsel %vm760_vm5, %v3289_v28, %v715_v39  ;;  %vm1316_vm9 = vcmp.eq.s32.totalorder %v3303_v33, 6  ;;  %v3334_v44 = vstv %s3278_s21  ;;  %s2974_s28 = sld [smem:[#allocation9 + $0x9]] }
  0x30   :  { %v946_v45 = vsel %vm899_vm6, %v3295_v30, %v807_v42  ;;  %v993_v46 = vsel %vm899_vm6, %v3297_v31, %v854_v43  ;;  %v3343_v47 = vstv %s3291_s22  ;;  %vm1455_vm10 = vcmp.eq.s32.totalorder %v3303_v33, 7  ;;  %s2975_s0 = sld [smem:[#allocation7 + $0xa]] }
  0x31   :  { %v1085_v48 = vsel %vm1038_vm7, %v3306_v34, %v946_v45  ;;  %v1132_v49 = vsel %vm1038_vm7, %v3309_v35, %v993_v46  ;;  %v3353_v50 = vstv %s3299_s23  ;;  %v3356_v51 = vstv %s3311_s24  ;;  %s2976_s29 = sld [smem:[#allocation9 + $0xa]] }
  0x32   :  { %v1224_v52 = vsel %vm1177_vm8, %v3325_v40, %v1085_v48  ;;  %v1271_v53 = vsel %vm1177_vm8, %v3328_v41, %v1132_v49  ;;  %vm1594_vm11 = vcmp.eq.s32.totalorder %v3303_v33, 8  ;;  %v3365_v54 = vstv %s2971_s25  ;;  %s2977_s30 = sld [smem:[#allocation7 + $0xb]] }
  0x33   :  { %v1363_v55 = vsel %vm1316_vm9, %v3334_v44, %v1224_v52  ;;  %v1410_v56 = vsel %vm1316_vm9, %v3343_v47, %v1271_v53  ;;  %v3373_v57 = vstv %s2972_s26  ;;  %vm1733_vm12 = vcmp.eq.s32.totalorder %v3303_v33, 9  ;;  %s2978_s2 = sld [smem:[#allocation9 + $0xb]] }
  0x34   :  { %v1502_v58 = vsel %vm1455_vm10, %v3353_v50, %v1363_v55  ;;  %v1549_v59 = vsel %vm1455_vm10, %v3356_v51, %v1410_v56  ;;  %v3382_v60 = vstv %s2973_s27  ;;  %vm1872_vm13 = vcmp.eq.s32.totalorder %v3303_v33, 10  ;;  %s2979_s3 = sld [smem:[#allocation7 + $0xc]] }
  0x35   :  { %v1641_v61 = vsel %vm1594_vm11, %v3365_v54, %v1502_v58  ;;  %v1688_v62 = vsel %vm1594_vm11, %v3373_v57, %v1549_v59  ;;  %v3387_v63 = vstv %s2974_s28  ;;  %s2980_s6 = sld [smem:[#allocation9 + $0xc]]  ;;  %vm2011_vm14 = vcmp.eq.s32.totalorder %v3303_v33, 11 }
  0x36   :  { %v1780_v6 = vsel %vm1733_vm12, %v3382_v60, %v1641_v61  ;;  %v1827_v7 = vsel %vm1733_vm12, %v3387_v63, %v1688_v62  ;;  %v3394_v8 = vstv %s2975_s0  ;;  %s2981_s7 = sld [smem:[#allocation7 + $0xd]]  ;;  %vm2150_vm15 = vcmp.eq.s32.totalorder %v3303_v33, 12 }
  0x37   :  { %v1919_v9 = vsel %vm1872_vm13, %v3394_v8, %v1780_v6  ;;  %v3400_v10 = vstv %s2976_s29  ;;  %s2982_s8 = sld [smem:[#allocation9 + $0xd]]  ;;  %vm2289_vm0 = vcmp.eq.s32.totalorder %v3303_v33, 13  ;;  %vm2428_vm2 = vcmp.eq.s32.totalorder %v3303_v33, 14 }
  0x38   :  { %v1966_v13 = vsel %vm1872_vm13, %v3400_v10, %v1827_v7  ;;  %v3409_v14 = vstv %s2977_s30  ;;  %s2983_s9 = sld [smem:[#allocation7 + $0xe]]  ;;  %vm2704_vm3 = vcmp.lt.f32.partialorder %v3231_v0, %v3265_v17  ;;  %v3420_v22 = vsel %vm394_vm1, %v305_v5, 14 }
  0x39   :  { %v2058_v15 = vsel %vm2011_vm14, %v3409_v14, %v1919_v9  ;;  %v3415_v18 = vstv %s2978_s2  ;;  %s2984_s10 = sld [smem:[#allocation9 + $0xe]]  ;;  %vm2658_vm4 = vcmp.gt.f32.partialorder %v3231_v0, %v3262_v16  ;;  %vm483_vm5 = vcmp.eq.s32.totalorder %v3420_v22, 0 }
  0x3a   :  { %v2105_v25 = vsel %vm2011_vm14, %v3415_v18, %v1966_v13  ;;  %v3425_v26 = vstv %s2979_s3  ;;  %vm622_vm6 = vcmp.eq.s32.totalorder %v3420_v22, 1  ;;  %v530_v37 = vsel %vm483_vm5, %v3255_v12, 0.0 }
  0x3b   :  { %v2197_v29 = vsel %vm2150_vm15, %v3425_v26, %v2058_v15  ;;  %v3434_v36 = vstv %s2980_s6  ;;  %v577_v38 = vsel %vm483_vm5, %v3267_v19, 0.0  ;;  %v669_v43 = vsel %vm622_vm6, %v3269_v20, %v530_v37 }
  0x3c   :  { %v2244_v39 = vsel %vm2150_vm15, %v3434_v36, %v2105_v25  ;;  %v3441_v42 = vstv %s2981_s7  ;;  %v716_v45 = vsel %vm622_vm6, %v3276_v23, %v577_v38  ;;  %vm761_vm7 = vcmp.eq.s32.totalorder %v3420_v22, 2 }
  0x3d   :  { %v2336_v46 = vsel %vm2289_vm0, %v3441_v42, %v2197_v29  ;;  %v3448_v48 = vstv %s2982_s8  ;;  %vm900_vm8 = vcmp.eq.s32.totalorder %v3420_v22, 3  ;;  %v808_v53 = vsel %vm761_vm7, %v3286_v27, %v669_v43 }
  0x3e   :  { %v2383_v49 = vsel %vm2289_vm0, %v3448_v48, %v2244_v39  ;;  %v3455_v52 = vstv %s2983_s9  ;;  %v855_v55 = vsel %vm761_vm7, %v3289_v28, %v716_v45  ;;  %v947_v59 = vsel %vm900_vm8, %v3295_v30, %v808_v53 }
  0x3f   :  { %v2475_v56 = vsel %vm2428_vm2, %v3455_v52, %v2336_v46  ;;  %v3462_v58 = vstv %s2984_s10  ;;  %v994_v61 = vsel %vm900_vm8, %v3297_v31, %v855_v55  ;;  %vm1039_vm9 = vcmp.eq.s32.totalorder %v3420_v22, 4 }
  0x40   :  { %v2522_v62 = vsel %vm2428_vm2, %v3462_v58, %v2383_v49  ;;  %v2567_v5 = vmul.f32 %v2475_v56, %v3231_v0  ;;  %vm1178_vm10 = vcmp.eq.s32.totalorder %v3420_v22, 5  ;;  %v1086_v6 = vsel %vm1039_vm9, %v3306_v34, %v947_v59 }
  0x41   :  { %v1133_v7 = vsel %vm1039_vm9, %v3309_v35, %v994_v61  ;;  %vm1317_vm11 = vcmp.eq.s32.totalorder %v3420_v22, 6  ;;  %vm1456_vm12 = vcmp.eq.s32.totalorder %v3420_v22, 7  ;;  %v1225_v13 = vsel %vm1178_vm10, %v3325_v40, %v1086_v6 }
  0x42   :  { %v2612_v9 = vadd.f32 %v2567_v5, %v2522_v62  ;;  %v1272_v33 = vsel %vm1178_vm10, %v3328_v41, %v1133_v7  ;;  %vm1595_vm13 = vcmp.eq.s32.totalorder %v3420_v22, 8  ;;  %v1364_v15 = vsel %vm1317_vm11, %v3334_v44, %v1225_v13 }
  0x43   :  { %v1411_v25 = vsel %vm1317_vm11, %v3343_v47, %v1272_v33  ;;  %vm1734_vm14 = vcmp.eq.s32.totalorder %v3420_v22, 9  ;;  %vm306_vm15 = vcmp.gt.s32.totalorder %v3301_v32, 0  ;;  %v1503_v37 = vsel %vm1456_vm12, %v3353_v50, %v1364_v15 }
  0x44   :  { %v2750_v29 = vsel %vm2704_vm3, %v3274_v21, %v2612_v9  ;;  %v1550_v38 = vsel %vm1456_vm12, %v3356_v51, %v1411_v25  ;;  %vm1873_vm0 = vcmp.eq.s32.totalorder %v3420_v22, 10  ;;  %v1642_v43 = vsel %vm1595_vm13, %v3365_v54, %v1503_v37 }
  0x45   :  { %v2796_v39 = vsel %vm2658_vm4, %v3281_v24, %v2750_v29  ;;  %v1689_v45 = vsel %vm1595_vm13, %v3373_v57, %v1550_v38  ;;  %vm2012_vm1 = vcmp.eq.s32.totalorder %v3420_v22, 11  ;;  %v1781_v46 = vsel %vm1734_vm14, %v3382_v60, %v1642_v43 }
  0x46   :  { %2841 = vst [vmem:[#allocation11] sm:$0xff] %v2796_v39  ;;  %v1828_v49 = vsel %vm1734_vm14, %v3387_v63, %v1689_v45  ;;  %vm2151_vm2 = vcmp.eq.s32.totalorder %v3420_v22, 12  ;;  %vm2659_vm3 = vcmp.gt.f32.partialorder %v3233_v1, %v3262_v16  ;;  %vm2705_vm5 = vcmp.lt.f32.partialorder %v3233_v1, %v3265_v17 }
  0x47   :  { %v1920_v0 = vsel %vm1873_vm0, %v3394_v8, %v1781_v46  ;;  %v1967_v53 = vsel %vm1873_vm0, %v3400_v10, %v1828_v49  ;;  %vm2290_vm4 = vcmp.eq.s32.totalorder %v3420_v22, 13  ;;  %v307_v55 = vsel %vm306_vm15, %v3301_v32, 0 }
  0x48   :  { %v2059_v56 = vsel %vm2012_vm1, %v3409_v14, %v1920_v0  ;;  %v2106_v59 = vsel %vm2012_vm1, %v3415_v18, %v1967_v53  ;;  %vm2429_vm6 = vcmp.eq.s32.totalorder %v3420_v22, 14  ;;  %vm396_vm7 = vcmp.lt.s32.totalorder %v307_v55, 14 }
  0x49   :  { %v2198_v61 = vsel %vm2151_vm2, %v3425_v26, %v2059_v56  ;;  %v2245_v62 = vsel %vm2151_vm2, %v3434_v36, %v2106_v59  ;;  %v3515_v5 = vsel %vm396_vm7, %v307_v55, 14  ;;  %vm308_vm8 = vcmp.gt.s32.totalorder %v3404_v11, 0 }
  0x4a   :  { %v2337_v6 = vsel %vm2290_vm4, %v3441_v42, %v2198_v61  ;;  %v2384_v7 = vsel %vm2290_vm4, %v3448_v48, %v2245_v62  ;;  %vm484_vm9 = vcmp.eq.s32.totalorder %v3515_v5, 0  ;;  %vm623_vm10 = vcmp.eq.s32.totalorder %v3515_v5, 1 }
  0x4b   :  { %v2476_v32 = vsel %vm2429_vm6, %v3455_v52, %v2337_v6  ;;  %v2523_v22 = vsel %vm2429_vm6, %v3462_v58, %v2384_v7  ;;  %v531_v9 = vsel %vm484_vm9, %v3255_v12, 0.0  ;;  %v578_v13 = vsel %vm484_vm9, %v3267_v19, 0.0 }
  0x4c   :  { %v2568_v33 = vmul.f32 %v2476_v32, %v3233_v1  ;;  %v670_v15 = vsel %vm623_vm10, %v3269_v20, %v531_v9  ;;  %v717_v25 = vsel %vm623_vm10, %v3276_v23, %v578_v13  ;;  %vm762_vm11 = vcmp.eq.s32.totalorder %v3515_v5, 2 }
  0x4d   :  { %v809_v29 = vsel %vm762_vm11, %v3286_v27, %v670_v15  ;;  %v856_v37 = vsel %vm762_vm11, %v3289_v28, %v717_v25  ;;  %vm901_vm12 = vcmp.eq.s32.totalorder %v3515_v5, 3  ;;  %vm1040_vm13 = vcmp.eq.s32.totalorder %v3515_v5, 4 }
  0x4e   :  { %v2613_v38 = vadd.f32 %v2568_v33, %v2523_v22  ;;  %v948_v39 = vsel %vm901_vm12, %v3295_v30, %v809_v29  ;;  %v995_v43 = vsel %vm901_vm12, %v3297_v31, %v856_v37  ;;  %vm1179_vm14 = vcmp.eq.s32.totalorder %v3515_v5, 5 }
  0x4f   :  { %v1087_v45 = vsel %vm1040_vm13, %v3306_v34, %v948_v39  ;;  %v1134_v46 = vsel %vm1040_vm13, %v3309_v35, %v995_v43  ;;  %vm1318_vm15 = vcmp.eq.s32.totalorder %v3515_v5, 6  ;;  %vm1457_vm0 = vcmp.eq.s32.totalorder %v3515_v5, 7 }
  0x50   :  { %v2751_v49 = vsel %vm2705_vm5, %v3274_v21, %v2613_v38  ;;  %v1226_v0 = vsel %vm1179_vm14, %v3325_v40, %v1087_v45  ;;  %v1273_v53 = vsel %vm1179_vm14, %v3328_v41, %v1134_v46  ;;  %vm1596_vm1 = vcmp.eq.s32.totalorder %v3515_v5, 8 }
  0x51   :  { %v2797_v55 = vsel %vm2659_vm3, %v3281_v24, %v2751_v49  ;;  %v1365_v56 = vsel %vm1318_vm15, %v3334_v44, %v1226_v0  ;;  %v1412_v59 = vsel %vm1318_vm15, %v3343_v47, %v1273_v53  ;;  %vm1735_vm2 = vcmp.eq.s32.totalorder %v3515_v5, 9 }
  0x52   :  { %2842 = vst [vmem:[#allocation11 + $0x8] sm:$0xff] %v2797_v55  ;;  %v1504_v61 = vsel %vm1457_vm0, %v3353_v50, %v1365_v56  ;;  %v1551_v62 = vsel %vm1457_vm0, %v3356_v51, %v1412_v59  ;;  %vm1874_vm5 = vcmp.eq.s32.totalorder %v3515_v5, 10  ;;  %vm2013_vm4 = vcmp.eq.s32.totalorder %v3515_v5, 11 }
  0x53   :  { %v1643_v6 = vsel %vm1596_vm1, %v3365_v54, %v1504_v61  ;;  %v1690_v7 = vsel %vm1596_vm1, %v3373_v57, %v1551_v62  ;;  %vm2152_vm3 = vcmp.eq.s32.totalorder %v3515_v5, 12  ;;  %vm2660_vm6 = vcmp.gt.f32.partialorder %v3235_v2, %v3262_v16 }
  0x54   :  { %v1782_v1 = vsel %vm1735_vm2, %v3382_v60, %v1643_v6  ;;  %v1829_v32 = vsel %vm1735_vm2, %v3387_v63, %v1690_v7  ;;  %v309_v22 = vsel %vm308_vm8, %v3404_v11, 0  ;;  %vm2291_vm7 = vcmp.eq.s32.totalorder %v3515_v5, 13 }
  0x55   :  { %v1921_v9 = vsel %vm1874_vm5, %v3394_v8, %v1782_v1  ;;  %v1968_v13 = vsel %vm1874_vm5, %v3400_v10, %v1829_v32  ;;  %vm398_vm9 = vcmp.lt.s32.totalorder %v309_v22, 14  ;;  %vm2430_vm10 = vcmp.eq.s32.totalorder %v3515_v5, 14 }
  0x56   :  { %v2060_v33 = vsel %vm2013_vm4, %v3409_v14, %v1921_v9  ;;  %v2107_v15 = vsel %vm2013_vm4, %v3415_v18, %v1968_v13  ;;  %v3575_v25 = vsel %vm398_vm9, %v309_v22, 14  ;;  %vm2706_vm15 = vcmp.lt.f32.partialorder %v3235_v2, %v3265_v17  ;;  %v3608_v22 = vld [vmem:[#allocation10 + $0x20] sm:$0xff] }
  0x57   :  { %v2199_v29 = vsel %vm2152_vm3, %v3425_v26, %v2060_v33  ;;  %v2246_v37 = vsel %vm2152_vm3, %v3434_v36, %v2107_v15  ;;  %vm485_vm8 = vcmp.eq.s32.totalorder %v3575_v25, 0  ;;  %vm624_vm11 = vcmp.eq.s32.totalorder %v3575_v25, 1 }
  0x58   :  { %v2338_v11 = vsel %vm2291_vm7, %v3441_v42, %v2199_v29  ;;  %v2385_v38 = vsel %vm2291_vm7, %v3448_v48, %v2246_v37  ;;  %v532_v39 = vsel %vm485_vm8, %v3255_v12, 0.0  ;;  %v579_v43 = vsel %vm485_vm8, %v3267_v19, 0.0  ;;  %v3621_v37 = vld [vmem:[#allocation10 + $0x28] sm:$0xff] }
  0x59   :  { %v2477_v5 = vsel %vm2430_vm10, %v3455_v52, %v2338_v11  ;;  %v2524_v45 = vsel %vm2430_vm10, %v3462_v58, %v2385_v38  ;;  %v671_v46 = vsel %vm624_vm11, %v3269_v20, %v532_v39  ;;  %v718_v49 = vsel %vm624_vm11, %v3276_v23, %v579_v43  ;;  %v3628_v39 = vld [vmem:[#allocation10 + $0x30] sm:$0xff]  ;;  %v3630_v43 = vld [vmem:[#allocation10 + $0x38] sm:$0xff] }
  0x5a   :  { %v2569_v0 = vmul.f32 %v2477_v5, %v3235_v2  ;;  %vm763_vm12 = vcmp.eq.s32.totalorder %v3575_v25, 2  ;;  %vm902_vm13 = vcmp.eq.s32.totalorder %v3575_v25, 3  ;;  %vm1041_vm14 = vcmp.eq.s32.totalorder %v3575_v25, 4 }
  0x5b   :  { %v810_v53 = vsel %vm763_vm12, %v3286_v27, %v671_v46  ;;  %v857_v55 = vsel %vm763_vm12, %v3289_v28, %v718_v49  ;;  %vm1180_vm0 = vcmp.eq.s32.totalorder %v3575_v25, 5  ;;  %vm1319_vm1 = vcmp.eq.s32.totalorder %v3575_v25, 6 }
  0x5c   :  { %v2614_v56 = vadd.f32 %v2569_v0, %v2524_v45  ;;  %v949_v59 = vsel %vm902_vm13, %v3295_v30, %v810_v53  ;;  %v996_v61 = vsel %vm902_vm13, %v3297_v31, %v857_v55  ;;  %vm1458_vm2 = vcmp.eq.s32.totalorder %v3575_v25, 7 }
  0x5d   :  { %v1088_v62 = vsel %vm1041_vm14, %v3306_v34, %v949_v59  ;;  %v1135_v6 = vsel %vm1041_vm14, %v3309_v35, %v996_v61  ;;  %vm1597_vm5 = vcmp.eq.s32.totalorder %v3575_v25, 8  ;;  %vm1736_vm4 = vcmp.eq.s32.totalorder %v3575_v25, 9 }
  0x5e   :  { %v2752_v7 = vsel %vm2706_vm15, %v3274_v21, %v2614_v56  ;;  %v1227_v1 = vsel %vm1180_vm0, %v3325_v40, %v1088_v62  ;;  %v1274_v32 = vsel %vm1180_vm0, %v3328_v41, %v1135_v6  ;;  %vm1875_vm3 = vcmp.eq.s32.totalorder %v3575_v25, 10 }
  0x5f   :  { %v2798_v9 = vsel %vm2660_vm6, %v3281_v24, %v2752_v7  ;;  %v1366_v13 = vsel %vm1319_vm1, %v3334_v44, %v1227_v1  ;;  %v1413_v33 = vsel %vm1319_vm1, %v3343_v47, %v1274_v32  ;;  %vm2014_vm7 = vcmp.eq.s32.totalorder %v3575_v25, 11 }
  0x60   :  { %2843 = vst [vmem:[#allocation11 + $0x10] sm:$0xff] %v2798_v9  ;;  %v1505_v15 = vsel %vm1458_vm2, %v3353_v50, %v1366_v13  ;;  %v1552_v29 = vsel %vm1458_vm2, %v3356_v51, %v1413_v33  ;;  %vm2153_vm6 = vcmp.eq.s32.totalorder %v3575_v25, 12  ;;  %v126_v38 = vmul.f32 %v3239_v4, %v3608_v22 }
  0x61   :  { %v1644_v2 = vsel %vm1597_vm5, %v3365_v54, %v1505_v15  ;;  %v1691_v11 = vsel %vm1597_vm5, %v3373_v57, %v1552_v29  ;;  %vm2292_vm9 = vcmp.eq.s32.totalorder %v3575_v25, 13  ;;  %vm2431_vm10 = vcmp.eq.s32.totalorder %v3575_v25, 14 }
  0x62   :  { %v1783_v5 = vsel %vm1736_vm4, %v3382_v60, %v1644_v2  ;;  %v1830_v45 = vsel %vm1736_vm4, %v3387_v63, %v1691_v11  ;;  %v171_v0 = vceil.f32 %v126_v38  ;;  %v127_v53 = vmul.f32 %v3239_v4, %v3621_v37 }
  0x63   :  { %v1922_v46 = vsel %vm1875_vm3, %v3394_v8, %v1783_v5  ;;  %v1969_v49 = vsel %vm1875_vm3, %v3400_v10, %v1830_v45  ;;  %v128_v59 = vmul.f32 %v3239_v4, %v3628_v39  ;;  %v129_v61 = vmul.f32 %v3239_v4, %v3630_v43 }
  0x64   :  { %v2061_v55 = vsel %vm2014_vm7, %v3409_v14, %v1922_v46  ;;  %v2108_v56 = vsel %vm2014_vm7, %v3415_v18, %v1969_v49  ;;  %v2994_v7 = vcvt.f32.s32 %v171_v0  ;;  %v172_v1 = vceil.f32 %v127_v53  ;;  %v3667_v46 = vld [vmem:[#allocation10 + $0x40] sm:$0xff] }
  0x65   :  { %v2200_v62 = vsel %vm2153_vm6, %v3425_v26, %v2061_v55  ;;  %v2247_v6 = vsel %vm2153_vm6, %v3434_v36, %v2108_v56  ;;  %v173_v13 = vceil.f32 %v128_v59  ;;  %v174_v33 = vceil.f32 %v129_v61 }
  0x66   :  { %v2339_v32 = vsel %vm2292_vm9, %v3441_v42, %v2200_v62  ;;  %v2386_v9 = vsel %vm2292_vm9, %v3448_v48, %v2247_v6  ;;  %v2916_v2 = vadd.s32 4294967295, %v2994_v7  ;;  %v2996_v11 = vcvt.f32.s32 %v172_v1 }
  0x67   :  { %v2478_v15 = vsel %vm2431_vm10, %v3455_v52, %v2339_v32  ;;  %v2525_v29 = vsel %vm2431_vm10, %v3462_v58, %v2386_v9  ;;  %v2998_v5 = vcvt.f32.s32 %v173_v13  ;;  %vm2707_vm8 = vcmp.lt.f32.partialorder %v3237_v3, %v3265_v17 }
  0x68   :  { %v2570_v38 = vmul.f32 %v2478_v15, %v3237_v3  ;;  %vm310_vm11 = vcmp.gt.s32.totalorder %v2916_v2, 0  ;;  %v2917_v45 = vadd.s32 4294967295, %v2996_v11  ;;  %vm2661_vm12 = vcmp.gt.f32.partialorder %v3237_v3, %v3262_v16 }
  0x69   :  { %v311_v0 = vsel %vm310_vm11, %v2916_v2, 0  ;;  %v3671_v25 = vcvt.f32.s32 %v174_v33  ;;  %v3676_v56 = vadd.s32 4294967295, %v2998_v5  ;;  %v3680_v59 = vmul.f32 %v3239_v4, %v3667_v46 }
  0x6a   :  { %v2615_v49 = vadd.f32 %v2570_v38, %v2525_v29  ;;  %vm400_vm13 = vcmp.lt.s32.totalorder %v311_v0, 14  ;;  %vm312_vm14 = vcmp.gt.s32.totalorder %v2917_v45, 0 }
  0x6b   :  { %v3674_v55 = vsel %vm400_vm13, %v311_v0, 14  ;;  %v313_v6 = vsel %vm312_vm14, %v2917_v45, 0 }
  0x6c   :  { %v2753_v53 = vsel %vm2707_vm8, %v3274_v21, %v2615_v49  ;;  %vm486_vm15 = vcmp.eq.s32.totalorder %v3674_v55, 0  ;;  %vm625_vm0 = vcmp.eq.s32.totalorder %v3674_v55, 1  ;;  %vm764_vm1 = vcmp.eq.s32.totalorder %v3674_v55, 2 }
  0x6d   :  { %v2799_v61 = vsel %vm2661_vm12, %v3281_v24, %v2753_v53  ;;  %v533_v3 = vsel %vm486_vm15, %v3255_v12, 0.0  ;;  %v580_v62 = vsel %vm486_vm15, %v3267_v19, 0.0  ;;  %vm903_vm2 = vcmp.eq.s32.totalorder %v3674_v55, 3 }
  0x6e   :  { %2844 = vst [vmem:[#allocation11 + $0x18] sm:$0xff] %v2799_v61  ;;  %v672_v7 = vsel %vm625_vm0, %v3269_v20, %v533_v3  ;;  %v719_v1 = vsel %vm625_vm0, %v3276_v23, %v580_v62  ;;  %vm1042_vm5 = vcmp.eq.s32.totalorder %v3674_v55, 4  ;;  %vm1181_vm4 = vcmp.eq.s32.totalorder %v3674_v55, 5 }
  0x6f   :  { %v811_v32 = vsel %vm764_vm1, %v3286_v27, %v672_v7  ;;  %v858_v9 = vsel %vm764_vm1, %v3289_v28, %v719_v1  ;;  %vm1320_vm3 = vcmp.eq.s32.totalorder %v3674_v55, 6  ;;  %vm1459_vm7 = vcmp.eq.s32.totalorder %v3674_v55, 7 }
  0x70   :  { %v950_v13 = vsel %vm903_vm2, %v3295_v30, %v811_v32  ;;  %v997_v33 = vsel %vm903_vm2, %v3297_v31, %v858_v9  ;;  %vm1598_vm6 = vcmp.eq.s32.totalorder %v3674_v55, 8  ;;  %vm1737_vm9 = vcmp.eq.s32.totalorder %v3674_v55, 9 }
  0x71   :  { %v1089_v15 = vsel %vm1042_vm5, %v3306_v34, %v950_v13  ;;  %v1136_v29 = vsel %vm1042_vm5, %v3309_v35, %v997_v33  ;;  %vm1876_vm10 = vcmp.eq.s32.totalorder %v3674_v55, 10  ;;  %vm2015_vm8 = vcmp.eq.s32.totalorder %v3674_v55, 11 }
  0x72   :  { %v1228_v2 = vsel %vm1181_vm4, %v3325_v40, %v1089_v15  ;;  %v1275_v11 = vsel %vm1181_vm4, %v3328_v41, %v1136_v29  ;;  %vm2154_vm11 = vcmp.eq.s32.totalorder %v3674_v55, 12  ;;  %vm2293_vm12 = vcmp.eq.s32.totalorder %v3674_v55, 13 }
  0x73   :  { %v1367_v38 = vsel %vm1320_vm3, %v3334_v44, %v1228_v2  ;;  %v1414_v5 = vsel %vm1320_vm3, %v3343_v47, %v1275_v11  ;;  %vm2432_vm13 = vcmp.eq.s32.totalorder %v3674_v55, 14  ;;  %vm402_vm14 = vcmp.lt.s32.totalorder %v313_v6, 14 }
  0x74   :  { %v1506_v45 = vsel %vm1459_vm7, %v3353_v50, %v1367_v38  ;;  %v1553_v49 = vsel %vm1459_vm7, %v3356_v51, %v1414_v5  ;;  %v3718_v0 = vsel %vm402_vm14, %v313_v6, 14  ;;  %vm314_vm15 = vcmp.gt.s32.totalorder %v3676_v56, 0 }
  0x75   :  { %v1645_v53 = vsel %vm1598_vm6, %v3365_v54, %v1506_v45  ;;  %v1692_v61 = vsel %vm1598_vm6, %v3373_v57, %v1553_v49  ;;  %vm2708_vm0 = vcmp.lt.f32.partialorder %v3608_v22, %v3265_v17  ;;  %vm487_vm1 = vcmp.eq.s32.totalorder %v3718_v0, 0 }
  0x76   :  { %vm626_vm2 = vcmp.eq.s32.totalorder %v3718_v0, 1  ;;  %v1784_v3 = vsel %vm1737_vm9, %v3382_v60, %v1645_v53  ;;  %v1831_v62 = vsel %vm1737_vm9, %v3387_v63, %v1692_v61  ;;  %vm2662_vm5 = vcmp.gt.f32.partialorder %v3608_v22, %v3262_v16 }
  0x77   :  { %v534_v6 = vsel %vm487_vm1, %v3255_v12, 0.0  ;;  %v581_v7 = vsel %vm487_vm1, %v3267_v19, 0.0  ;;  %v1923_v1 = vsel %vm1876_vm10, %v3394_v8, %v1784_v3  ;;  %v1970_v32 = vsel %vm1876_vm10, %v3400_v10, %v1831_v62 }
  0x78   :  { %v673_v9 = vsel %vm626_vm2, %v3269_v20, %v534_v6  ;;  %v720_v13 = vsel %vm626_vm2, %v3276_v23, %v581_v7  ;;  %v2062_v33 = vsel %vm2015_vm8, %v3409_v14, %v1923_v1  ;;  %v2109_v15 = vsel %vm2015_vm8, %v3415_v18, %v1970_v32 }
  0x79   :  { %vm765_vm4 = vcmp.eq.s32.totalorder %v3718_v0, 2  ;;  %vm904_vm3 = vcmp.eq.s32.totalorder %v3718_v0, 3  ;;  %v2201_v29 = vsel %vm2154_vm11, %v3425_v26, %v2062_v33  ;;  %v2248_v2 = vsel %vm2154_vm11, %v3434_v36, %v2109_v15 }
  0x7a   :  { %v812_v11 = vsel %vm765_vm4, %v3286_v27, %v673_v9  ;;  %v859_v38 = vsel %vm765_vm4, %v3289_v28, %v720_v13  ;;  %v2340_v5 = vsel %vm2293_vm12, %v3441_v42, %v2201_v29  ;;  %v2387_v45 = vsel %vm2293_vm12, %v3448_v48, %v2248_v2 }
  0x7b   :  { %v951_v49 = vsel %vm904_vm3, %v3295_v30, %v812_v11  ;;  %v998_v53 = vsel %vm904_vm3, %v3297_v31, %v859_v38  ;;  %v2479_v61 = vsel %vm2432_vm13, %v3455_v52, %v2340_v5  ;;  %v2526_v3 = vsel %vm2432_vm13, %v3462_v58, %v2387_v45 }
  0x7c   :  { %vm1043_vm7 = vcmp.eq.s32.totalorder %v3718_v0, 4  ;;  %vm1182_vm6 = vcmp.eq.s32.totalorder %v3718_v0, 5  ;;  %v2571_v62 = vmul.f32 %v2479_v61, %v3608_v22  ;;  %vm1321_vm9 = vcmp.eq.s32.totalorder %v3718_v0, 6 }
  0x7d   :  { %v1090_v6 = vsel %vm1043_vm7, %v3306_v34, %v951_v49  ;;  %v1137_v7 = vsel %vm1043_vm7, %v3309_v35, %v998_v53  ;;  %vm1460_vm10 = vcmp.eq.s32.totalorder %v3718_v0, 7  ;;  %vm1599_vm8 = vcmp.eq.s32.totalorder %v3718_v0, 8 }
  0x7e   :  { %v1229_v1 = vsel %vm1182_vm6, %v3325_v40, %v1090_v6  ;;  %v1276_v32 = vsel %vm1182_vm6, %v3328_v41, %v1137_v7  ;;  %v2616_v55 = vadd.f32 %v2571_v62, %v2526_v3  ;;  %vm1738_vm11 = vcmp.eq.s32.totalorder %v3718_v0, 9 }
  0x7f   :  { %v1368_v9 = vsel %vm1321_vm9, %v3334_v44, %v1229_v1  ;;  %v1415_v13 = vsel %vm1321_vm9, %v3343_v47, %v1276_v32  ;;  %vm1877_vm12 = vcmp.eq.s32.totalorder %v3718_v0, 10  ;;  %v315_v29 = vsel %vm314_vm15, %v3676_v56, 0 }
  0x80   :  { %v1507_v33 = vsel %vm1460_vm10, %v3353_v50, %v1368_v9  ;;  %v1554_v15 = vsel %vm1460_vm10, %v3356_v51, %v1415_v13  ;;  %v2754_v2 = vsel %vm2708_vm0, %v3274_v21, %v2616_v55  ;;  %vm2016_vm13 = vcmp.eq.s32.totalorder %v3718_v0, 11 }
  0x81   :  { %v1646_v11 = vsel %vm1599_vm8, %v3365_v54, %v1507_v33  ;;  %v1693_v38 = vsel %vm1599_vm8, %v3373_v57, %v1554_v15  ;;  %v2800_v5 = vsel %vm2662_vm5, %v3281_v24, %v2754_v2  ;;  %vm2155_vm14 = vcmp.eq.s32.totalorder %v3718_v0, 12 }
  0x82   :  { %v1785_v45 = vsel %vm1738_vm11, %v3382_v60, %v1646_v11  ;;  %v1832_v56 = vsel %vm1738_vm11, %v3387_v63, %v1693_v38  ;;  %vm2663_vm15 = vcmp.gt.f32.partialorder %v3621_v37, %v3262_v16  ;;  %2845 = vst [vmem:[#allocation11 + $0x20] sm:$0xff] %v2800_v5  ;;  %vm2294_vm0 = vcmp.eq.s32.totalorder %v3718_v0, 13 }
  0x83   :  { %v1924_v49 = vsel %vm1877_vm12, %v3394_v8, %v1785_v45  ;;  %v1971_v53 = vsel %vm1877_vm12, %v3400_v10, %v1832_v56  ;;  %vm404_vm1 = vcmp.lt.s32.totalorder %v315_v29, 14  ;;  %vm2433_vm2 = vcmp.eq.s32.totalorder %v3718_v0, 14 }
  0x84   :  { %v2063_v22 = vsel %vm2016_vm13, %v3409_v14, %v1924_v49  ;;  %v2110_v61 = vsel %vm2016_vm13, %v3415_v18, %v1971_v53  ;;  %v3820_v3 = vsel %vm404_vm1, %v315_v29, 14  ;;  %vm2709_vm9 = vcmp.lt.f32.partialorder %v3621_v37, %v3265_v17 }
  0x85   :  { %v2202_v62 = vsel %vm2155_vm14, %v3425_v26, %v2063_v22  ;;  %v2249_v6 = vsel %vm2155_vm14, %v3434_v36, %v2110_v61  ;;  %vm488_vm5 = vcmp.eq.s32.totalorder %v3820_v3, 0  ;;  %vm627_vm4 = vcmp.eq.s32.totalorder %v3820_v3, 1 }
  0x86   :  { %v2341_v7 = vsel %vm2294_vm0, %v3441_v42, %v2202_v62  ;;  %v2388_v1 = vsel %vm2294_vm0, %v3448_v48, %v2249_v6  ;;  %v535_v32 = vsel %vm488_vm5, %v3255_v12, 0.0  ;;  %v582_v55 = vsel %vm488_vm5, %v3267_v19, 0.0 }
  0x87   :  { %v2480_v0 = vsel %vm2433_vm2, %v3455_v52, %v2341_v7  ;;  %v2527_v9 = vsel %vm2433_vm2, %v3462_v58, %v2388_v1  ;;  %v674_v13 = vsel %vm627_vm4, %v3269_v20, %v535_v32  ;;  %v721_v33 = vsel %vm627_vm4, %v3276_v23, %v582_v55 }
  0x88   :  { %v2572_v15 = vmul.f32 %v2480_v0, %v3621_v37  ;;  %vm766_vm3 = vcmp.eq.s32.totalorder %v3820_v3, 2  ;;  %vm905_vm7 = vcmp.eq.s32.totalorder %v3820_v3, 3  ;;  %vm1044_vm6 = vcmp.eq.s32.totalorder %v3820_v3, 4 }
  0x89   :  { %v813_v29 = vsel %vm766_vm3, %v3286_v27, %v674_v13  ;;  %v860_v2 = vsel %vm766_vm3, %v3289_v28, %v721_v33  ;;  %vm1183_vm10 = vcmp.eq.s32.totalorder %v3820_v3, 5  ;;  %vm1322_vm8 = vcmp.eq.s32.totalorder %v3820_v3, 6 }
  0x8a   :  { %v2617_v11 = vadd.f32 %v2572_v15, %v2527_v9  ;;  %v952_v38 = vsel %vm905_vm7, %v3295_v30, %v813_v29  ;;  %v999_v5 = vsel %vm905_vm7, %v3297_v31, %v860_v2  ;;  %vm1461_vm11 = vcmp.eq.s32.totalorder %v3820_v3, 7 }
  0x8b   :  { %v1091_v45 = vsel %vm1044_vm6, %v3306_v34, %v952_v38  ;;  %v1138_v56 = vsel %vm1044_vm6, %v3309_v35, %v999_v5  ;;  %v2919_v49 = vadd.s32 4294967295, %v3671_v25  ;;  %vm1600_vm12 = vcmp.eq.s32.totalorder %v3820_v3, 8 }
  0x8c   :  { %v2755_v53 = vsel %vm2709_vm9, %v3274_v21, %v2617_v11  ;;  %v1230_v22 = vsel %vm1183_vm10, %v3325_v40, %v1091_v45  ;;  %v1277_v61 = vsel %vm1183_vm10, %v3328_v41, %v1138_v56  ;;  %vm1739_vm13 = vcmp.eq.s32.totalorder %v3820_v3, 9 }
  0x8d   :  { %v2801_v62 = vsel %vm2663_vm15, %v3281_v24, %v2755_v53  ;;  %v1369_v6 = vsel %vm1322_vm8, %v3334_v44, %v1230_v22  ;;  %v1416_v7 = vsel %vm1322_vm8, %v3343_v47, %v1277_v61  ;;  %vm1878_vm14 = vcmp.eq.s32.totalorder %v3820_v3, 10 }
  0x8e   :  { %2846 = vst [vmem:[#allocation11 + $0x28] sm:$0xff] %v2801_v62  ;;  %v1508_v25 = vsel %vm1461_vm11, %v3353_v50, %v1369_v6  ;;  %v1555_v1 = vsel %vm1461_vm11, %v3356_v51, %v1416_v7  ;;  %v175_v32 = vceil.f32 %v3680_v59  ;;  %vm2017_vm15 = vcmp.eq.s32.totalorder %v3820_v3, 11 }
  0x8f   :  { %v1647_v55 = vsel %vm1600_vm12, %v3365_v54, %v1508_v25  ;;  %v1694_v37 = vsel %vm1600_vm12, %v3373_v57, %v1555_v1  ;;  %vm2156_vm0 = vcmp.eq.s32.totalorder %v3820_v3, 12  ;;  %vm2295_vm1 = vcmp.eq.s32.totalorder %v3820_v3, 13 }
  0x90   :  { %v1786_v0 = vsel %vm1739_vm13, %v3382_v60, %v1647_v55  ;;  %v1833_v9 = vsel %vm1739_vm13, %v3387_v63, %v1694_v37  ;;  %vm2664_vm2 = vcmp.gt.f32.partialorder %v3628_v39, %v3262_v16  ;;  %vm316_vm5 = vcmp.gt.s32.totalorder %v2919_v49, 0 }
  0x91   :  { %v1925_v59 = vsel %vm1878_vm14, %v3394_v8, %v1786_v0  ;;  %v1972_v13 = vsel %vm1878_vm14, %v3400_v10, %v1833_v9  ;;  %vm2434_vm4 = vcmp.eq.s32.totalorder %v3820_v3, 14  ;;  %v317_v33 = vsel %vm316_vm5, %v2919_v49, 0 }
  0x92   :  { %v2064_v15 = vsel %vm2017_vm15, %v3409_v14, %v1925_v59  ;;  %v2111_v29 = vsel %vm2017_vm15, %v3415_v18, %v1972_v13  ;;  %vm2710_vm3 = vcmp.lt.f32.partialorder %v3628_v39, %v3265_v17  ;;  %vm406_vm7 = vcmp.lt.s32.totalorder %v317_v33, 14 }
  0x93   :  { %v2203_v2 = vsel %vm2156_vm0, %v3425_v26, %v2064_v15  ;;  %v2250_v11 = vsel %vm2156_vm0, %v3434_v36, %v2111_v29  ;;  %v3883_v38 = vsel %vm406_vm7, %v317_v33, 14  ;;  %v3002_v5 = vcvt.f32.s32 %v175_v32 }
  0x94   :  { %v2342_v45 = vsel %vm2295_vm1, %v3441_v42, %v2203_v2  ;;  %v2389_v56 = vsel %vm2295_vm1, %v3448_v48, %v2250_v11  ;;  %vm489_vm6 = vcmp.eq.s32.totalorder %v3883_v38, 0  ;;  %vm628_vm9 = vcmp.eq.s32.totalorder %v3883_v38, 1 }
  0x95   :  { %v2481_v49 = vsel %vm2434_vm4, %v3455_v52, %v2342_v45  ;;  %v2528_v53 = vsel %vm2434_vm4, %v3462_v58, %v2389_v56  ;;  %v536_v22 = vsel %vm489_vm6, %v3255_v12, 0.0  ;;  %v583_v61 = vsel %vm489_vm6, %v3267_v19, 0.0  ;;  %v3929_v45 = vld [vmem:[#allocation10 + $0x48] sm:$0xff] }
  0x96   :  { %v2573_v62 = vmul.f32 %v2481_v49, %v3628_v39  ;;  %v675_v6 = vsel %vm628_vm9, %v3269_v20, %v536_v22  ;;  %v722_v7 = vsel %vm628_vm9, %v3276_v23, %v583_v61  ;;  %vm767_vm10 = vcmp.eq.s32.totalorder %v3883_v38, 2 }
  0x97   :  { %v814_v3 = vsel %vm767_vm10, %v3286_v27, %v675_v6  ;;  %v861_v25 = vsel %vm767_vm10, %v3289_v28, %v722_v7  ;;  %vm906_vm8 = vcmp.eq.s32.totalorder %v3883_v38, 3  ;;  %vm1045_vm11 = vcmp.eq.s32.totalorder %v3883_v38, 4 }
  0x98   :  { %v2618_v1 = vadd.f32 %v2573_v62, %v2528_v53  ;;  %v953_v32 = vsel %vm906_vm8, %v3295_v30, %v814_v3  ;;  %v1000_v55 = vsel %vm906_vm8, %v3297_v31, %v861_v25  ;;  %vm1184_vm12 = vcmp.eq.s32.totalorder %v3883_v38, 5 }
  0x99   :  { %v1092_v37 = vsel %vm1045_vm11, %v3306_v34, %v953_v32  ;;  %v1139_v0 = vsel %vm1045_vm11, %v3309_v35, %v1000_v55  ;;  %vm1323_vm13 = vcmp.eq.s32.totalorder %v3883_v38, 6  ;;  %vm1462_vm14 = vcmp.eq.s32.totalorder %v3883_v38, 7 }
  0x9a   :  { %v2756_v9 = vsel %vm2710_vm3, %v3274_v21, %v2618_v1  ;;  %v1231_v59 = vsel %vm1184_vm12, %v3325_v40, %v1092_v37  ;;  %v1278_v13 = vsel %vm1184_vm12, %v3328_v41, %v1139_v0  ;;  %vm1601_vm15 = vcmp.eq.s32.totalorder %v3883_v38, 8  ;;  %v3953_v37 = vld [vmem:[#allocation10 + $0x50] sm:$0xff] }
  0x9b   :  { %v2802_v33 = vsel %vm2664_vm2, %v3281_v24, %v2756_v9  ;;  %v1370_v15 = vsel %vm1323_vm13, %v3334_v44, %v1231_v59  ;;  %v1417_v29 = vsel %vm1323_vm13, %v3343_v47, %v1278_v13  ;;  %vm1740_vm0 = vcmp.eq.s32.totalorder %v3883_v38, 9 }
  0x9c   :  { %2847 = vst [vmem:[#allocation11 + $0x30] sm:$0xff] %v2802_v33  ;;  %v1509_v2 = vsel %vm1462_vm14, %v3353_v50, %v1370_v15  ;;  %v1556_v11 = vsel %vm1462_vm14, %v3356_v51, %v1417_v29  ;;  %vm1879_vm1 = vcmp.eq.s32.totalorder %v3883_v38, 10  ;;  %vm2018_vm2 = vcmp.eq.s32.totalorder %v3883_v38, 11 }
  0x9d   :  { %v1648_v56 = vsel %vm1601_vm15, %v3365_v54, %v1509_v2  ;;  %v1695_v39 = vsel %vm1601_vm15, %v3373_v57, %v1556_v11  ;;  %vm2157_vm5 = vcmp.eq.s32.totalorder %v3883_v38, 12  ;;  %v2920_v22 = vadd.s32 4294967295, %v3002_v5 }
  0x9e   :  { %v1787_v49 = vsel %vm1740_vm0, %v3382_v60, %v1648_v56  ;;  %v1834_v53 = vsel %vm1740_vm0, %v3387_v63, %v1695_v39  ;;  %vm2296_vm4 = vcmp.eq.s32.totalorder %v3883_v38, 13  ;;  %v131_v6 = vmul.f32 %v3239_v4, %v3929_v45 }
  0x9f   :  { %v1926_v61 = vsel %vm1879_vm1, %v3394_v8, %v1787_v49  ;;  %v1973_v62 = vsel %vm1879_vm1, %v3400_v10, %v1834_v53  ;;  %vm2435_vm3 = vcmp.eq.s32.totalorder %v3883_v38, 14  ;;  %vm318_vm7 = vcmp.gt.s32.totalorder %v2920_v22, 0 }
  0xa0   :  { %v2065_v7 = vsel %vm2018_vm2, %v3409_v14, %v1926_v61  ;;  %v2112_v3 = vsel %vm2018_vm2, %v3415_v18, %v1973_v62  ;;  %vm2665_vm6 = vcmp.gt.f32.partialorder %v3630_v43, %v3262_v16  ;;  %v319_v1 = vsel %vm318_vm7, %v2920_v22, 0 }
  0xa1   :  { %v2204_v25 = vsel %vm2157_vm5, %v3425_v26, %v2065_v7  ;;  %v2251_v5 = vsel %vm2157_vm5, %v3434_v36, %v2112_v3  ;;  %vm2711_vm9 = vcmp.lt.f32.partialorder %v3630_v43, %v3265_v17  ;;  %vm408_vm10 = vcmp.lt.s32.totalorder %v319_v1, 14 }
  0xa2   :  { %v2343_v32 = vsel %vm2296_vm4, %v3441_v42, %v2204_v25  ;;  %v2390_v55 = vsel %vm2296_vm4, %v3448_v48, %v2251_v5  ;;  %v3957_v9 = vsel %vm408_vm10, %v319_v1, 14  ;;  %v176_v59 = vceil.f32 %v131_v6 }
  0xa3   :  { %v2482_v38 = vsel %vm2435_vm3, %v3455_v52, %v2343_v32  ;;  %v2529_v0 = vsel %vm2435_vm3, %v3462_v58, %v2390_v55  ;;  %vm490_vm8 = vcmp.eq.s32.totalorder %v3957_v9, 0  ;;  %vm629_vm11 = vcmp.eq.s32.totalorder %v3957_v9, 1 }
  0xa4   :  { %v2574_v13 = vmul.f32 %v2482_v38, %v3630_v43  ;;  %vm768_vm12 = vcmp.eq.s32.totalorder %v3957_v9, 2  ;;  %v537_v33 = vsel %vm490_vm8, %v3255_v12, 0.0  ;;  %v584_v15 = vsel %vm490_vm8, %v3267_v19, 0.0 }
  0xa5   :  { %vm907_vm13 = vcmp.eq.s32.totalorder %v3957_v9, 3  ;;  %v132_v29 = vmul.f32 %v3239_v4, %v3953_v37  ;;  %v676_v11 = vsel %vm629_vm11, %v3269_v20, %v537_v33  ;;  %v723_v56 = vsel %vm629_vm11, %v3276_v23, %v584_v15  ;;  %v4004_v33 = vld [vmem:[#allocation10 + $0x58] sm:$0xff] }
  0xa6   :  { %v2619_v2 = vadd.f32 %v2574_v13, %v2529_v0  ;;  %vm1046_vm14 = vcmp.eq.s32.totalorder %v3957_v9, 4  ;;  %v815_v39 = vsel %vm768_vm12, %v3286_v27, %v676_v11  ;;  %v862_v49 = vsel %vm768_vm12, %v3289_v28, %v723_v56 }
  0xa7   :  { %vm1185_vm15 = vcmp.eq.s32.totalorder %v3957_v9, 5  ;;  %v3004_v53 = vcvt.f32.s32 %v176_v59  ;;  %v954_v61 = vsel %vm907_vm13, %v3295_v30, %v815_v39  ;;  %v1001_v62 = vsel %vm907_vm13, %v3297_v31, %v862_v49 }
  0xa8   :  { %v2757_v22 = vsel %vm2711_vm9, %v3274_v21, %v2619_v2  ;;  %vm1324_vm0 = vcmp.eq.s32.totalorder %v3957_v9, 6  ;;  %v1093_v7 = vsel %vm1046_vm14, %v3306_v34, %v954_v61  ;;  %v1140_v3 = vsel %vm1046_vm14, %v3309_v35, %v1001_v62 }
  0xa9   :  { %v2803_v6 = vsel %vm2665_vm6, %v3281_v24, %v2757_v22  ;;  %vm1463_vm1 = vcmp.eq.s32.totalorder %v3957_v9, 7  ;;  %v1232_v25 = vsel %vm1185_vm15, %v3325_v40, %v1093_v7  ;;  %v1279_v5 = vsel %vm1185_vm15, %v3328_v41, %v1140_v3 }
  0xaa   :  { %2848 = vst [vmem:[#allocation11 + $0x38] sm:$0xff] %v2803_v6  ;;  %vm1602_vm2 = vcmp.eq.s32.totalorder %v3957_v9, 8  ;;  %v177_v1 = vceil.f32 %v132_v29  ;;  %v1371_v32 = vsel %vm1324_vm0, %v3334_v44, %v1232_v25  ;;  %v1418_v55 = vsel %vm1324_vm0, %v3343_v47, %v1279_v5 }
  0xab   :  { %vm1741_vm5 = vcmp.eq.s32.totalorder %v3957_v9, 9  ;;  %vm1880_vm4 = vcmp.eq.s32.totalorder %v3957_v9, 10  ;;  %v1510_v43 = vsel %vm1463_vm1, %v3353_v50, %v1371_v32  ;;  %v1557_v38 = vsel %vm1463_vm1, %v3356_v51, %v1418_v55 }
  0xac   :  { %vm2019_vm3 = vcmp.eq.s32.totalorder %v3957_v9, 11  ;;  %v2921_v0 = vadd.s32 4294967295, %v3004_v53  ;;  %v1649_v59 = vsel %vm1602_vm2, %v3365_v54, %v1510_v43  ;;  %v1696_v13 = vsel %vm1602_vm2, %v3373_v57, %v1557_v38 }
  0xad   :  { %vm2158_vm7 = vcmp.eq.s32.totalorder %v3957_v9, 12  ;;  %vm2297_vm6 = vcmp.eq.s32.totalorder %v3957_v9, 13  ;;  %vm2712_vm9 = vcmp.lt.f32.partialorder %v3667_v46, %v3265_v17  ;;  %v1788_v15 = vsel %vm1741_vm5, %v3382_v60, %v1649_v59 }
  0xae   :  { %v1835_v29 = vsel %vm1741_vm5, %v3387_v63, %v1696_v13  ;;  %vm2666_vm10 = vcmp.gt.f32.partialorder %v3667_v46, %v3262_v16  ;;  %vm320_vm8 = vcmp.gt.s32.totalorder %v2921_v0, 0  ;;  %v3006_v2 = vcvt.f32.s32 %v177_v1 }
  0xaf   :  { %v1927_v11 = vsel %vm1880_vm4, %v3394_v8, %v1788_v15  ;;  %v1974_v56 = vsel %vm1880_vm4, %v3400_v10, %v1835_v29  ;;  %vm2436_vm11 = vcmp.eq.s32.totalorder %v3957_v9, 14  ;;  %v321_v39 = vsel %vm320_vm8, %v2921_v0, 0 }
  0xb0   :  { %v2066_v49 = vsel %vm2019_vm3, %v3409_v14, %v1927_v11  ;;  %v2113_v53 = vsel %vm2019_vm3, %v3415_v18, %v1974_v56  ;;  %vm410_vm12 = vcmp.lt.s32.totalorder %v321_v39, 14  ;;  %v133_v22 = vmul.f32 %v3239_v4, %v4004_v33 }
  0xb1   :  { %v2205_v61 = vsel %vm2158_vm7, %v3425_v26, %v2066_v49  ;;  %v2252_v62 = vsel %vm2158_vm7, %v3434_v36, %v2113_v53  ;;  %v4031_v6 = vsel %vm410_vm12, %v321_v39, 14  ;;  %v2922_v7 = vadd.s32 4294967295, %v3006_v2 }
  0xb2   :  { %v2344_v3 = vsel %vm2297_vm6, %v3441_v42, %v2205_v61  ;;  %v2391_v25 = vsel %vm2297_vm6, %v3448_v48, %v2252_v62  ;;  %vm491_vm13 = vcmp.eq.s32.totalorder %v4031_v6, 0  ;;  %vm630_vm14 = vcmp.eq.s32.totalorder %v4031_v6, 1 }
  0xb3   :  { %v2483_v5 = vsel %vm2436_vm11, %v3455_v52, %v2344_v3  ;;  %v2530_v1 = vsel %vm2436_vm11, %v3462_v58, %v2391_v25  ;;  %v538_v32 = vsel %vm491_vm13, %v3255_v12, 0.0  ;;  %v585_v55 = vsel %vm491_vm13, %v3267_v19, 0.0 }
  0xb4   :  { %v2575_v43 = vmul.f32 %v2483_v5, %v3667_v46  ;;  %v677_v38 = vsel %vm630_vm14, %v3269_v20, %v538_v32  ;;  %v724_v0 = vsel %vm630_vm14, %v3276_v23, %v585_v55  ;;  %vm769_vm15 = vcmp.eq.s32.totalorder %v4031_v6, 2 }
  0xb5   :  { %v816_v9 = vsel %vm769_vm15, %v3286_v27, %v677_v38  ;;  %v863_v59 = vsel %vm769_vm15, %v3289_v28, %v724_v0  ;;  %vm908_vm0 = vcmp.eq.s32.totalorder %v4031_v6, 3  ;;  %vm1047_vm1 = vcmp.eq.s32.totalorder %v4031_v6, 4 }
  0xb6   :  { %v2620_v13 = vadd.f32 %v2575_v43, %v2530_v1  ;;  %v955_v15 = vsel %vm908_vm0, %v3295_v30, %v816_v9  ;;  %v1002_v29 = vsel %vm908_vm0, %v3297_v31, %v863_v59  ;;  %vm1186_vm2 = vcmp.eq.s32.totalorder %v4031_v6, 5 }
  0xb7   :  { %v1094_v2 = vsel %vm1047_vm1, %v3306_v34, %v955_v15  ;;  %v1141_v11 = vsel %vm1047_vm1, %v3309_v35, %v1002_v29  ;;  %vm1325_vm5 = vcmp.eq.s32.totalorder %v4031_v6, 6  ;;  %vm1464_vm4 = vcmp.eq.s32.totalorder %v4031_v6, 7 }
  0xb8   :  { %v2758_v56 = vsel %vm2712_vm9, %v3274_v21, %v2620_v13  ;;  %v1233_v39 = vsel %vm1186_vm2, %v3325_v40, %v1094_v2  ;;  %v1280_v49 = vsel %vm1186_vm2, %v3328_v41, %v1141_v11  ;;  %vm1603_vm3 = vcmp.eq.s32.totalorder %v4031_v6, 8 }
  0xb9   :  { %v2804_v53 = vsel %vm2666_vm10, %v3281_v24, %v2758_v56  ;;  %v1372_v61 = vsel %vm1325_vm5, %v3334_v44, %v1233_v39  ;;  %v1419_v62 = vsel %vm1325_vm5, %v3343_v47, %v1280_v49  ;;  %vm1742_vm7 = vcmp.eq.s32.totalorder %v4031_v6, 9 }
  0xba   :  { %2849 = vst [vmem:[#allocation11 + $0x40] sm:$0xff] %v2804_v53  ;;  %v1511_v3 = vsel %vm1464_vm4, %v3353_v50, %v1372_v61  ;;  %v1558_v25 = vsel %vm1464_vm4, %v3356_v51, %v1419_v62  ;;  %vm1881_vm6 = vcmp.eq.s32.totalorder %v4031_v6, 10  ;;  %vm2020_vm9 = vcmp.eq.s32.totalorder %v4031_v6, 11 }
  0xbb   :  { %v1650_v5 = vsel %vm1603_vm3, %v3365_v54, %v1511_v3  ;;  %v1697_v1 = vsel %vm1603_vm3, %v3373_v57, %v1558_v25  ;;  %vm2713_vm10 = vcmp.lt.f32.partialorder %v3929_v45, %v3265_v17  ;;  %v178_v46 = vceil.f32 %v133_v22 }
  0xbc   :  { %v1789_v32 = vsel %vm1742_vm7, %v3382_v60, %v1650_v5  ;;  %v1836_v55 = vsel %vm1742_vm7, %v3387_v63, %v1697_v1  ;;  %vm2159_vm8 = vcmp.eq.s32.totalorder %v4031_v6, 12  ;;  %vm2667_vm11 = vcmp.gt.f32.partialorder %v3929_v45, %v3262_v16 }
  0xbd   :  { %vm322_vm12 = vcmp.gt.s32.totalorder %v2922_v7, 0  ;;  %v1928_v43 = vsel %vm1881_vm6, %v3394_v8, %v1789_v32  ;;  %v1975_v38 = vsel %vm1881_vm6, %v3400_v10, %v1836_v55  ;;  %vm2298_vm13 = vcmp.eq.s32.totalorder %v4031_v6, 13 }
  0xbe   :  { %v323_v0 = vsel %vm322_vm12, %v2922_v7, 0  ;;  %v2067_v9 = vsel %vm2020_vm9, %v3409_v14, %v1928_v43  ;;  %v2114_v22 = vsel %vm2020_vm9, %v3415_v18, %v1975_v38  ;;  %vm2437_vm14 = vcmp.eq.s32.totalorder %v4031_v6, 14 }
  0xbf   :  { %vm412_vm15 = vcmp.lt.s32.totalorder %v323_v0, 14  ;;  %v2206_v59 = vsel %vm2159_vm8, %v3425_v26, %v2067_v9  ;;  %v2253_v13 = vsel %vm2159_vm8, %v3434_v36, %v2114_v22  ;;  %v3008_v29 = vcvt.f32.s32 %v178_v46 }
  0xc0   :  { %v4095_v15 = vsel %vm412_vm15, %v323_v0, 14  ;;  %v2345_v2 = vsel %vm2298_vm13, %v3441_v42, %v2206_v59  ;;  %v2392_v11 = vsel %vm2298_vm13, %v3448_v48, %v2253_v13 }
  0xc1   :  { %vm492_vm0 = vcmp.eq.s32.totalorder %v4095_v15, 0  ;;  %vm631_vm1 = vcmp.eq.s32.totalorder %v4095_v15, 1  ;;  %v2484_v7 = vsel %vm2437_vm14, %v3455_v52, %v2345_v2  ;;  %v2531_v6 = vsel %vm2437_vm14, %v3462_v58, %v2392_v11 }
  0xc2   :  { %v539_v56 = vsel %vm492_vm0, %v3255_v12, 0.0  ;;  %v586_v39 = vsel %vm492_vm0, %v3267_v19, 0.0  ;;  %v2576_v49 = vmul.f32 %v2484_v7, %v3929_v45  ;;  %vm770_vm2 = vcmp.eq.s32.totalorder %v4095_v15, 2 }
  0xc3   :  { %v678_v53 = vsel %vm631_vm1, %v3269_v20, %v539_v56  ;;  %v725_v61 = vsel %vm631_vm1, %v3276_v23, %v586_v39  ;;  %vm909_vm5 = vcmp.eq.s32.totalorder %v4095_v15, 3  ;;  %vm1048_vm4 = vcmp.eq.s32.totalorder %v4095_v15, 4 }
  0xc4   :  { %v817_v62 = vsel %vm770_vm2, %v3286_v27, %v678_v53  ;;  %v864_v3 = vsel %vm770_vm2, %v3289_v28, %v725_v61  ;;  %v2621_v25 = vadd.f32 %v2576_v49, %v2531_v6  ;;  %vm1187_vm3 = vcmp.eq.s32.totalorder %v4095_v15, 5  ;;  %v4149_v61 = vld [vmem:[#allocation10 + $0x60] sm:$0xff] }
  0xc5   :  { %v956_v5 = vsel %vm909_vm5, %v3295_v30, %v817_v62  ;;  %v1003_v1 = vsel %vm909_vm5, %v3297_v31, %v864_v3  ;;  %vm1326_vm7 = vcmp.eq.s32.totalorder %v4095_v15, 6  ;;  %vm1465_vm6 = vcmp.eq.s32.totalorder %v4095_v15, 7 }
  0xc6   :  { %v1095_v46 = vsel %vm1048_vm4, %v3306_v34, %v956_v5  ;;  %v1142_v32 = vsel %vm1048_vm4, %v3309_v35, %v1003_v1  ;;  %v2759_v55 = vsel %vm2713_vm10, %v3274_v21, %v2621_v25  ;;  %vm1604_vm9 = vcmp.eq.s32.totalorder %v4095_v15, 8 }
  0xc7   :  { %v1234_v43 = vsel %vm1187_vm3, %v3325_v40, %v1095_v46  ;;  %v1281_v38 = vsel %vm1187_vm3, %v3328_v41, %v1142_v32  ;;  %v2805_v0 = vsel %vm2667_vm11, %v3281_v24, %v2759_v55  ;;  %vm1743_vm8 = vcmp.eq.s32.totalorder %v4095_v15, 9 }
  0xc8   :  { %v1373_v9 = vsel %vm1326_vm7, %v3334_v44, %v1234_v43  ;;  %v1420_v22 = vsel %vm1326_vm7, %v3343_v47, %v1281_v38  ;;  %2850 = vst [vmem:[#allocation11 + $0x48] sm:$0xff] %v2805_v0  ;;  %vm1882_vm10 = vcmp.eq.s32.totalorder %v4095_v15, 10  ;;  %vm2021_vm12 = vcmp.eq.s32.totalorder %v4095_v15, 11 }
  0xc9   :  { %v1512_v59 = vsel %vm1465_vm6, %v3353_v50, %v1373_v9  ;;  %v1559_v13 = vsel %vm1465_vm6, %v3356_v51, %v1420_v22  ;;  %vm2160_vm11 = vcmp.eq.s32.totalorder %v4095_v15, 12  ;;  %v2923_v6 = vadd.s32 4294967295, %v3008_v29 }
  0xca   :  { %v1651_v2 = vsel %vm1604_vm9, %v3365_v54, %v1512_v59  ;;  %v1698_v11 = vsel %vm1604_vm9, %v3373_v57, %v1559_v13  ;;  %vm2299_vm13 = vcmp.eq.s32.totalorder %v4095_v15, 13  ;;  %vm2438_vm14 = vcmp.eq.s32.totalorder %v4095_v15, 14  ;;  %v4159_v15 = vld [vmem:[#allocation10 + $0x68] sm:$0xff] }
  0xcb   :  { %v1790_v45 = vsel %vm1743_vm8, %v3382_v60, %v1651_v2  ;;  %v1837_v7 = vsel %vm1743_vm8, %v3387_v63, %v1698_v11  ;;  %vm324_vm15 = vcmp.gt.s32.totalorder %v2923_v6, 0  ;;  %vm2668_vm0 = vcmp.gt.f32.partialorder %v3953_v37, %v3262_v16 }
  0xcc   :  { %v1929_v56 = vsel %vm1882_vm10, %v3394_v8, %v1790_v45  ;;  %v1976_v39 = vsel %vm1882_vm10, %v3400_v10, %v1837_v7  ;;  %v325_v29 = vsel %vm324_vm15, %v2923_v6, 0  ;;  %vm2714_vm1 = vcmp.lt.f32.partialorder %v3953_v37, %v3265_v17 }
  0xcd   :  { %v2068_v49 = vsel %vm2021_vm12, %v3409_v14, %v1929_v56  ;;  %v2115_v53 = vsel %vm2021_vm12, %v3415_v18, %v1976_v39  ;;  %vm414_vm2 = vcmp.lt.s32.totalorder %v325_v29, 14  ;;  %v134_v55 = vmul.f32 %v3239_v4, %v4149_v61 }
  0xce   :  { %v2207_v62 = vsel %vm2160_vm11, %v3425_v26, %v2068_v49  ;;  %v2254_v3 = vsel %vm2160_vm11, %v3434_v36, %v2115_v53  ;;  %v4163_v32 = vsel %vm414_vm2, %v325_v29, 14  ;;  %v135_v9 = vmul.f32 %v3239_v4, %v4159_v15 }
  0xcf   :  { %v2346_v25 = vsel %vm2299_vm13, %v3441_v42, %v2207_v62  ;;  %v2393_v5 = vsel %vm2299_vm13, %v3448_v48, %v2254_v3  ;;  %vm493_vm5 = vcmp.eq.s32.totalorder %v4163_v32, 0  ;;  %vm632_vm4 = vcmp.eq.s32.totalorder %v4163_v32, 1 }
  0xd0   :  { %v2485_v1 = vsel %vm2438_vm14, %v3455_v52, %v2346_v25  ;;  %v2532_v46 = vsel %vm2438_vm14, %v3462_v58, %v2393_v5  ;;  %vm771_vm3 = vcmp.eq.s32.totalorder %v4163_v32, 2  ;;  %v540_v38 = vsel %vm493_vm5, %v3255_v12, 0.0 }
  0xd1   :  { %v2577_v43 = vmul.f32 %v2485_v1, %v3953_v37  ;;  %v587_v0 = vsel %vm493_vm5, %v3267_v19, 0.0  ;;  %vm910_vm7 = vcmp.eq.s32.totalorder %v4163_v32, 3  ;;  %v679_v59 = vsel %vm632_vm4, %v3269_v20, %v540_v38 }
  0xd2   :  { %v726_v13 = vsel %vm632_vm4, %v3276_v23, %v587_v0  ;;  %vm1049_vm6 = vcmp.eq.s32.totalorder %v4163_v32, 4  ;;  %v818_v2 = vsel %vm771_vm3, %v3286_v27, %v679_v59  ;;  %vm1188_vm9 = vcmp.eq.s32.totalorder %v4163_v32, 5 }
  0xd3   :  { %v2622_v22 = vadd.f32 %v2577_v43, %v2532_v46  ;;  %v865_v11 = vsel %vm771_vm3, %v3289_v28, %v726_v13  ;;  %v179_v45 = vceil.f32 %v134_v55  ;;  %v957_v6 = vsel %vm910_vm7, %v3295_v30, %v818_v2 }
  0xd4   :  { %v1004_v56 = vsel %vm910_vm7, %v3297_v31, %v865_v11  ;;  %vm1327_vm8 = vcmp.eq.s32.totalorder %v4163_v32, 6  ;;  %v1096_v49 = vsel %vm1049_vm6, %v3306_v34, %v957_v6  ;;  %vm1466_vm10 = vcmp.eq.s32.totalorder %v4163_v32, 7 }
  0xd5   :  { %v2760_v7 = vsel %vm2714_vm1, %v3274_v21, %v2622_v22  ;;  %v1143_v53 = vsel %vm1049_vm6, %v3309_v35, %v1004_v56  ;;  %v1235_v62 = vsel %vm1188_vm9, %v3325_v40, %v1096_v49  ;;  %vm1605_vm12 = vcmp.eq.s32.totalorder %v4163_v32, 8 }
  0xd6   :  { %v2806_v39 = vsel %vm2668_vm0, %v3281_v24, %v2760_v7  ;;  %v1282_v3 = vsel %vm1188_vm9, %v3328_v41, %v1143_v53  ;;  %v180_v29 = vceil.f32 %v135_v9  ;;  %v1374_v25 = vsel %vm1327_vm8, %v3334_v44, %v1235_v62  ;;  %v4219_v7 = vld [vmem:[#allocation10 + $0x70] sm:$0xff] }
  0xd7   :  { %2851 = vst [vmem:[#allocation11 + $0x50] sm:$0xff] %v2806_v39  ;;  %v1421_v5 = vsel %vm1327_vm8, %v3343_v47, %v1282_v3  ;;  %vm1744_vm11 = vcmp.eq.s32.totalorder %v4163_v32, 9  ;;  %v1513_v37 = vsel %vm1466_vm10, %v3353_v50, %v1374_v25  ;;  %vm1883_vm13 = vcmp.eq.s32.totalorder %v4163_v32, 10 }
  0xd8   :  { %v1560_v1 = vsel %vm1466_vm10, %v3356_v51, %v1421_v5  ;;  %v3010_v46 = vcvt.f32.s32 %v179_v45  ;;  %v1652_v55 = vsel %vm1605_vm12, %v3365_v54, %v1513_v37  ;;  %vm2022_vm14 = vcmp.eq.s32.totalorder %v4163_v32, 11 }
  0xd9   :  { %v1699_v43 = vsel %vm1605_vm12, %v3373_v57, %v1560_v1  ;;  %vm2161_vm15 = vcmp.eq.s32.totalorder %v4163_v32, 12  ;;  %v1791_v38 = vsel %vm1744_vm11, %v3382_v60, %v1652_v55  ;;  %vm2669_vm0 = vcmp.gt.f32.partialorder %v4004_v33, %v3262_v16 }
  0xda   :  { %v1838_v0 = vsel %vm1744_vm11, %v3387_v63, %v1699_v43  ;;  %v2924_v9 = vadd.s32 4294967295, %v3010_v46  ;;  %v3012_v22 = vcvt.f32.s32 %v180_v29  ;;  %v1930_v59 = vsel %vm1883_vm13, %v3394_v8, %v1791_v38 }
  0xdb   :  { %v1977_v13 = vsel %vm1883_vm13, %v3400_v10, %v1838_v0  ;;  %vm2300_vm1 = vcmp.eq.s32.totalorder %v4163_v32, 13  ;;  %vm2439_vm2 = vcmp.eq.s32.totalorder %v4163_v32, 14  ;;  %v2069_v2 = vsel %vm2022_vm14, %v3409_v14, %v1930_v59 }
  0xdc   :  { %v2116_v11 = vsel %vm2022_vm14, %v3415_v18, %v1977_v13  ;;  %vm326_vm5 = vcmp.gt.s32.totalorder %v2924_v9, 0  ;;  %v2925_v45 = vadd.s32 4294967295, %v3012_v22  ;;  %v2208_v6 = vsel %vm2161_vm15, %v3425_v26, %v2069_v2 }
  0xdd   :  { %v2255_v56 = vsel %vm2161_vm15, %v3434_v36, %v2116_v11  ;;  %vm2715_vm4 = vcmp.lt.f32.partialorder %v4004_v33, %v3265_v17  ;;  %v327_v39 = vsel %vm326_vm5, %v2924_v9, 0  ;;  %v2347_v49 = vsel %vm2300_vm1, %v3441_v42, %v2208_v6 }
  0xde   :  { %v2394_v53 = vsel %vm2300_vm1, %v3448_v48, %v2255_v56  ;;  %vm416_vm3 = vcmp.lt.s32.totalorder %v327_v39, 14  ;;  %vm328_vm7 = vcmp.gt.s32.totalorder %v2925_v45, 0  ;;  %v2486_v62 = vsel %vm2439_vm2, %v3455_v52, %v2347_v49 }
  0xdf   :  { %v2533_v3 = vsel %vm2439_vm2, %v3462_v58, %v2394_v53  ;;  %v4233_v29 = vsel %vm416_vm3, %v327_v39, 14  ;;  %v4237_v32 = vmul.f32 %v3239_v4, %v4219_v7  ;;  %v2578_v25 = vmul.f32 %v2486_v62, %v4004_v33 }
  0xe0   :  { %vm494_vm6 = vcmp.eq.s32.totalorder %v4233_v29, 0  ;;  %vm633_vm9 = vcmp.eq.s32.totalorder %v4233_v29, 1  ;;  %vm772_vm8 = vcmp.eq.s32.totalorder %v4233_v29, 2  ;;  %vm911_vm10 = vcmp.eq.s32.totalorder %v4233_v29, 3 }
  0xe1   :  { %v541_v5 = vsel %vm494_vm6, %v3255_v12, 0.0  ;;  %v588_v37 = vsel %vm494_vm6, %v3267_v19, 0.0  ;;  %v329_v1 = vsel %vm328_vm7, %v2925_v45, 0  ;;  %v2623_v46 = vadd.f32 %v2578_v25, %v2533_v3 }
  0xe2   :  { %v680_v55 = vsel %vm633_vm9, %v3269_v20, %v541_v5  ;;  %v727_v43 = vsel %vm633_vm9, %v3276_v23, %v588_v37  ;;  %vm1050_vm12 = vcmp.eq.s32.totalorder %v4233_v29, 4  ;;  %vm1189_vm11 = vcmp.eq.s32.totalorder %v4233_v29, 5 }
  0xe3   :  { %v819_v38 = vsel %vm772_vm8, %v3286_v27, %v680_v55  ;;  %v866_v0 = vsel %vm772_vm8, %v3289_v28, %v727_v43  ;;  %vm1328_vm13 = vcmp.eq.s32.totalorder %v4233_v29, 6  ;;  %v2761_v9 = vsel %vm2715_vm4, %v3274_v21, %v2623_v46 }
  0xe4   :  { %v958_v22 = vsel %vm911_vm10, %v3295_v30, %v819_v38  ;;  %v1005_v59 = vsel %vm911_vm10, %v3297_v31, %v866_v0  ;;  %vm1467_vm14 = vcmp.eq.s32.totalorder %v4233_v29, 7  ;;  %v2807_v13 = vsel %vm2669_vm0, %v3281_v24, %v2761_v9 }
  0xe5   :  { %v1097_v2 = vsel %vm1050_vm12, %v3306_v34, %v958_v22  ;;  %v1144_v11 = vsel %vm1050_vm12, %v3309_v35, %v1005_v59  ;;  %vm1606_vm15 = vcmp.eq.s32.totalorder %v4233_v29, 8  ;;  %2852 = vst [vmem:[#allocation11 + $0x58] sm:$0xff] %v2807_v13  ;;  %vm1745_vm1 = vcmp.eq.s32.totalorder %v4233_v29, 9 }
  0xe6   :  { %v1236_v45 = vsel %vm1189_vm11, %v3325_v40, %v1097_v2  ;;  %v1283_v6 = vsel %vm1189_vm11, %v3328_v41, %v1144_v11  ;;  %vm1884_vm2 = vcmp.eq.s32.totalorder %v4233_v29, 10  ;;  %vm2023_vm0 = vcmp.eq.s32.totalorder %v4233_v29, 11 }
  0xe7   :  { %v1375_v56 = vsel %vm1328_vm13, %v3334_v44, %v1236_v45  ;;  %v1422_v33 = vsel %vm1328_vm13, %v3343_v47, %v1283_v6  ;;  %vm2162_vm5 = vcmp.eq.s32.totalorder %v4233_v29, 12  ;;  %vm2301_vm4 = vcmp.eq.s32.totalorder %v4233_v29, 13  ;;  %v4327_v6 = vld [vmem:[#allocation10 + $0x78] sm:$0xff] }
  0xe8   :  { %v1514_v39 = vsel %vm1467_vm14, %v3353_v50, %v1375_v56  ;;  %v1561_v49 = vsel %vm1467_vm14, %v3356_v51, %v1422_v33  ;;  %vm418_vm3 = vcmp.lt.s32.totalorder %v329_v1, 14  ;;  %vm2440_vm7 = vcmp.eq.s32.totalorder %v4233_v29, 14 }
  0xe9   :  { %v1653_v53 = vsel %vm1606_vm15, %v3365_v54, %v1514_v39  ;;  %v1700_v62 = vsel %vm1606_vm15, %v3373_v57, %v1561_v49  ;;  %vm2716_vm6 = vcmp.lt.f32.partialorder %v4149_v61, %v3265_v17  ;;  %v4283_v3 = vsel %vm418_vm3, %v329_v1, 14 }
  0xea   :  { %v1792_v25 = vsel %vm1745_vm1, %v3382_v60, %v1653_v53  ;;  %v1839_v5 = vsel %vm1745_vm1, %v3387_v63, %v1700_v62  ;;  %vm2670_vm9 = vcmp.gt.f32.partialorder %v4149_v61, %v3262_v16  ;;  %vm495_vm8 = vcmp.eq.s32.totalorder %v4283_v3, 0 }
  0xeb   :  { %vm634_vm10 = vcmp.eq.s32.totalorder %v4283_v3, 1  ;;  %v1931_v37 = vsel %vm1884_vm2, %v3394_v8, %v1792_v25  ;;  %v1978_v1 = vsel %vm1884_vm2, %v3400_v10, %v1839_v5  ;;  %v542_v46 = vsel %vm495_vm8, %v3255_v12, 0.0 }
  0xec   :  { %v589_v55 = vsel %vm495_vm8, %v3267_v19, 0.0  ;;  %v2070_v43 = vsel %vm2023_vm0, %v3409_v14, %v1931_v37  ;;  %v2117_v38 = vsel %vm2023_vm0, %v3415_v18, %v1978_v1  ;;  %v681_v0 = vsel %vm634_vm10, %v3269_v20, %v542_v46 }
  0xed   :  { %v728_v9 = vsel %vm634_vm10, %v3276_v23, %v589_v55  ;;  %v2209_v22 = vsel %vm2162_vm5, %v3425_v26, %v2070_v43  ;;  %v2256_v59 = vsel %vm2162_vm5, %v3434_v36, %v2117_v38  ;;  %vm773_vm12 = vcmp.eq.s32.totalorder %v4283_v3, 2 }
  0xee   :  { %vm912_vm11 = vcmp.eq.s32.totalorder %v4283_v3, 3  ;;  %v2348_v13 = vsel %vm2301_vm4, %v3441_v42, %v2209_v22  ;;  %v2395_v2 = vsel %vm2301_vm4, %v3448_v48, %v2256_v59  ;;  %v820_v11 = vsel %vm773_vm12, %v3286_v27, %v681_v0 }
  0xef   :  { %v867_v45 = vsel %vm773_vm12, %v3289_v28, %v728_v9  ;;  %v2487_v56 = vsel %vm2440_vm7, %v3455_v52, %v2348_v13  ;;  %v2534_v33 = vsel %vm2440_vm7, %v3462_v58, %v2395_v2  ;;  %v959_v39 = vsel %vm912_vm11, %v3295_v30, %v820_v11  ;;  %v4370_v11 = vld [vmem:[#allocation10 + $0x80] sm:$0xff] }
  0xf0   :  { %v1006_v49 = vsel %vm912_vm11, %v3297_v31, %v867_v45  ;;  %v2579_v53 = vmul.f32 %v2487_v56, %v4149_v61  ;;  %vm1051_vm13 = vcmp.eq.s32.totalorder %v4283_v3, 4  ;;  %vm1190_vm14 = vcmp.eq.s32.totalorder %v4283_v3, 5 }
  0xf1   :  { %vm1329_vm15 = vcmp.eq.s32.totalorder %v4283_v3, 6  ;;  %v1098_v62 = vsel %vm1051_vm13, %v3306_v34, %v959_v39  ;;  %v1145_v25 = vsel %vm1051_vm13, %v3309_v35, %v1006_v49  ;;  %vm1468_vm1 = vcmp.eq.s32.totalorder %v4283_v3, 7 }
  0xf2   :  { %v137_v29 = vmul.f32 %v3239_v4, %v4327_v6  ;;  %v2624_v5 = vadd.f32 %v2579_v53, %v2534_v33  ;;  %v1237_v37 = vsel %vm1190_vm14, %v3325_v40, %v1098_v62  ;;  %v1284_v1 = vsel %vm1190_vm14, %v3328_v41, %v1145_v25  ;;  %v4375_v33 = vld [vmem:[#allocation10 + $0x88] sm:$0xff] }
  0xf3   :  { %vm1607_vm2 = vcmp.eq.s32.totalorder %v4283_v3, 8  ;;  %v1376_v46 = vsel %vm1329_vm15, %v3334_v44, %v1237_v37  ;;  %v1423_v55 = vsel %vm1329_vm15, %v3343_v47, %v1284_v1  ;;  %vm1746_vm0 = vcmp.eq.s32.totalorder %v4283_v3, 9 }
  0xf4   :  { %v181_v43 = vceil.f32 %v4237_v32  ;;  %v2762_v38 = vsel %vm2716_vm6, %v3274_v21, %v2624_v5  ;;  %v1515_v0 = vsel %vm1468_vm1, %v3353_v50, %v1376_v46  ;;  %v1562_v9 = vsel %vm1468_vm1, %v3356_v51, %v1423_v55 }
  0xf5   :  { %vm1885_vm5 = vcmp.eq.s32.totalorder %v4283_v3, 10  ;;  %v2808_v22 = vsel %vm2670_vm9, %v3281_v24, %v2762_v38  ;;  %v1654_v59 = vsel %vm1607_vm2, %v3365_v54, %v1515_v0  ;;  %v1701_v32 = vsel %vm1607_vm2, %v3373_v57, %v1562_v9 }
  0xf6   :  { %vm2024_vm4 = vcmp.eq.s32.totalorder %v4283_v3, 11  ;;  %2853 = vst [vmem:[#allocation11 + $0x60] sm:$0xff] %v2808_v22  ;;  %v1793_v13 = vsel %vm1746_vm0, %v3382_v60, %v1654_v59  ;;  %v1840_v2 = vsel %vm1746_vm0, %v3387_v63, %v1701_v32  ;;  %vm2163_vm3 = vcmp.eq.s32.totalorder %v4283_v3, 12 }
  0xf7   :  { %v1932_v45 = vsel %vm1885_vm5, %v3394_v8, %v1793_v13  ;;  %v1979_v61 = vsel %vm1885_vm5, %v3400_v10, %v1840_v2  ;;  %vm2302_vm7 = vcmp.eq.s32.totalorder %v4283_v3, 13  ;;  %v3014_v56 = vcvt.f32.s32 %v181_v43 }
  0xf8   :  { %v2071_v39 = vsel %vm2024_vm4, %v3409_v14, %v1932_v45  ;;  %v2118_v49 = vsel %vm2024_vm4, %v3415_v18, %v1979_v61  ;;  %vm2441_vm6 = vcmp.eq.s32.totalorder %v4283_v3, 14  ;;  %v182_v53 = vceil.f32 %v137_v29 }
  0xf9   :  { %v2210_v62 = vsel %vm2163_vm3, %v3425_v26, %v2071_v39  ;;  %v2257_v25 = vsel %vm2163_vm3, %v3434_v36, %v2118_v49  ;;  %v2926_v5 = vadd.s32 4294967295, %v3014_v56  ;;  %v138_v37 = vmul.f32 %v3239_v4, %v4370_v11 }
  0xfa   :  { %v2349_v1 = vsel %vm2302_vm7, %v3441_v42, %v2210_v62  ;;  %v2396_v46 = vsel %vm2302_vm7, %v3448_v48, %v2257_v25  ;;  %v3016_v55 = vcvt.f32.s32 %v182_v53  ;;  %v139_v43 = vmul.f32 %v3239_v4, %v4375_v33 }
  0xfb   :  { %v2488_v38 = vsel %vm2441_vm6, %v3455_v52, %v2349_v1  ;;  %v2535_v3 = vsel %vm2441_vm6, %v3462_v58, %v2396_v46  ;;  %vm330_vm9 = vcmp.gt.s32.totalorder %v2926_v5, 0  ;;  %v183_v29 = vceil.f32 %v138_v37 }
  0xfc   :  { %v2580_v0 = vmul.f32 %v2488_v38, %v4159_v15  ;;  %v331_v9 = vsel %vm330_vm9, %v2926_v5, 0  ;;  %v2927_v22 = vadd.s32 4294967295, %v3016_v55  ;;  %vm2671_vm8 = vcmp.gt.f32.partialorder %v4159_v15, %v3262_v16 }
  0xfd   :  { %vm2717_vm10 = vcmp.lt.f32.partialorder %v4159_v15, %v3265_v17  ;;  %vm420_vm12 = vcmp.lt.s32.totalorder %v331_v9, 14  ;;  %v4397_v13 = vcvt.f32.s32 %v183_v29  ;;  %v184_v2 = vceil.f32 %v139_v43 }
  0xfe   :  { %v2625_v59 = vadd.f32 %v2580_v0, %v2535_v3  ;;  %v4395_v32 = vsel %vm420_vm12, %v331_v9, 14  ;;  %vm332_vm15 = vcmp.gt.s32.totalorder %v2927_v22, 0 }
  0xff   :  { %vm496_vm11 = vcmp.eq.s32.totalorder %v4395_v32, 0  ;;  %vm635_vm13 = vcmp.eq.s32.totalorder %v4395_v32, 1  ;;  %vm774_vm14 = vcmp.eq.s32.totalorder %v4395_v32, 2  ;;  %vm913_vm1 = vcmp.eq.s32.totalorder %v4395_v32, 3 }
 0x100   :  { %v2763_v45 = vsel %vm2717_vm10, %v3274_v21, %v2625_v59  ;;  %v543_v61 = vsel %vm496_vm11, %v3255_v12, 0.0  ;;  %v590_v15 = vsel %vm496_vm11, %v3267_v19, 0.0  ;;  %vm1052_vm2 = vcmp.eq.s32.totalorder %v4395_v32, 4 }
 0x101   :  { %v2809_v56 = vsel %vm2671_vm8, %v3281_v24, %v2763_v45  ;;  %v682_v39 = vsel %vm635_vm13, %v3269_v20, %v543_v61  ;;  %v729_v49 = vsel %vm635_vm13, %v3276_v23, %v590_v15  ;;  %vm1191_vm0 = vcmp.eq.s32.totalorder %v4395_v32, 5 }
 0x102   :  { %2854 = vst [vmem:[#allocation11 + $0x68] sm:$0xff] %v2809_v56  ;;  %v821_v53 = vsel %vm774_vm14, %v3286_v27, %v682_v39  ;;  %v868_v62 = vsel %vm774_vm14, %v3289_v28, %v729_v49  ;;  %v4413_v25 = vcvt.f32.s32 %v184_v2  ;;  %vm1330_vm5 = vcmp.eq.s32.totalorder %v4395_v32, 6 }
 0x103   :  { %v960_v5 = vsel %vm913_vm1, %v3295_v30, %v821_v53  ;;  %v1007_v37 = vsel %vm913_vm1, %v3297_v31, %v868_v62  ;;  %vm1469_vm4 = vcmp.eq.s32.totalorder %v4395_v32, 7  ;;  %vm1608_vm3 = vcmp.eq.s32.totalorder %v4395_v32, 8 }
 0x104   :  { %v1099_v1 = vsel %vm1052_vm2, %v3306_v34, %v960_v5  ;;  %v1146_v46 = vsel %vm1052_vm2, %v3309_v35, %v1007_v37  ;;  %vm1747_vm7 = vcmp.eq.s32.totalorder %v4395_v32, 9  ;;  %vm1886_vm6 = vcmp.eq.s32.totalorder %v4395_v32, 10 }
 0x105   :  { %v1238_v55 = vsel %vm1191_vm0, %v3325_v40, %v1099_v1  ;;  %v1285_v43 = vsel %vm1191_vm0, %v3328_v41, %v1146_v46  ;;  %vm2025_vm9 = vcmp.eq.s32.totalorder %v4395_v32, 11  ;;  %vm2164_vm8 = vcmp.eq.s32.totalorder %v4395_v32, 12 }
 0x106   :  { %v1377_v38 = vsel %vm1330_vm5, %v3334_v44, %v1238_v55  ;;  %v1424_v3 = vsel %vm1330_vm5, %v3343_v47, %v1285_v43  ;;  %v333_v29 = vsel %vm332_vm15, %v2927_v22, 0  ;;  %vm2303_vm10 = vcmp.eq.s32.totalorder %v4395_v32, 13 }
 0x107   :  { %v1516_v0 = vsel %vm1469_vm4, %v3353_v50, %v1377_v38  ;;  %v1563_v9 = vsel %vm1469_vm4, %v3356_v51, %v1424_v3  ;;  %vm422_vm12 = vcmp.lt.s32.totalorder %v333_v29, 14  ;;  %vm2442_vm11 = vcmp.eq.s32.totalorder %v4395_v32, 14 }
 0x108   :  { %v1655_v59 = vsel %vm1608_vm3, %v3365_v54, %v1516_v0  ;;  %v1702_v2 = vsel %vm1608_vm3, %v3373_v57, %v1563_v9  ;;  %vm2718_vm13 = vcmp.lt.f32.partialorder %v4219_v7, %v3265_v17  ;;  %v4439_v45 = vsel %vm422_vm12, %v333_v29, 14 }
 0x109   :  { %v1794_v22 = vsel %vm1747_vm7, %v3382_v60, %v1655_v59  ;;  %v1841_v61 = vsel %vm1747_vm7, %v3387_v63, %v1702_v2  ;;  %vm2672_vm14 = vcmp.gt.f32.partialorder %v4219_v7, %v3262_v16  ;;  %vm497_vm15 = vcmp.eq.s32.totalorder %v4439_v45, 0 }
 0x10a   :  { %vm636_vm1 = vcmp.eq.s32.totalorder %v4439_v45, 1  ;;  %v1933_v15 = vsel %vm1886_vm6, %v3394_v8, %v1794_v22  ;;  %v1980_v56 = vsel %vm1886_vm6, %v3400_v10, %v1841_v61  ;;  %v544_v39 = vsel %vm497_vm15, %v3255_v12, 0.0 }
 0x10b   :  { %v591_v49 = vsel %vm497_vm15, %v3267_v19, 0.0  ;;  %v2072_v53 = vsel %vm2025_vm9, %v3409_v14, %v1933_v15  ;;  %v2119_v62 = vsel %vm2025_vm9, %v3415_v18, %v1980_v56  ;;  %v683_v5 = vsel %vm636_vm1, %v3269_v20, %v544_v39 }
 0x10c   :  { %v730_v37 = vsel %vm636_vm1, %v3276_v23, %v591_v49  ;;  %v2211_v1 = vsel %vm2164_vm8, %v3425_v26, %v2072_v53  ;;  %v2258_v46 = vsel %vm2164_vm8, %v3434_v36, %v2119_v62  ;;  %vm775_vm2 = vcmp.eq.s32.totalorder %v4439_v45, 2 }
 0x10d   :  { %vm914_vm0 = vcmp.eq.s32.totalorder %v4439_v45, 3  ;;  %v2350_v55 = vsel %vm2303_vm10, %v3441_v42, %v2211_v1  ;;  %v2397_v43 = vsel %vm2303_vm10, %v3448_v48, %v2258_v46  ;;  %v822_v38 = vsel %vm775_vm2, %v3286_v27, %v683_v5 }
 0x10e   :  { %v869_v3 = vsel %vm775_vm2, %v3289_v28, %v730_v37  ;;  %v2489_v29 = vsel %vm2442_vm11, %v3455_v52, %v2350_v55  ;;  %v2536_v0 = vsel %vm2442_vm11, %v3462_v58, %v2397_v43  ;;  %v961_v9 = vsel %vm914_vm0, %v3295_v30, %v822_v38 }
 0x10f   :  { %v1008_v59 = vsel %vm914_vm0, %v3297_v31, %v869_v3  ;;  %v2581_v2 = vmul.f32 %v2489_v29, %v4219_v7  ;;  %vm1053_vm5 = vcmp.eq.s32.totalorder %v4439_v45, 4  ;;  %vm1192_vm4 = vcmp.eq.s32.totalorder %v4439_v45, 5 }
 0x110   :  { %vm1331_vm3 = vcmp.eq.s32.totalorder %v4439_v45, 6  ;;  %v1100_v22 = vsel %vm1053_vm5, %v3306_v34, %v961_v9  ;;  %v1147_v61 = vsel %vm1053_vm5, %v3309_v35, %v1008_v59  ;;  %vm1470_vm7 = vcmp.eq.s32.totalorder %v4439_v45, 7 }
 0x111   :  { %v2928_v32 = vadd.s32 4294967295, %v4397_v13  ;;  %v2626_v15 = vadd.f32 %v2581_v2, %v2536_v0  ;;  %v1239_v56 = vsel %vm1192_vm4, %v3325_v40, %v1100_v22  ;;  %v1286_v39 = vsel %vm1192_vm4, %v3328_v41, %v1147_v61 }
 0x112   :  { %vm1609_vm6 = vcmp.eq.s32.totalorder %v4439_v45, 8  ;;  %v1378_v49 = vsel %vm1331_vm3, %v3334_v44, %v1239_v56  ;;  %v1425_v53 = vsel %vm1331_vm3, %v3343_v47, %v1286_v39  ;;  %vm1748_vm9 = vcmp.eq.s32.totalorder %v4439_v45, 9 }
 0x113   :  { %v4506_v62 = vadd.s32 4294967295, %v4413_v25  ;;  %v2764_v13 = vsel %vm2718_vm13, %v3274_v21, %v2626_v15  ;;  %v1517_v5 = vsel %vm1470_vm7, %v3353_v50, %v1378_v49  ;;  %v1564_v37 = vsel %vm1470_vm7, %v3356_v51, %v1425_v53 }
 0x114   :  { %vm1887_vm8 = vcmp.eq.s32.totalorder %v4439_v45, 10  ;;  %v2810_v1 = vsel %vm2672_vm14, %v3281_v24, %v2764_v13  ;;  %v1656_v46 = vsel %vm1609_vm6, %v3365_v54, %v1517_v5  ;;  %v1703_v25 = vsel %vm1609_vm6, %v3373_v57, %v1564_v37 }
 0x115   :  { %vm2026_vm10 = vcmp.eq.s32.totalorder %v4439_v45, 11  ;;  %vm2719_vm12 = vcmp.lt.f32.partialorder %v4327_v6, %v3265_v17  ;;  %2855 = vst [vmem:[#allocation11 + $0x70] sm:$0xff] %v2810_v1  ;;  %v1795_v55 = vsel %vm1748_vm9, %v3382_v60, %v1656_v46  ;;  %v1842_v43 = vsel %vm1748_vm9, %v3387_v63, %v1703_v25 }
 0x116   :  { %vm2165_vm11 = vcmp.eq.s32.totalorder %v4439_v45, 12  ;;  %vm2673_vm13 = vcmp.gt.f32.partialorder %v4327_v6, %v3262_v16  ;;  %vm334_vm14 = vcmp.gt.s32.totalorder %v2928_v32, 0  ;;  %v1934_v7 = vsel %vm1887_vm8, %v3394_v8, %v1795_v55 }
 0x117   :  { %v1981_v38 = vsel %vm1887_vm8, %v3400_v10, %v1842_v43  ;;  %vm2304_vm15 = vcmp.eq.s32.totalorder %v4439_v45, 13  ;;  %v335_v3 = vsel %vm334_vm14, %v2928_v32, 0  ;;  %v2073_v29 = vsel %vm2026_vm10, %v3409_v14, %v1934_v7 }
 0x118   :  { %v2120_v0 = vsel %vm2026_vm10, %v3415_v18, %v1981_v38  ;;  %vm2443_vm1 = vcmp.eq.s32.totalorder %v4439_v45, 14  ;;  %vm424_vm2 = vcmp.lt.s32.totalorder %v335_v3, 14  ;;  %v2212_v9 = vsel %vm2165_vm11, %v3425_v26, %v2073_v29 }
 0x119   :  { %v2259_v59 = vsel %vm2165_vm11, %v3434_v36, %v2120_v0  ;;  %v4537_v2 = vsel %vm424_vm2, %v335_v3, 14  ;;  %vm336_vm0 = vcmp.gt.s32.totalorder %v4506_v62, 0  ;;  %v2351_v22 = vsel %vm2304_vm15, %v3441_v42, %v2212_v9 }
 0x11a   :  { %v2398_v61 = vsel %vm2304_vm15, %v3448_v48, %v2259_v59  ;;  %vm498_vm5 = vcmp.eq.s32.totalorder %v4537_v2, 0  ;;  %vm637_vm4 = vcmp.eq.s32.totalorder %v4537_v2, 1  ;;  %v2490_v32 = vsel %vm2443_vm1, %v3455_v52, %v2351_v22 }
 0x11b   :  { %v2537_v45 = vsel %vm2443_vm1, %v3462_v58, %v2398_v61  ;;  %v545_v15 = vsel %vm498_vm5, %v3255_v12, 0.0  ;;  %v592_v56 = vsel %vm498_vm5, %v3267_v19, 0.0  ;;  %v2582_v39 = vmul.f32 %v2490_v32, %v4327_v6 }
 0x11c   :  { %v684_v49 = vsel %vm637_vm4, %v3269_v20, %v545_v15  ;;  %v731_v53 = vsel %vm637_vm4, %v3276_v23, %v592_v56  ;;  %vm776_vm3 = vcmp.eq.s32.totalorder %v4537_v2, 2  ;;  %vm915_vm7 = vcmp.eq.s32.totalorder %v4537_v2, 3 }
 0x11d   :  { %v823_v13 = vsel %vm776_vm3, %v3286_v27, %v684_v49  ;;  %v870_v5 = vsel %vm776_vm3, %v3289_v28, %v731_v53  ;;  %vm1054_vm6 = vcmp.eq.s32.totalorder %v4537_v2, 4  ;;  %v2627_v37 = vadd.f32 %v2582_v39, %v2537_v45 }
 0x11e   :  { %v962_v1 = vsel %vm915_vm7, %v3295_v30, %v823_v13  ;;  %v1009_v46 = vsel %vm915_vm7, %v3297_v31, %v870_v5  ;;  %vm1193_vm9 = vcmp.eq.s32.totalorder %v4537_v2, 5  ;;  %vm1332_vm8 = vcmp.eq.s32.totalorder %v4537_v2, 6 }
 0x11f   :  { %v1101_v25 = vsel %vm1054_vm6, %v3306_v34, %v962_v1  ;;  %v1148_v55 = vsel %vm1054_vm6, %v3309_v35, %v1009_v46  ;;  %vm1471_vm10 = vcmp.eq.s32.totalorder %v4537_v2, 7  ;;  %v2765_v43 = vsel %vm2719_vm12, %v3274_v21, %v2627_v37 }
 0x120   :  { %v1240_v7 = vsel %vm1193_vm9, %v3325_v40, %v1101_v25  ;;  %v1287_v38 = vsel %vm1193_vm9, %v3328_v41, %v1148_v55  ;;  %vm1610_vm11 = vcmp.eq.s32.totalorder %v4537_v2, 8  ;;  %v2811_v3 = vsel %vm2673_vm13, %v3281_v24, %v2765_v43 }
 0x121   :  { %v1379_v29 = vsel %vm1332_vm8, %v3334_v44, %v1240_v7  ;;  %v1426_v0 = vsel %vm1332_vm8, %v3343_v47, %v1287_v38  ;;  %vm1749_vm14 = vcmp.eq.s32.totalorder %v4537_v2, 9  ;;  %2856 = vst [vmem:[#allocation11 + $0x78] sm:$0xff] %v2811_v3  ;;  %vm1888_vm12 = vcmp.eq.s32.totalorder %v4537_v2, 10 }
 0x122   :  { %v1518_v9 = vsel %vm1471_vm10, %v3353_v50, %v1379_v29  ;;  %v1565_v59 = vsel %vm1471_vm10, %v3356_v51, %v1426_v0  ;;  %vm2027_vm15 = vcmp.eq.s32.totalorder %v4537_v2, 11  ;;  %vm2166_vm13 = vcmp.eq.s32.totalorder %v4537_v2, 12 }
 0x123   :  { %v1657_v22 = vsel %vm1610_vm11, %v3365_v54, %v1518_v9  ;;  %v1704_v61 = vsel %vm1610_vm11, %v3373_v57, %v1565_v59  ;;  %vm2674_vm1 = vcmp.gt.f32.partialorder %v4370_v11, %v3262_v16  ;;  %v337_v45 = vsel %vm336_vm0, %v4506_v62, 0 }
 0x124   :  { %v1796_v6 = vsel %vm1749_vm14, %v3382_v60, %v1657_v22  ;;  %v1843_v32 = vsel %vm1749_vm14, %v3387_v63, %v1704_v61  ;;  %vm2305_vm2 = vcmp.eq.s32.totalorder %v4537_v2, 13  ;;  %vm426_vm5 = vcmp.lt.s32.totalorder %v337_v45, 14 }
 0x125   :  { %v1935_v15 = vsel %vm1888_vm12, %v3394_v8, %v1796_v6  ;;  %v1982_v56 = vsel %vm1888_vm12, %v3400_v10, %v1843_v32  ;;  %vm2444_vm4 = vcmp.eq.s32.totalorder %v4537_v2, 14  ;;  %v4597_v53 = vsel %vm426_vm5, %v337_v45, 14  ;;  %v4630_v45 = vld [vmem:[#allocation10 + $0x90] sm:$0xff] }
 0x126   :  { %v2074_v39 = vsel %vm2027_vm15, %v3409_v14, %v1935_v15  ;;  %v2121_v49 = vsel %vm2027_vm15, %v3415_v18, %v1982_v56  ;;  %vm499_vm0 = vcmp.eq.s32.totalorder %v4597_v53, 0  ;;  %vm638_vm3 = vcmp.eq.s32.totalorder %v4597_v53, 1 }
 0x127   :  { %v2213_v13 = vsel %vm2166_vm13, %v3425_v26, %v2074_v39  ;;  %v2260_v5 = vsel %vm2166_vm13, %v3434_v36, %v2121_v49  ;;  %v546_v1 = vsel %vm499_vm0, %v3255_v12, 0.0  ;;  %v593_v46 = vsel %vm499_vm0, %v3267_v19, 0.0 }
 0x128   :  { %v2352_v62 = vsel %vm2305_vm2, %v3441_v42, %v2213_v13  ;;  %v2399_v37 = vsel %vm2305_vm2, %v3448_v48, %v2260_v5  ;;  %v685_v55 = vsel %vm638_vm3, %v3269_v20, %v546_v1  ;;  %v732_v43 = vsel %vm638_vm3, %v3276_v23, %v593_v46  ;;  %v4643_v5 = vld [vmem:[#allocation10 + $0x98] sm:$0xff]  ;;  %v4650_v1 = vld [vmem:[#allocation10 + $0xa0] sm:$0xff]  ;;  %v4652_v46 = vld [vmem:[#allocation10 + $0xa8] sm:$0xff] }
 0x129   :  { %v2491_v2 = vsel %vm2444_vm4, %v3455_v52, %v2352_v62  ;;  %v2538_v25 = vsel %vm2444_vm4, %v3462_v58, %v2399_v37  ;;  %vm777_vm7 = vcmp.eq.s32.totalorder %v4597_v53, 2  ;;  %vm916_vm6 = vcmp.eq.s32.totalorder %v4597_v53, 3 }
 0x12a   :  { %v2583_v7 = vmul.f32 %v2491_v2, %v4370_v11  ;;  %vm1055_vm9 = vcmp.eq.s32.totalorder %v4597_v53, 4  ;;  %vm2720_vm8 = vcmp.lt.f32.partialorder %v4370_v11, %v3265_v17  ;;  %v824_v38 = vsel %vm777_vm7, %v3286_v27, %v685_v55 }
 0x12b   :  { %v871_v3 = vsel %vm777_vm7, %v3289_v28, %v732_v43  ;;  %vm1194_vm10 = vcmp.eq.s32.totalorder %v4597_v53, 5  ;;  %v963_v0 = vsel %vm916_vm6, %v3295_v30, %v824_v38  ;;  %vm1333_vm11 = vcmp.eq.s32.totalorder %v4597_v53, 6 }
 0x12c   :  { %v2628_v29 = vadd.f32 %v2583_v7, %v2538_v25  ;;  %v1010_v9 = vsel %vm916_vm6, %v3297_v31, %v871_v3  ;;  %v1102_v59 = vsel %vm1055_vm9, %v3306_v34, %v963_v0  ;;  %vm1472_vm14 = vcmp.eq.s32.totalorder %v4597_v53, 7 }
 0x12d   :  { %v1149_v22 = vsel %vm1055_vm9, %v3309_v35, %v1010_v9  ;;  %v1241_v6 = vsel %vm1194_vm10, %v3325_v40, %v1102_v59  ;;  %vm1611_vm12 = vcmp.eq.s32.totalorder %v4597_v53, 8  ;;  %vm1750_vm15 = vcmp.eq.s32.totalorder %v4597_v53, 9 }
 0x12e   :  { %v2766_v61 = vsel %vm2720_vm8, %v3274_v21, %v2628_v29  ;;  %v1288_v32 = vsel %vm1194_vm10, %v3328_v41, %v1149_v22  ;;  %v1380_v56 = vsel %vm1333_vm11, %v3334_v44, %v1241_v6  ;;  %vm1889_vm13 = vcmp.eq.s32.totalorder %v4597_v53, 10 }
 0x12f   :  { %v2812_v15 = vsel %vm2674_vm1, %v3281_v24, %v2766_v61  ;;  %v1427_v39 = vsel %vm1333_vm11, %v3343_v47, %v1288_v32  ;;  %v1519_v49 = vsel %vm1472_vm14, %v3353_v50, %v1380_v56  ;;  %vm2028_vm2 = vcmp.eq.s32.totalorder %v4597_v53, 11 }
 0x130   :  { %2857 = vst [vmem:[#allocation11 + $0x80] sm:$0xff] %v2812_v15  ;;  %v1566_v13 = vsel %vm1472_vm14, %v3356_v51, %v1427_v39  ;;  %v1658_v11 = vsel %vm1611_vm12, %v3365_v54, %v1519_v49  ;;  %vm2167_vm1 = vcmp.eq.s32.totalorder %v4597_v53, 12  ;;  %v140_v37 = vmul.f32 %v3239_v4, %v4630_v45 }
 0x131   :  { %v1705_v62 = vsel %vm1611_vm12, %v3373_v57, %v1566_v13  ;;  %v1797_v2 = vsel %vm1750_vm15, %v3382_v60, %v1658_v11  ;;  %vm2306_vm5 = vcmp.eq.s32.totalorder %v4597_v53, 13  ;;  %vm2445_vm4 = vcmp.eq.s32.totalorder %v4597_v53, 14 }
 0x132   :  { %v1844_v25 = vsel %vm1750_vm15, %v3387_v63, %v1705_v62  ;;  %v1936_v55 = vsel %vm1889_vm13, %v3394_v8, %v1797_v2  ;;  %v185_v7 = vceil.f32 %v140_v37  ;;  %v141_v38 = vmul.f32 %v3239_v4, %v4643_v5 }
 0x133   :  { %v1983_v43 = vsel %vm1889_vm13, %v3400_v10, %v1844_v25  ;;  %v2075_v3 = vsel %vm2028_vm2, %v3409_v14, %v1936_v55  ;;  %v142_v0 = vmul.f32 %v3239_v4, %v4650_v1  ;;  %v143_v9 = vmul.f32 %v3239_v4, %v4652_v46  ;;  %v4689_v55 = vld [vmem:[#allocation10 + $0xb0] sm:$0xff] }
 0x134   :  { %v2122_v29 = vsel %vm2028_vm2, %v3415_v18, %v1983_v43  ;;  %v2214_v59 = vsel %vm2167_vm1, %v3425_v26, %v2075_v3  ;;  %v3022_v61 = vcvt.f32.s32 %v185_v7  ;;  %v186_v6 = vceil.f32 %v141_v38 }
 0x135   :  { %v2261_v22 = vsel %vm2167_vm1, %v3434_v36, %v2122_v29  ;;  %v2353_v32 = vsel %vm2306_vm5, %v3441_v42, %v2214_v59  ;;  %v187_v56 = vceil.f32 %v142_v0  ;;  %v188_v39 = vceil.f32 %v143_v9 }
 0x136   :  { %v2400_v15 = vsel %vm2306_vm5, %v3448_v48, %v2261_v22  ;;  %v2492_v49 = vsel %vm2445_vm4, %v3455_v52, %v2353_v32  ;;  %v2930_v11 = vadd.s32 4294967295, %v3022_v61  ;;  %v3024_v62 = vcvt.f32.s32 %v186_v6 }
 0x137   :  { %v2539_v13 = vsel %vm2445_vm4, %v3462_v58, %v2400_v15  ;;  %v2584_v37 = vmul.f32 %v2492_v49, %v4375_v33  ;;  %v3026_v2 = vcvt.f32.s32 %v187_v56  ;;  %vm2721_vm0 = vcmp.lt.f32.partialorder %v4375_v33, %v3265_v17 }
 0x138   :  { %vm338_vm3 = vcmp.gt.s32.totalorder %v2930_v11, 0  ;;  %v2931_v25 = vadd.s32 4294967295, %v3024_v62  ;;  %vm2675_vm7 = vcmp.gt.f32.partialorder %v4375_v33, %v3262_v16  ;;  %v4693_v53 = vcvt.f32.s32 %v188_v39 }
 0x139   :  { %v2629_v43 = vadd.f32 %v2584_v37, %v2539_v13  ;;  %v339_v7 = vsel %vm338_vm3, %v2930_v11, 0  ;;  %v4698_v29 = vadd.s32 4294967295, %v3026_v2  ;;  %v4702_v0 = vmul.f32 %v3239_v4, %v4689_v55 }
 0x13a   :  { %vm428_vm6 = vcmp.lt.s32.totalorder %v339_v7, 14  ;;  %vm340_vm9 = vcmp.gt.s32.totalorder %v2931_v25, 0 }
 0x13b   :  { %v2767_v38 = vsel %vm2721_vm0, %v3274_v21, %v2629_v43  ;;  %v4696_v3 = vsel %vm428_vm6, %v339_v7, 14  ;;  %v341_v22 = vsel %vm340_vm9, %v2931_v25, 0 }
 0x13c   :  { %v2813_v9 = vsel %vm2675_vm7, %v3281_v24, %v2767_v38  ;;  %vm500_vm8 = vcmp.eq.s32.totalorder %v4696_v3, 0  ;;  %vm639_vm10 = vcmp.eq.s32.totalorder %v4696_v3, 1  ;;  %vm778_vm11 = vcmp.eq.s32.totalorder %v4696_v3, 2 }
 0x13d   :  { %2858 = vst [vmem:[#allocation11 + $0x88] sm:$0xff] %v2813_v9  ;;  %v547_v33 = vsel %vm500_vm8, %v3255_v12, 0.0  ;;  %v594_v59 = vsel %vm500_vm8, %v3267_v19, 0.0  ;;  %vm917_vm14 = vcmp.eq.s32.totalorder %v4696_v3, 3  ;;  %vm1056_vm12 = vcmp.eq.s32.totalorder %v4696_v3, 4 }
 0x13e   :  { %v686_v61 = vsel %vm639_vm10, %v3269_v20, %v547_v33  ;;  %v733_v6 = vsel %vm639_vm10, %v3276_v23, %v594_v59  ;;  %vm1195_vm15 = vcmp.eq.s32.totalorder %v4696_v3, 5  ;;  %vm1334_vm13 = vcmp.eq.s32.totalorder %v4696_v3, 6 }
 0x13f   :  { %v825_v32 = vsel %vm778_vm11, %v3286_v27, %v686_v61  ;;  %v872_v15 = vsel %vm778_vm11, %v3289_v28, %v733_v6  ;;  %vm1473_vm2 = vcmp.eq.s32.totalorder %v4696_v3, 7  ;;  %vm1612_vm1 = vcmp.eq.s32.totalorder %v4696_v3, 8 }
 0x140   :  { %v964_v56 = vsel %vm917_vm14, %v3295_v30, %v825_v32  ;;  %v1011_v39 = vsel %vm917_vm14, %v3297_v31, %v872_v15  ;;  %vm1751_vm5 = vcmp.eq.s32.totalorder %v4696_v3, 9  ;;  %vm1890_vm4 = vcmp.eq.s32.totalorder %v4696_v3, 10 }
 0x141   :  { %v1103_v49 = vsel %vm1056_vm12, %v3306_v34, %v964_v56  ;;  %v1150_v13 = vsel %vm1056_vm12, %v3309_v35, %v1011_v39  ;;  %vm2029_vm0 = vcmp.eq.s32.totalorder %v4696_v3, 11  ;;  %vm2168_vm3 = vcmp.eq.s32.totalorder %v4696_v3, 12 }
 0x142   :  { %v1242_v11 = vsel %vm1195_vm15, %v3325_v40, %v1103_v49  ;;  %v1289_v62 = vsel %vm1195_vm15, %v3328_v41, %v1150_v13  ;;  %vm2307_vm7 = vcmp.eq.s32.totalorder %v4696_v3, 13  ;;  %vm2446_vm6 = vcmp.eq.s32.totalorder %v4696_v3, 14 }
 0x143   :  { %v1381_v37 = vsel %vm1334_vm13, %v3334_v44, %v1242_v11  ;;  %v1428_v2 = vsel %vm1334_vm13, %v3343_v47, %v1289_v62  ;;  %vm430_vm9 = vcmp.lt.s32.totalorder %v341_v22, 14  ;;  %vm342_vm8 = vcmp.gt.s32.totalorder %v4698_v29, 0 }
 0x144   :  { %v1520_v25 = vsel %vm1473_vm2, %v3353_v50, %v1381_v37  ;;  %v1567_v43 = vsel %vm1473_vm2, %v3356_v51, %v1428_v2  ;;  %v4740_v7 = vsel %vm430_vm9, %v341_v22, 14  ;;  %vm2722_vm10 = vcmp.lt.f32.partialorder %v4630_v45, %v3265_v17 }
 0x145   :  { %v1659_v38 = vsel %vm1612_vm1, %v3365_v54, %v1520_v25  ;;  %v1706_v9 = vsel %vm1612_vm1, %v3373_v57, %v1567_v43  ;;  %vm501_vm11 = vcmp.eq.s32.totalorder %v4740_v7, 0  ;;  %vm640_vm14 = vcmp.eq.s32.totalorder %v4740_v7, 1 }
 0x146   :  { %v1798_v33 = vsel %vm1751_vm5, %v3382_v60, %v1659_v38  ;;  %v1845_v59 = vsel %vm1751_vm5, %v3387_v63, %v1706_v9  ;;  %vm2676_vm12 = vcmp.gt.f32.partialorder %v4630_v45, %v3262_v16  ;;  %v548_v22 = vsel %vm501_vm11, %v3255_v12, 0.0 }
 0x147   :  { %v595_v61 = vsel %vm501_vm11, %v3267_v19, 0.0  ;;  %v1937_v6 = vsel %vm1890_vm4, %v3394_v8, %v1798_v33  ;;  %v1984_v32 = vsel %vm1890_vm4, %v3400_v10, %v1845_v59  ;;  %v687_v15 = vsel %vm640_vm14, %v3269_v20, %v548_v22 }
 0x148   :  { %v734_v56 = vsel %vm640_vm14, %v3276_v23, %v595_v61  ;;  %v2076_v39 = vsel %vm2029_vm0, %v3409_v14, %v1937_v6  ;;  %v2123_v49 = vsel %vm2029_vm0, %v3415_v18, %v1984_v32  ;;  %vm779_vm15 = vcmp.eq.s32.totalorder %v4740_v7, 2 }
 0x149   :  { %vm918_vm13 = vcmp.eq.s32.totalorder %v4740_v7, 3  ;;  %v2215_v13 = vsel %vm2168_vm3, %v3425_v26, %v2076_v39  ;;  %v2262_v11 = vsel %vm2168_vm3, %v3434_v36, %v2123_v49  ;;  %v826_v62 = vsel %vm779_vm15, %v3286_v27, %v687_v15 }
 0x14a   :  { %v873_v37 = vsel %vm779_vm15, %v3289_v28, %v734_v56  ;;  %v2354_v2 = vsel %vm2307_vm7, %v3441_v42, %v2215_v13  ;;  %v2401_v25 = vsel %vm2307_vm7, %v3448_v48, %v2262_v11  ;;  %v965_v43 = vsel %vm918_vm13, %v3295_v30, %v826_v62 }
 0x14b   :  { %v1012_v38 = vsel %vm918_vm13, %v3297_v31, %v873_v37  ;;  %v2493_v9 = vsel %vm2446_vm6, %v3455_v52, %v2354_v2  ;;  %v2540_v33 = vsel %vm2446_vm6, %v3462_v58, %v2401_v25  ;;  %vm1057_vm2 = vcmp.eq.s32.totalorder %v4740_v7, 4 }
 0x14c   :  { %vm1196_vm1 = vcmp.eq.s32.totalorder %v4740_v7, 5  ;;  %v2585_v59 = vmul.f32 %v2493_v9, %v4630_v45  ;;  %v1104_v22 = vsel %vm1057_vm2, %v3306_v34, %v965_v43  ;;  %v1151_v61 = vsel %vm1057_vm2, %v3309_v35, %v1012_v38 }
 0x14d   :  { %vm1335_vm5 = vcmp.eq.s32.totalorder %v4740_v7, 6  ;;  %v1243_v6 = vsel %vm1196_vm1, %v3325_v40, %v1104_v22  ;;  %v1290_v32 = vsel %vm1196_vm1, %v3328_v41, %v1151_v61  ;;  %vm1474_vm4 = vcmp.eq.s32.totalorder %v4740_v7, 7 }
 0x14e   :  { %vm1613_vm0 = vcmp.eq.s32.totalorder %v4740_v7, 8  ;;  %v2630_v3 = vadd.f32 %v2585_v59, %v2540_v33  ;;  %v1382_v15 = vsel %vm1335_vm5, %v3334_v44, %v1243_v6  ;;  %v1429_v56 = vsel %vm1335_vm5, %v3343_v47, %v1290_v32 }
 0x14f   :  { %vm1752_vm3 = vcmp.eq.s32.totalorder %v4740_v7, 9  ;;  %v1521_v39 = vsel %vm1474_vm4, %v3353_v50, %v1382_v15  ;;  %v1568_v49 = vsel %vm1474_vm4, %v3356_v51, %v1429_v56  ;;  %vm1891_vm7 = vcmp.eq.s32.totalorder %v4740_v7, 10 }
 0x150   :  { %v343_v13 = vsel %vm342_vm8, %v4698_v29, 0  ;;  %v2768_v11 = vsel %vm2722_vm10, %v3274_v21, %v2630_v3  ;;  %v1660_v62 = vsel %vm1613_vm0, %v3365_v54, %v1521_v39  ;;  %v1707_v37 = vsel %vm1613_vm0, %v3373_v57, %v1568_v49 }
 0x151   :  { %vm2030_vm6 = vcmp.eq.s32.totalorder %v4740_v7, 11  ;;  %v2814_v2 = vsel %vm2676_vm12, %v3281_v24, %v2768_v11  ;;  %v1799_v25 = vsel %vm1752_vm3, %v3382_v60, %v1660_v62  ;;  %v1846_v29 = vsel %vm1752_vm3, %v3387_v63, %v1707_v37 }
 0x152   :  { %vm2169_vm9 = vcmp.eq.s32.totalorder %v4740_v7, 12  ;;  %vm2677_vm8 = vcmp.gt.f32.partialorder %v4643_v5, %v3262_v16  ;;  %2859 = vst [vmem:[#allocation11 + $0x90] sm:$0xff] %v2814_v2  ;;  %v1938_v43 = vsel %vm1891_vm7, %v3394_v8, %v1799_v25  ;;  %v1985_v38 = vsel %vm1891_vm7, %v3400_v10, %v1846_v29 }
 0x153   :  { %vm2308_vm10 = vcmp.eq.s32.totalorder %v4740_v7, 13  ;;  %vm432_vm11 = vcmp.lt.s32.totalorder %v343_v13, 14  ;;  %v2077_v45 = vsel %vm2030_vm6, %v3409_v14, %v1938_v43  ;;  %v2124_v9 = vsel %vm2030_vm6, %v3415_v18, %v1985_v38 }
 0x154   :  { %vm2447_vm14 = vcmp.eq.s32.totalorder %v4740_v7, 14  ;;  %v4842_v33 = vsel %vm432_vm11, %v343_v13, 14  ;;  %v2216_v59 = vsel %vm2169_vm9, %v3425_v26, %v2077_v45  ;;  %v2263_v22 = vsel %vm2169_vm9, %v3434_v36, %v2124_v9 }
 0x155   :  { %vm502_vm12 = vcmp.eq.s32.totalorder %v4842_v33, 0  ;;  %vm641_vm15 = vcmp.eq.s32.totalorder %v4842_v33, 1  ;;  %v2355_v61 = vsel %vm2308_vm10, %v3441_v42, %v2216_v59  ;;  %v2402_v6 = vsel %vm2308_vm10, %v3448_v48, %v2263_v22 }
 0x156   :  { %v549_v32 = vsel %vm502_vm12, %v3255_v12, 0.0  ;;  %v596_v3 = vsel %vm502_vm12, %v3267_v19, 0.0  ;;  %v2494_v7 = vsel %vm2447_vm14, %v3455_v52, %v2355_v61  ;;  %v2541_v15 = vsel %vm2447_vm14, %v3462_v58, %v2402_v6 }
 0x157   :  { %v688_v56 = vsel %vm641_vm15, %v3269_v20, %v549_v32  ;;  %v735_v39 = vsel %vm641_vm15, %v3276_v23, %v596_v3  ;;  %v2586_v49 = vmul.f32 %v2494_v7, %v4643_v5  ;;  %vm780_vm13 = vcmp.eq.s32.totalorder %v4842_v33, 2 }
 0x158   :  { %vm919_vm2 = vcmp.eq.s32.totalorder %v4842_v33, 3  ;;  %vm1058_vm1 = vcmp.eq.s32.totalorder %v4842_v33, 4  ;;  %vm2723_vm5 = vcmp.lt.f32.partialorder %v4643_v5, %v3265_v17  ;;  %v827_v13 = vsel %vm780_vm13, %v3286_v27, %v688_v56 }
 0x159   :  { %v874_v11 = vsel %vm780_vm13, %v3289_v28, %v735_v39  ;;  %vm1197_vm4 = vcmp.eq.s32.totalorder %v4842_v33, 5  ;;  %v2631_v62 = vadd.f32 %v2586_v49, %v2541_v15  ;;  %v966_v37 = vsel %vm919_vm2, %v3295_v30, %v827_v13 }
 0x15a   :  { %v1013_v2 = vsel %vm919_vm2, %v3297_v31, %v874_v11  ;;  %vm1336_vm0 = vcmp.eq.s32.totalorder %v4842_v33, 6  ;;  %v1105_v25 = vsel %vm1058_vm1, %v3306_v34, %v966_v37  ;;  %vm1475_vm3 = vcmp.eq.s32.totalorder %v4842_v33, 7 }
 0x15b   :  { %v1152_v29 = vsel %vm1058_vm1, %v3309_v35, %v1013_v2  ;;  %v2933_v43 = vadd.s32 4294967295, %v4693_v53  ;;  %v2769_v38 = vsel %vm2723_vm5, %v3274_v21, %v2631_v62  ;;  %v1244_v45 = vsel %vm1197_vm4, %v3325_v40, %v1105_v25 }
 0x15c   :  { %v1291_v9 = vsel %vm1197_vm4, %v3328_v41, %v1152_v29  ;;  %vm1614_vm7 = vcmp.eq.s32.totalorder %v4842_v33, 8  ;;  %v2815_v59 = vsel %vm2677_vm8, %v3281_v24, %v2769_v38  ;;  %v1383_v22 = vsel %vm1336_vm0, %v3334_v44, %v1244_v45 }
 0x15d   :  { %v1430_v61 = vsel %vm1336_vm0, %v3343_v47, %v1291_v9  ;;  %vm1753_vm6 = vcmp.eq.s32.totalorder %v4842_v33, 9  ;;  %2860 = vst [vmem:[#allocation11 + $0x98] sm:$0xff] %v2815_v59  ;;  %v1522_v53 = vsel %vm1475_vm3, %v3353_v50, %v1383_v22  ;;  %vm1892_vm9 = vcmp.eq.s32.totalorder %v4842_v33, 10 }
 0x15e   :  { %v1569_v6 = vsel %vm1475_vm3, %v3356_v51, %v1430_v61  ;;  %v189_v32 = vceil.f32 %v4702_v0  ;;  %v1661_v3 = vsel %vm1614_vm7, %v3365_v54, %v1522_v53  ;;  %vm2031_vm8 = vcmp.eq.s32.totalorder %v4842_v33, 11 }
 0x15f   :  { %v1708_v5 = vsel %vm1614_vm7, %v3373_v57, %v1569_v6  ;;  %vm2170_vm10 = vcmp.eq.s32.totalorder %v4842_v33, 12  ;;  %v1800_v7 = vsel %vm1753_vm6, %v3382_v60, %v1661_v3  ;;  %vm2309_vm11 = vcmp.eq.s32.totalorder %v4842_v33, 13 }
 0x160   :  { %v1847_v15 = vsel %vm1753_vm6, %v3387_v63, %v1708_v5  ;;  %vm2678_vm14 = vcmp.gt.f32.partialorder %v4650_v1, %v3262_v16  ;;  %vm344_vm12 = vcmp.gt.s32.totalorder %v2933_v43, 0  ;;  %v1939_v0 = vsel %vm1892_vm9, %v3394_v8, %v1800_v7 }
 0x161   :  { %v1986_v56 = vsel %vm1892_vm9, %v3400_v10, %v1847_v15  ;;  %vm2448_vm15 = vcmp.eq.s32.totalorder %v4842_v33, 14  ;;  %v345_v39 = vsel %vm344_vm12, %v2933_v43, 0  ;;  %v2078_v49 = vsel %vm2031_vm8, %v3409_v14, %v1939_v0 }
 0x162   :  { %v2125_v13 = vsel %vm2031_vm8, %v3415_v18, %v1986_v56  ;;  %vm2724_vm13 = vcmp.lt.f32.partialorder %v4650_v1, %v3265_v17  ;;  %vm434_vm2 = vcmp.lt.s32.totalorder %v345_v39, 14  ;;  %v2217_v11 = vsel %vm2170_vm10, %v3425_v26, %v2078_v49 }
 0x163   :  { %v2264_v62 = vsel %vm2170_vm10, %v3434_v36, %v2125_v13  ;;  %v4905_v37 = vsel %vm434_vm2, %v345_v39, 14  ;;  %v3030_v2 = vcvt.f32.s32 %v189_v32  ;;  %v2356_v25 = vsel %vm2309_vm11, %v3441_v42, %v2217_v11 }
 0x164   :  { %v2403_v29 = vsel %vm2309_vm11, %v3448_v48, %v2264_v62  ;;  %vm503_vm1 = vcmp.eq.s32.totalorder %v4905_v37, 0  ;;  %vm642_vm5 = vcmp.eq.s32.totalorder %v4905_v37, 1  ;;  %v2495_v43 = vsel %vm2448_vm15, %v3455_v52, %v2356_v25  ;;  %v4951_v25 = vld [vmem:[#allocation10 + $0xb8] sm:$0xff] }
 0x165   :  { %v2542_v38 = vsel %vm2448_vm15, %v3462_v58, %v2403_v29  ;;  %v550_v45 = vsel %vm503_vm1, %v3255_v12, 0.0  ;;  %v597_v9 = vsel %vm503_vm1, %v3267_v19, 0.0  ;;  %v2587_v59 = vmul.f32 %v2495_v43, %v4650_v1 }
 0x166   :  { %v689_v22 = vsel %vm642_vm5, %v3269_v20, %v550_v45  ;;  %v736_v61 = vsel %vm642_vm5, %v3276_v23, %v597_v9  ;;  %vm781_vm4 = vcmp.eq.s32.totalorder %v4905_v37, 2  ;;  %vm920_vm0 = vcmp.eq.s32.totalorder %v4905_v37, 3 }
 0x167   :  { %v828_v33 = vsel %vm781_vm4, %v3286_v27, %v689_v22  ;;  %v875_v53 = vsel %vm781_vm4, %v3289_v28, %v736_v61  ;;  %vm1059_vm3 = vcmp.eq.s32.totalorder %v4905_v37, 4  ;;  %v2632_v6 = vadd.f32 %v2587_v59, %v2542_v38 }
 0x168   :  { %v967_v32 = vsel %vm920_vm0, %v3295_v30, %v828_v33  ;;  %v1014_v3 = vsel %vm920_vm0, %v3297_v31, %v875_v53  ;;  %vm1198_vm7 = vcmp.eq.s32.totalorder %v4905_v37, 5  ;;  %vm1337_vm6 = vcmp.eq.s32.totalorder %v4905_v37, 6 }
 0x169   :  { %v1106_v5 = vsel %vm1059_vm3, %v3306_v34, %v967_v32  ;;  %v1153_v7 = vsel %vm1059_vm3, %v3309_v35, %v1014_v3  ;;  %vm1476_vm9 = vcmp.eq.s32.totalorder %v4905_v37, 7  ;;  %v2770_v15 = vsel %vm2724_vm13, %v3274_v21, %v2632_v6 }
 0x16a   :  { %v1245_v0 = vsel %vm1198_vm7, %v3325_v40, %v1106_v5  ;;  %v1292_v56 = vsel %vm1198_vm7, %v3328_v41, %v1153_v7  ;;  %vm1615_vm8 = vcmp.eq.s32.totalorder %v4905_v37, 8  ;;  %v2816_v39 = vsel %vm2678_vm14, %v3281_v24, %v2770_v15  ;;  %v4975_v5 = vld [vmem:[#allocation10 + $0xc0] sm:$0xff] }
 0x16b   :  { %v1384_v49 = vsel %vm1337_vm6, %v3334_v44, %v1245_v0  ;;  %v1431_v13 = vsel %vm1337_vm6, %v3343_v47, %v1292_v56  ;;  %vm1754_vm10 = vcmp.eq.s32.totalorder %v4905_v37, 9  ;;  %2861 = vst [vmem:[#allocation11 + $0xa0] sm:$0xff] %v2816_v39  ;;  %vm1893_vm11 = vcmp.eq.s32.totalorder %v4905_v37, 10 }
 0x16c   :  { %v1523_v11 = vsel %vm1476_vm9, %v3353_v50, %v1384_v49  ;;  %v1570_v62 = vsel %vm1476_vm9, %v3356_v51, %v1431_v13  ;;  %vm2032_vm14 = vcmp.eq.s32.totalorder %v4905_v37, 11  ;;  %vm2171_vm12 = vcmp.eq.s32.totalorder %v4905_v37, 12 }
 0x16d   :  { %v1662_v29 = vsel %vm1615_vm8, %v3365_v54, %v1523_v11  ;;  %v1709_v1 = vsel %vm1615_vm8, %v3373_v57, %v1570_v62  ;;  %v2934_v45 = vadd.s32 4294967295, %v3030_v2  ;;  %vm2310_vm15 = vcmp.eq.s32.totalorder %v4905_v37, 13 }
 0x16e   :  { %v1801_v43 = vsel %vm1754_vm10, %v3382_v60, %v1662_v29  ;;  %v1848_v38 = vsel %vm1754_vm10, %v3387_v63, %v1709_v1  ;;  %v145_v22 = vmul.f32 %v3239_v4, %v4951_v25  ;;  %vm2449_vm13 = vcmp.eq.s32.totalorder %v4905_v37, 14 }
 0x16f   :  { %v1940_v9 = vsel %vm1893_vm11, %v3394_v8, %v1801_v43  ;;  %v1987_v59 = vsel %vm1893_vm11, %v3400_v10, %v1848_v38  ;;  %vm346_vm2 = vcmp.gt.s32.totalorder %v2934_v45, 0  ;;  %vm2679_vm1 = vcmp.gt.f32.partialorder %v4652_v46, %v3262_v16 }
 0x170   :  { %v2079_v61 = vsel %vm2032_vm14, %v3409_v14, %v1940_v9  ;;  %v2126_v33 = vsel %vm2032_vm14, %v3415_v18, %v1987_v59  ;;  %v347_v6 = vsel %vm346_vm2, %v2934_v45, 0  ;;  %vm2725_vm5 = vcmp.lt.f32.partialorder %v4652_v46, %v3265_v17 }
 0x171   :  { %v2218_v53 = vsel %vm2171_vm12, %v3425_v26, %v2079_v61  ;;  %v2265_v2 = vsel %vm2171_vm12, %v3434_v36, %v2126_v33  ;;  %vm436_vm4 = vcmp.lt.s32.totalorder %v347_v6, 14  ;;  %v190_v0 = vceil.f32 %v145_v22 }
 0x172   :  { %v2357_v32 = vsel %vm2310_vm15, %v3441_v42, %v2218_v53  ;;  %v2404_v3 = vsel %vm2310_vm15, %v3448_v48, %v2265_v2  ;;  %v4979_v15 = vsel %vm436_vm4, %v347_v6, 14  ;;  %v146_v13 = vmul.f32 %v3239_v4, %v4975_v5 }
 0x173   :  { %v2496_v37 = vsel %vm2449_vm13, %v3455_v52, %v2357_v32  ;;  %v2543_v7 = vsel %vm2449_vm13, %v3462_v58, %v2404_v3  ;;  %vm504_vm0 = vcmp.eq.s32.totalorder %v4979_v15, 0  ;;  %vm643_vm3 = vcmp.eq.s32.totalorder %v4979_v15, 1 }
 0x174   :  { %v2588_v56 = vmul.f32 %v2496_v37, %v4652_v46  ;;  %vm782_vm7 = vcmp.eq.s32.totalorder %v4979_v15, 2  ;;  %v551_v39 = vsel %vm504_vm0, %v3255_v12, 0.0  ;;  %v598_v49 = vsel %vm504_vm0, %v3267_v19, 0.0 }
 0x175   :  { %vm921_vm6 = vcmp.eq.s32.totalorder %v4979_v15, 3  ;;  %v690_v62 = vsel %vm643_vm3, %v3269_v20, %v551_v39  ;;  %v737_v29 = vsel %vm643_vm3, %v3276_v23, %v598_v49  ;;  %vm1060_vm9 = vcmp.eq.s32.totalorder %v4979_v15, 4  ;;  %v5026_v39 = vld [vmem:[#allocation10 + $0xc8] sm:$0xff] }
 0x176   :  { %v2633_v11 = vadd.f32 %v2588_v56, %v2543_v7  ;;  %v829_v1 = vsel %vm782_vm7, %v3286_v27, %v690_v62  ;;  %v876_v43 = vsel %vm782_vm7, %v3289_v28, %v737_v29  ;;  %vm1199_vm8 = vcmp.eq.s32.totalorder %v4979_v15, 5 }
 0x177   :  { %v3032_v38 = vcvt.f32.s32 %v190_v0  ;;  %v968_v9 = vsel %vm921_vm6, %v3295_v30, %v829_v1  ;;  %v1015_v59 = vsel %vm921_vm6, %v3297_v31, %v876_v43  ;;  %vm1338_vm10 = vcmp.eq.s32.totalorder %v4979_v15, 6 }
 0x178   :  { %v2771_v45 = vsel %vm2725_vm5, %v3274_v21, %v2633_v11  ;;  %v1107_v61 = vsel %vm1060_vm9, %v3306_v34, %v968_v9  ;;  %v1154_v33 = vsel %vm1060_vm9, %v3309_v35, %v1015_v59  ;;  %vm1477_vm11 = vcmp.eq.s32.totalorder %v4979_v15, 7 }
 0x179   :  { %v2817_v22 = vsel %vm2679_vm1, %v3281_v24, %v2771_v45  ;;  %v1246_v53 = vsel %vm1199_vm8, %v3325_v40, %v1107_v61  ;;  %v1293_v2 = vsel %vm1199_vm8, %v3328_v41, %v1154_v33  ;;  %vm1616_vm14 = vcmp.eq.s32.totalorder %v4979_v15, 8 }
 0x17a   :  { %2862 = vst [vmem:[#allocation11 + $0xa8] sm:$0xff] %v2817_v22  ;;  %v191_v6 = vceil.f32 %v146_v13  ;;  %v1385_v32 = vsel %vm1338_vm10, %v3334_v44, %v1246_v53  ;;  %v1432_v3 = vsel %vm1338_vm10, %v3343_v47, %v1293_v2  ;;  %vm1755_vm12 = vcmp.eq.s32.totalorder %v4979_v15, 9 }
 0x17b   :  { %vm1894_vm15 = vcmp.eq.s32.totalorder %v4979_v15, 10  ;;  %v1524_v46 = vsel %vm1477_vm11, %v3353_v50, %v1385_v32  ;;  %v1571_v37 = vsel %vm1477_vm11, %v3356_v51, %v1432_v3  ;;  %vm2033_vm13 = vcmp.eq.s32.totalorder %v4979_v15, 11 }
 0x17c   :  { %v2935_v7 = vadd.s32 4294967295, %v3032_v38  ;;  %v1663_v0 = vsel %vm1616_vm14, %v3365_v54, %v1524_v46  ;;  %v1710_v56 = vsel %vm1616_vm14, %v3373_v57, %v1571_v37  ;;  %vm2172_vm2 = vcmp.eq.s32.totalorder %v4979_v15, 12 }
 0x17d   :  { %vm2311_vm1 = vcmp.eq.s32.totalorder %v4979_v15, 13  ;;  %vm2726_vm5 = vcmp.lt.f32.partialorder %v4689_v55, %v3265_v17  ;;  %v1802_v49 = vsel %vm1755_vm12, %v3382_v60, %v1663_v0  ;;  %v1849_v13 = vsel %vm1755_vm12, %v3387_v63, %v1710_v56 }
 0x17e   :  { %vm2680_vm4 = vcmp.gt.f32.partialorder %v4689_v55, %v3262_v16  ;;  %vm348_vm0 = vcmp.gt.s32.totalorder %v2935_v7, 0  ;;  %v3034_v11 = vcvt.f32.s32 %v191_v6  ;;  %v1941_v62 = vsel %vm1894_vm15, %v3394_v8, %v1802_v49 }
 0x17f   :  { %v1988_v29 = vsel %vm1894_vm15, %v3400_v10, %v1849_v13  ;;  %vm2450_vm3 = vcmp.eq.s32.totalorder %v4979_v15, 14  ;;  %v349_v1 = vsel %vm348_vm0, %v2935_v7, 0  ;;  %v2080_v43 = vsel %vm2033_vm13, %v3409_v14, %v1941_v62 }
 0x180   :  { %v2127_v38 = vsel %vm2033_vm13, %v3415_v18, %v1988_v29  ;;  %vm438_vm7 = vcmp.lt.s32.totalorder %v349_v1, 14  ;;  %v147_v45 = vmul.f32 %v3239_v4, %v5026_v39  ;;  %v2219_v9 = vsel %vm2172_vm2, %v3425_v26, %v2080_v43 }
 0x181   :  { %v2266_v59 = vsel %vm2172_vm2, %v3434_v36, %v2127_v38  ;;  %v5053_v22 = vsel %vm438_vm7, %v349_v1, 14  ;;  %v2936_v61 = vadd.s32 4294967295, %v3034_v11  ;;  %v2358_v33 = vsel %vm2311_vm1, %v3441_v42, %v2219_v9 }
 0x182   :  { %v2405_v53 = vsel %vm2311_vm1, %v3448_v48, %v2266_v59  ;;  %vm505_vm6 = vcmp.eq.s32.totalorder %v5053_v22, 0  ;;  %vm644_vm9 = vcmp.eq.s32.totalorder %v5053_v22, 1  ;;  %v2497_v2 = vsel %vm2450_vm3, %v3455_v52, %v2358_v33 }
 0x183   :  { %v2544_v6 = vsel %vm2450_vm3, %v3462_v58, %v2405_v53  ;;  %v552_v32 = vsel %vm505_vm6, %v3255_v12, 0.0  ;;  %v599_v3 = vsel %vm505_vm6, %v3267_v19, 0.0  ;;  %v2589_v46 = vmul.f32 %v2497_v2, %v4689_v55 }
 0x184   :  { %v691_v37 = vsel %vm644_vm9, %v3269_v20, %v552_v32  ;;  %v738_v7 = vsel %vm644_vm9, %v3276_v23, %v599_v3  ;;  %vm783_vm8 = vcmp.eq.s32.totalorder %v5053_v22, 2  ;;  %vm922_vm10 = vcmp.eq.s32.totalorder %v5053_v22, 3 }
 0x185   :  { %v830_v15 = vsel %vm783_vm8, %v3286_v27, %v691_v37  ;;  %v877_v0 = vsel %vm783_vm8, %v3289_v28, %v738_v7  ;;  %vm1061_vm11 = vcmp.eq.s32.totalorder %v5053_v22, 4  ;;  %v2634_v56 = vadd.f32 %v2589_v46, %v2544_v6 }
 0x186   :  { %v969_v49 = vsel %vm922_vm10, %v3295_v30, %v830_v15  ;;  %v1016_v13 = vsel %vm922_vm10, %v3297_v31, %v877_v0  ;;  %vm1200_vm14 = vcmp.eq.s32.totalorder %v5053_v22, 5  ;;  %vm1339_vm12 = vcmp.eq.s32.totalorder %v5053_v22, 6 }
 0x187   :  { %v1108_v11 = vsel %vm1061_vm11, %v3306_v34, %v969_v49  ;;  %v1155_v62 = vsel %vm1061_vm11, %v3309_v35, %v1016_v13  ;;  %vm1478_vm15 = vcmp.eq.s32.totalorder %v5053_v22, 7  ;;  %v2772_v29 = vsel %vm2726_vm5, %v3274_v21, %v2634_v56 }
 0x188   :  { %v1247_v1 = vsel %vm1200_vm14, %v3325_v40, %v1108_v11  ;;  %v1294_v43 = vsel %vm1200_vm14, %v3328_v41, %v1155_v62  ;;  %vm1617_vm13 = vcmp.eq.s32.totalorder %v5053_v22, 8  ;;  %v2818_v38 = vsel %vm2680_vm4, %v3281_v24, %v2772_v29 }
 0x189   :  { %v1386_v9 = vsel %vm1339_vm12, %v3334_v44, %v1247_v1  ;;  %v1433_v59 = vsel %vm1339_vm12, %v3343_v47, %v1294_v43  ;;  %vm1756_vm2 = vcmp.eq.s32.totalorder %v5053_v22, 9  ;;  %2863 = vst [vmem:[#allocation11 + $0xb0] sm:$0xff] %v2818_v38  ;;  %vm1895_vm1 = vcmp.eq.s32.totalorder %v5053_v22, 10 }
 0x18a   :  { %v1525_v33 = vsel %vm1478_vm15, %v3353_v50, %v1386_v9  ;;  %v1572_v53 = vsel %vm1478_vm15, %v3356_v51, %v1433_v59  ;;  %vm2034_vm5 = vcmp.eq.s32.totalorder %v5053_v22, 11  ;;  %vm2727_vm4 = vcmp.lt.f32.partialorder %v4951_v25, %v3265_v17 }
 0x18b   :  { %v1664_v2 = vsel %vm1617_vm13, %v3365_v54, %v1525_v33  ;;  %v1711_v6 = vsel %vm1617_vm13, %v3373_v57, %v1572_v53  ;;  %v192_v55 = vceil.f32 %v147_v45  ;;  %vm2173_vm0 = vcmp.eq.s32.totalorder %v5053_v22, 12 }
 0x18c   :  { %v1803_v32 = vsel %vm1756_vm2, %v3382_v60, %v1664_v2  ;;  %v1850_v3 = vsel %vm1756_vm2, %v3387_v63, %v1711_v6  ;;  %vm2681_vm3 = vcmp.gt.f32.partialorder %v4951_v25, %v3262_v16  ;;  %vm350_vm7 = vcmp.gt.s32.totalorder %v2936_v61, 0 }
 0x18d   :  { %v1942_v46 = vsel %vm1895_vm1, %v3394_v8, %v1803_v32  ;;  %v1989_v37 = vsel %vm1895_vm1, %v3400_v10, %v1850_v3  ;;  %vm2312_vm6 = vcmp.eq.s32.totalorder %v5053_v22, 13  ;;  %v351_v7 = vsel %vm350_vm7, %v2936_v61, 0 }
 0x18e   :  { %v2081_v15 = vsel %vm2034_vm5, %v3409_v14, %v1942_v46  ;;  %v2128_v45 = vsel %vm2034_vm5, %v3415_v18, %v1989_v37  ;;  %vm2451_vm9 = vcmp.eq.s32.totalorder %v5053_v22, 14  ;;  %vm440_vm8 = vcmp.lt.s32.totalorder %v351_v7, 14 }
 0x18f   :  { %v2220_v0 = vsel %vm2173_vm0, %v3425_v26, %v2081_v15  ;;  %v2267_v56 = vsel %vm2173_vm0, %v3434_v36, %v2128_v45  ;;  %v5117_v49 = vsel %vm440_vm8, %v351_v7, 14  ;;  %v3036_v13 = vcvt.f32.s32 %v192_v55 }
 0x190   :  { %v2359_v11 = vsel %vm2312_vm6, %v3441_v42, %v2220_v0  ;;  %v2406_v62 = vsel %vm2312_vm6, %v3448_v48, %v2267_v56  ;;  %vm506_vm10 = vcmp.eq.s32.totalorder %v5117_v49, 0  ;;  %vm645_vm11 = vcmp.eq.s32.totalorder %v5117_v49, 1 }
 0x191   :  { %v2498_v61 = vsel %vm2451_vm9, %v3455_v52, %v2359_v11  ;;  %v2545_v22 = vsel %vm2451_vm9, %v3462_v58, %v2406_v62  ;;  %v553_v29 = vsel %vm506_vm10, %v3255_v12, 0.0  ;;  %v600_v1 = vsel %vm506_vm10, %v3267_v19, 0.0 }
 0x192   :  { %v2590_v43 = vmul.f32 %v2498_v61, %v4951_v25  ;;  %v692_v38 = vsel %vm645_vm11, %v3269_v20, %v553_v29  ;;  %v739_v9 = vsel %vm645_vm11, %v3276_v23, %v600_v1  ;;  %vm784_vm14 = vcmp.eq.s32.totalorder %v5117_v49, 2 }
 0x193   :  { %v831_v59 = vsel %vm784_vm14, %v3286_v27, %v692_v38  ;;  %v878_v33 = vsel %vm784_vm14, %v3289_v28, %v739_v9  ;;  %vm923_vm12 = vcmp.eq.s32.totalorder %v5117_v49, 3  ;;  %vm1062_vm15 = vcmp.eq.s32.totalorder %v5117_v49, 4  ;;  %v5171_v9 = vld [vmem:[#allocation10 + $0xd0] sm:$0xff] }
 0x194   :  { %v2635_v53 = vadd.f32 %v2590_v43, %v2545_v22  ;;  %v970_v2 = vsel %vm923_vm12, %v3295_v30, %v831_v59  ;;  %v1017_v6 = vsel %vm923_vm12, %v3297_v31, %v878_v33  ;;  %vm1201_vm13 = vcmp.eq.s32.totalorder %v5117_v49, 5 }
 0x195   :  { %v1109_v55 = vsel %vm1062_vm15, %v3306_v34, %v970_v2  ;;  %v1156_v32 = vsel %vm1062_vm15, %v3309_v35, %v1017_v6  ;;  %vm1340_vm2 = vcmp.eq.s32.totalorder %v5117_v49, 6  ;;  %vm1479_vm1 = vcmp.eq.s32.totalorder %v5117_v49, 7 }
 0x196   :  { %v2773_v3 = vsel %vm2727_vm4, %v3274_v21, %v2635_v53  ;;  %v1248_v46 = vsel %vm1201_vm13, %v3325_v40, %v1109_v55  ;;  %v1295_v37 = vsel %vm1201_vm13, %v3328_v41, %v1156_v32  ;;  %vm1618_vm5 = vcmp.eq.s32.totalorder %v5117_v49, 8 }
 0x197   :  { %v2819_v7 = vsel %vm2681_vm3, %v3281_v24, %v2773_v3  ;;  %v1387_v15 = vsel %vm1340_vm2, %v3334_v44, %v1248_v46  ;;  %v1434_v45 = vsel %vm1340_vm2, %v3343_v47, %v1295_v37  ;;  %vm1757_vm0 = vcmp.eq.s32.totalorder %v5117_v49, 9 }
 0x198   :  { %2864 = vst [vmem:[#allocation11 + $0xb8] sm:$0xff] %v2819_v7  ;;  %v1526_v0 = vsel %vm1479_vm1, %v3353_v50, %v1387_v15  ;;  %v1573_v56 = vsel %vm1479_vm1, %v3356_v51, %v1434_v45  ;;  %vm1896_vm4 = vcmp.eq.s32.totalorder %v5117_v49, 10  ;;  %vm2035_vm7 = vcmp.eq.s32.totalorder %v5117_v49, 11 }
 0x199   :  { %v1665_v11 = vsel %vm1618_vm5, %v3365_v54, %v1526_v0  ;;  %v1712_v62 = vsel %vm1618_vm5, %v3373_v57, %v1573_v56  ;;  %vm2174_vm3 = vcmp.eq.s32.totalorder %v5117_v49, 12  ;;  %v2937_v22 = vadd.s32 4294967295, %v3036_v13 }
 0x19a   :  { %v1804_v25 = vsel %vm1757_vm0, %v3382_v60, %v1665_v11  ;;  %v1851_v61 = vsel %vm1757_vm0, %v3387_v63, %v1712_v62  ;;  %vm2313_vm6 = vcmp.eq.s32.totalorder %v5117_v49, 13  ;;  %vm2452_vm9 = vcmp.eq.s32.totalorder %v5117_v49, 14  ;;  %v5181_v49 = vld [vmem:[#allocation10 + $0xd8] sm:$0xff] }
 0x19b   :  { %v1943_v29 = vsel %vm1896_vm4, %v3394_v8, %v1804_v25  ;;  %v1990_v1 = vsel %vm1896_vm4, %v3400_v10, %v1851_v61  ;;  %vm352_vm8 = vcmp.gt.s32.totalorder %v2937_v22, 0  ;;  %vm2682_vm10 = vcmp.gt.f32.partialorder %v4975_v5, %v3262_v16 }
 0x19c   :  { %v2082_v43 = vsel %vm2035_vm7, %v3409_v14, %v1943_v29  ;;  %v2129_v38 = vsel %vm2035_vm7, %v3415_v18, %v1990_v1  ;;  %v353_v13 = vsel %vm352_vm8, %v2937_v22, 0  ;;  %vm2728_vm11 = vcmp.lt.f32.partialorder %v4975_v5, %v3265_v17 }
 0x19d   :  { %v2221_v59 = vsel %vm2174_vm3, %v3425_v26, %v2082_v43  ;;  %v2268_v33 = vsel %vm2174_vm3, %v3434_v36, %v2129_v38  ;;  %vm442_vm14 = vcmp.lt.s32.totalorder %v353_v13, 14  ;;  %v148_v3 = vmul.f32 %v3239_v4, %v5171_v9 }
 0x19e   :  { %v2360_v53 = vsel %vm2313_vm6, %v3441_v42, %v2221_v59  ;;  %v2407_v2 = vsel %vm2313_vm6, %v3448_v48, %v2268_v33  ;;  %v5185_v32 = vsel %vm442_vm14, %v353_v13, 14  ;;  %v149_v15 = vmul.f32 %v3239_v4, %v5181_v49 }
 0x19f   :  { %v2499_v6 = vsel %vm2452_vm9, %v3455_v52, %v2360_v53  ;;  %v2546_v55 = vsel %vm2452_vm9, %v3462_v58, %v2407_v2  ;;  %vm507_vm12 = vcmp.eq.s32.totalorder %v5185_v32, 0  ;;  %vm646_vm15 = vcmp.eq.s32.totalorder %v5185_v32, 1 }
 0x1a0   :  { %v2591_v46 = vmul.f32 %v2499_v6, %v4975_v5  ;;  %vm785_vm13 = vcmp.eq.s32.totalorder %v5185_v32, 2  ;;  %v554_v37 = vsel %vm507_vm12, %v3255_v12, 0.0  ;;  %v601_v7 = vsel %vm507_vm12, %v3267_v19, 0.0 }
 0x1a1   :  { %vm924_vm2 = vcmp.eq.s32.totalorder %v5185_v32, 3  ;;  %v693_v0 = vsel %vm646_vm15, %v3269_v20, %v554_v37  ;;  %v740_v56 = vsel %vm646_vm15, %v3276_v23, %v601_v7  ;;  %vm1063_vm1 = vcmp.eq.s32.totalorder %v5185_v32, 4 }
 0x1a2   :  { %v2636_v45 = vadd.f32 %v2591_v46, %v2546_v55  ;;  %v832_v11 = vsel %vm785_vm13, %v3286_v27, %v693_v0  ;;  %v879_v62 = vsel %vm785_vm13, %v3289_v28, %v740_v56  ;;  %vm1202_vm5 = vcmp.eq.s32.totalorder %v5185_v32, 5 }
 0x1a3   :  { %v193_v25 = vceil.f32 %v148_v3  ;;  %v971_v22 = vsel %vm924_vm2, %v3295_v30, %v832_v11  ;;  %v1018_v29 = vsel %vm924_vm2, %v3297_v31, %v879_v62  ;;  %vm1341_vm0 = vcmp.eq.s32.totalorder %v5185_v32, 6 }
 0x1a4   :  { %v2774_v61 = vsel %vm2728_vm11, %v3274_v21, %v2636_v45  ;;  %v1110_v43 = vsel %vm1063_vm1, %v3306_v34, %v971_v22  ;;  %v1157_v38 = vsel %vm1063_vm1, %v3309_v35, %v1018_v29  ;;  %vm1480_vm4 = vcmp.eq.s32.totalorder %v5185_v32, 7 }
 0x1a5   :  { %v2820_v1 = vsel %vm2682_vm10, %v3281_v24, %v2774_v61  ;;  %v1249_v59 = vsel %vm1202_vm5, %v3325_v40, %v1110_v43  ;;  %v1296_v33 = vsel %vm1202_vm5, %v3328_v41, %v1157_v38  ;;  %vm1619_vm7 = vcmp.eq.s32.totalorder %v5185_v32, 8  ;;  %v5241_v61 = vld [vmem:[#allocation10 + $0xe0] sm:$0xff] }
 0x1a6   :  { %2865 = vst [vmem:[#allocation11 + $0xc0] sm:$0xff] %v2820_v1  ;;  %v194_v13 = vceil.f32 %v149_v15  ;;  %v1388_v53 = vsel %vm1341_vm0, %v3334_v44, %v1249_v59  ;;  %v1435_v2 = vsel %vm1341_vm0, %v3343_v47, %v1296_v33  ;;  %vm1758_vm3 = vcmp.eq.s32.totalorder %v5185_v32, 9 }
 0x1a7   :  { %v1527_v5 = vsel %vm1480_vm4, %v3353_v50, %v1388_v53  ;;  %v1574_v6 = vsel %vm1480_vm4, %v3356_v51, %v1435_v2  ;;  %vm1897_vm6 = vcmp.eq.s32.totalorder %v5185_v32, 10  ;;  %v3038_v55 = vcvt.f32.s32 %v193_v25 }
 0x1a8   :  { %v1666_v3 = vsel %vm1619_vm7, %v3365_v54, %v1527_v5  ;;  %v1713_v46 = vsel %vm1619_vm7, %v3373_v57, %v1574_v6  ;;  %vm2036_vm9 = vcmp.eq.s32.totalorder %v5185_v32, 11  ;;  %vm2175_vm8 = vcmp.eq.s32.totalorder %v5185_v32, 12 }
 0x1a9   :  { %v1805_v37 = vsel %vm1758_vm3, %v3382_v60, %v1666_v3  ;;  %v1852_v7 = vsel %vm1758_vm3, %v3387_v63, %v1713_v46  ;;  %vm2683_vm10 = vcmp.gt.f32.partialorder %v5026_v39, %v3262_v16  ;;  %v2938_v15 = vadd.s32 4294967295, %v3038_v55 }
 0x1aa   :  { %v3040_v45 = vcvt.f32.s32 %v194_v13  ;;  %v1944_v0 = vsel %vm1897_vm6, %v3394_v8, %v1805_v37  ;;  %v1991_v56 = vsel %vm1897_vm6, %v3400_v10, %v1852_v7  ;;  %vm2314_vm11 = vcmp.eq.s32.totalorder %v5185_v32, 13 }
 0x1ab   :  { %vm2453_vm14 = vcmp.eq.s32.totalorder %v5185_v32, 14  ;;  %v2083_v11 = vsel %vm2036_vm9, %v3409_v14, %v1944_v0  ;;  %v2130_v62 = vsel %vm2036_vm9, %v3415_v18, %v1991_v56  ;;  %vm354_vm12 = vcmp.gt.s32.totalorder %v2938_v15, 0 }
 0x1ac   :  { %v2939_v25 = vadd.s32 4294967295, %v3040_v45  ;;  %v2222_v22 = vsel %vm2175_vm8, %v3425_v26, %v2083_v11  ;;  %v2269_v29 = vsel %vm2175_vm8, %v3434_v36, %v2130_v62  ;;  %vm2729_vm15 = vcmp.lt.f32.partialorder %v5026_v39, %v3265_v17 }
 0x1ad   :  { %v355_v1 = vsel %vm354_vm12, %v2938_v15, 0  ;;  %v2361_v43 = vsel %vm2314_vm11, %v3441_v42, %v2222_v22  ;;  %v2408_v38 = vsel %vm2314_vm11, %v3448_v48, %v2269_v29  ;;  %v5259_v32 = vmul.f32 %v3239_v4, %v5241_v61 }
 0x1ae   :  { %vm444_vm13 = vcmp.lt.s32.totalorder %v355_v1, 14  ;;  %vm356_vm2 = vcmp.gt.s32.totalorder %v2939_v25, 0  ;;  %v2500_v59 = vsel %vm2453_vm14, %v3455_v52, %v2361_v43  ;;  %v2547_v33 = vsel %vm2453_vm14, %v3462_v58, %v2408_v38 }
 0x1af   :  { %v5255_v13 = vsel %vm444_vm13, %v355_v1, 14  ;;  %v2592_v53 = vmul.f32 %v2500_v59, %v5026_v39  ;;  %v357_v6 = vsel %vm356_vm2, %v2939_v25, 0 }
 0x1b0   :  { %vm508_vm1 = vcmp.eq.s32.totalorder %v5255_v13, 0  ;;  %vm647_vm5 = vcmp.eq.s32.totalorder %v5255_v13, 1  ;;  %vm786_vm0 = vcmp.eq.s32.totalorder %v5255_v13, 2  ;;  %vm925_vm4 = vcmp.eq.s32.totalorder %v5255_v13, 3 }
 0x1b1   :  { %v555_v2 = vsel %vm508_vm1, %v3255_v12, 0.0  ;;  %v602_v5 = vsel %vm508_vm1, %v3267_v19, 0.0  ;;  %v2637_v55 = vadd.f32 %v2592_v53, %v2547_v33  ;;  %vm1064_vm7 = vcmp.eq.s32.totalorder %v5255_v13, 4 }
 0x1b2   :  { %v694_v3 = vsel %vm647_vm5, %v3269_v20, %v555_v2  ;;  %v741_v46 = vsel %vm647_vm5, %v3276_v23, %v602_v5  ;;  %vm1203_vm3 = vcmp.eq.s32.totalorder %v5255_v13, 5  ;;  %vm1342_vm6 = vcmp.eq.s32.totalorder %v5255_v13, 6 }
 0x1b3   :  { %v833_v37 = vsel %vm786_vm0, %v3286_v27, %v694_v3  ;;  %v880_v7 = vsel %vm786_vm0, %v3289_v28, %v741_v46  ;;  %v2775_v15 = vsel %vm2729_vm15, %v3274_v21, %v2637_v55  ;;  %vm1481_vm9 = vcmp.eq.s32.totalorder %v5255_v13, 7 }
 0x1b4   :  { %v972_v45 = vsel %vm925_vm4, %v3295_v30, %v833_v37  ;;  %v1019_v0 = vsel %vm925_vm4, %v3297_v31, %v880_v7  ;;  %v2821_v56 = vsel %vm2683_vm10, %v3281_v24, %v2775_v15  ;;  %vm1620_vm8 = vcmp.eq.s32.totalorder %v5255_v13, 8 }
 0x1b5   :  { %v1111_v11 = vsel %vm1064_vm7, %v3306_v34, %v972_v45  ;;  %v1158_v62 = vsel %vm1064_vm7, %v3309_v35, %v1019_v0  ;;  %2866 = vst [vmem:[#allocation11 + $0xc8] sm:$0xff] %v2821_v56  ;;  %vm1759_vm11 = vcmp.eq.s32.totalorder %v5255_v13, 9  ;;  %vm1898_vm14 = vcmp.eq.s32.totalorder %v5255_v13, 10 }
 0x1b6   :  { %v1250_v25 = vsel %vm1203_vm3, %v3325_v40, %v1111_v11  ;;  %v1297_v22 = vsel %vm1203_vm3, %v3328_v41, %v1158_v62  ;;  %vm2037_vm10 = vcmp.eq.s32.totalorder %v5255_v13, 11  ;;  %vm2176_vm12 = vcmp.eq.s32.totalorder %v5255_v13, 12 }
 0x1b7   :  { %v1389_v29 = vsel %vm1342_vm6, %v3334_v44, %v1250_v25  ;;  %v1436_v39 = vsel %vm1342_vm6, %v3343_v47, %v1297_v22  ;;  %vm2315_vm15 = vcmp.eq.s32.totalorder %v5255_v13, 13  ;;  %vm446_vm13 = vcmp.lt.s32.totalorder %v357_v6, 14  ;;  %v5349_v22 = vld [vmem:[#allocation10 + $0xe8] sm:$0xff] }
 0x1b8   :  { %v1528_v1 = vsel %vm1481_vm9, %v3353_v50, %v1389_v29  ;;  %v1575_v43 = vsel %vm1481_vm9, %v3356_v51, %v1436_v39  ;;  %vm2454_vm2 = vcmp.eq.s32.totalorder %v5255_v13, 14  ;;  %vm2730_vm1 = vcmp.lt.f32.partialorder %v5171_v9, %v3265_v17 }
 0x1b9   :  { %v1667_v38 = vsel %vm1620_vm8, %v3365_v54, %v1528_v1  ;;  %v1714_v59 = vsel %vm1620_vm8, %v3373_v57, %v1575_v43  ;;  %v5305_v33 = vsel %vm446_vm13, %v357_v6, 14  ;;  %vm2684_vm5 = vcmp.gt.f32.partialorder %v5171_v9, %v3262_v16 }
 0x1ba   :  { %v1806_v53 = vsel %vm1759_vm11, %v3382_v60, %v1667_v38  ;;  %v1853_v2 = vsel %vm1759_vm11, %v3387_v63, %v1714_v59  ;;  %vm509_vm0 = vcmp.eq.s32.totalorder %v5305_v33, 0  ;;  %vm648_vm4 = vcmp.eq.s32.totalorder %v5305_v33, 1 }
 0x1bb   :  { %v1945_v5 = vsel %vm1898_vm14, %v3394_v8, %v1806_v53  ;;  %v1992_v6 = vsel %vm1898_vm14, %v3400_v10, %v1853_v2  ;;  %v556_v55 = vsel %vm509_vm0, %v3255_v12, 0.0  ;;  %v603_v3 = vsel %vm509_vm0, %v3267_v19, 0.0 }
 0x1bc   :  { %v2084_v46 = vsel %vm2037_vm10, %v3409_v14, %v1945_v5  ;;  %v2131_v37 = vsel %vm2037_vm10, %v3415_v18, %v1992_v6  ;;  %v695_v7 = vsel %vm648_vm4, %v3269_v20, %v556_v55  ;;  %v742_v15 = vsel %vm648_vm4, %v3276_v23, %v603_v3 }
 0x1bd   :  { %v2223_v45 = vsel %vm2176_vm12, %v3425_v26, %v2084_v46  ;;  %v2270_v0 = vsel %vm2176_vm12, %v3434_v36, %v2131_v37  ;;  %vm787_vm7 = vcmp.eq.s32.totalorder %v5305_v33, 2  ;;  %vm926_vm3 = vcmp.eq.s32.totalorder %v5305_v33, 3 }
 0x1be   :  { %v2362_v56 = vsel %vm2315_vm15, %v3441_v42, %v2223_v45  ;;  %v2409_v11 = vsel %vm2315_vm15, %v3448_v48, %v2270_v0  ;;  %v834_v62 = vsel %vm787_vm7, %v3286_v27, %v695_v7  ;;  %v881_v25 = vsel %vm787_vm7, %v3289_v28, %v742_v15 }
 0x1bf   :  { %v2501_v29 = vsel %vm2454_vm2, %v3455_v52, %v2362_v56  ;;  %v2548_v39 = vsel %vm2454_vm2, %v3462_v58, %v2409_v11  ;;  %v973_v1 = vsel %vm926_vm3, %v3295_v30, %v834_v62  ;;  %v1020_v43 = vsel %vm926_vm3, %v3297_v31, %v881_v25  ;;  %v5392_v62 = vld [vmem:[#allocation10 + $0xf0] sm:$0xff] }
 0x1c0   :  { %v2593_v38 = vmul.f32 %v2501_v29, %v5171_v9  ;;  %vm1065_vm6 = vcmp.eq.s32.totalorder %v5305_v33, 4  ;;  %vm1204_vm9 = vcmp.eq.s32.totalorder %v5305_v33, 5  ;;  %vm1343_vm8 = vcmp.eq.s32.totalorder %v5305_v33, 6 }
 0x1c1   :  { %v1112_v59 = vsel %vm1065_vm6, %v3306_v34, %v973_v1  ;;  %v1159_v53 = vsel %vm1065_vm6, %v3309_v35, %v1020_v43  ;;  %vm1482_vm11 = vcmp.eq.s32.totalorder %v5305_v33, 7  ;;  %v151_v13 = vmul.f32 %v3239_v4, %v5349_v22 }
 0x1c2   :  { %v2638_v2 = vadd.f32 %v2593_v38, %v2548_v39  ;;  %v1251_v5 = vsel %vm1204_vm9, %v3325_v40, %v1112_v59  ;;  %v1298_v6 = vsel %vm1204_vm9, %v3328_v41, %v1159_v53  ;;  %vm1621_vm14 = vcmp.eq.s32.totalorder %v5305_v33, 8  ;;  %v5397_v39 = vld [vmem:[#allocation10 + $0xf8] sm:$0xff] }
 0x1c3   :  { %v1390_v55 = vsel %vm1343_vm8, %v3334_v44, %v1251_v5  ;;  %v1437_v3 = vsel %vm1343_vm8, %v3343_v47, %v1298_v6  ;;  %vm1760_vm10 = vcmp.eq.s32.totalorder %v5305_v33, 9  ;;  %v195_v46 = vceil.f32 %v5259_v32 }
 0x1c4   :  { %v2776_v37 = vsel %vm2730_vm1, %v3274_v21, %v2638_v2  ;;  %v1529_v7 = vsel %vm1482_vm11, %v3353_v50, %v1390_v55  ;;  %v1576_v15 = vsel %vm1482_vm11, %v3356_v51, %v1437_v3  ;;  %vm1899_vm12 = vcmp.eq.s32.totalorder %v5305_v33, 10 }
 0x1c5   :  { %v2822_v45 = vsel %vm2684_vm5, %v3281_v24, %v2776_v37  ;;  %v1668_v0 = vsel %vm1621_vm14, %v3365_v54, %v1529_v7  ;;  %v1715_v32 = vsel %vm1621_vm14, %v3373_v57, %v1576_v15  ;;  %vm2038_vm15 = vcmp.eq.s32.totalorder %v5305_v33, 11 }
 0x1c6   :  { %2867 = vst [vmem:[#allocation11 + $0xd0] sm:$0xff] %v2822_v45  ;;  %v1807_v56 = vsel %vm1760_vm10, %v3382_v60, %v1668_v0  ;;  %v1854_v11 = vsel %vm1760_vm10, %v3387_v63, %v1715_v32  ;;  %vm2177_vm13 = vcmp.eq.s32.totalorder %v5305_v33, 12  ;;  %vm2316_vm2 = vcmp.eq.s32.totalorder %v5305_v33, 13 }
 0x1c7   :  { %v1946_v25 = vsel %vm1899_vm12, %v3394_v8, %v1807_v56  ;;  %v1993_v9 = vsel %vm1899_vm12, %v3400_v10, %v1854_v11  ;;  %v3042_v29 = vcvt.f32.s32 %v195_v46  ;;  %vm2455_vm1 = vcmp.eq.s32.totalorder %v5305_v33, 14 }
 0x1c8   :  { %v2085_v1 = vsel %vm2038_vm15, %v3409_v14, %v1946_v25  ;;  %v2132_v43 = vsel %vm2038_vm15, %v3415_v18, %v1993_v9  ;;  %v196_v38 = vceil.f32 %v151_v13  ;;  %v152_v5 = vmul.f32 %v3239_v4, %v5392_v62 }
 0x1c9   :  { %v2224_v59 = vsel %vm2177_vm13, %v3425_v26, %v2085_v1  ;;  %v2271_v53 = vsel %vm2177_vm13, %v3434_v36, %v2132_v43  ;;  %v2940_v2 = vadd.s32 4294967295, %v3042_v29  ;;  %v153_v46 = vmul.f32 %v3239_v4, %v5397_v39 }
 0x1ca   :  { %v2363_v6 = vsel %vm2316_vm2, %v3441_v42, %v2224_v59  ;;  %v2410_v55 = vsel %vm2316_vm2, %v3448_v48, %v2271_v53  ;;  %v3044_v3 = vcvt.f32.s32 %v196_v38  ;;  %v197_v13 = vceil.f32 %v152_v5 }
 0x1cb   :  { %v2502_v37 = vsel %vm2455_vm1, %v3455_v52, %v2363_v6  ;;  %v2549_v33 = vsel %vm2455_vm1, %v3462_v58, %v2410_v55  ;;  %vm358_vm5 = vcmp.gt.s32.totalorder %v2940_v2, 0  ;;  %vm2685_vm0 = vcmp.gt.f32.partialorder %v5181_v49, %v3262_v16 }
 0x1cc   :  { %v2594_v7 = vmul.f32 %v2502_v37, %v5181_v49  ;;  %v359_v15 = vsel %vm358_vm5, %v2940_v2, 0  ;;  %v2941_v45 = vadd.s32 4294967295, %v3044_v3  ;;  %vm2731_vm4 = vcmp.lt.f32.partialorder %v5181_v49, %v3265_v17 }
 0x1cd   :  { %vm448_vm7 = vcmp.lt.s32.totalorder %v359_v15, 14  ;;  %v5419_v56 = vcvt.f32.s32 %v197_v13  ;;  %v198_v11 = vceil.f32 %v153_v46 }
 0x1ce   :  { %v2639_v0 = vadd.f32 %v2594_v7, %v2549_v33  ;;  %v5417_v32 = vsel %vm448_vm7, %v359_v15, 14  ;;  %vm360_vm8 = vcmp.gt.s32.totalorder %v2941_v45, 0 }
 0x1cf   :  { %vm510_vm3 = vcmp.eq.s32.totalorder %v5417_v32, 0  ;;  %vm649_vm6 = vcmp.eq.s32.totalorder %v5417_v32, 1  ;;  %vm788_vm9 = vcmp.eq.s32.totalorder %v5417_v32, 2  ;;  %vm927_vm11 = vcmp.eq.s32.totalorder %v5417_v32, 3 }
 0x1d0   :  { %v2777_v25 = vsel %vm2731_vm4, %v3274_v21, %v2639_v0  ;;  %v557_v9 = vsel %vm510_vm3, %v3255_v12, 0.0  ;;  %v604_v49 = vsel %vm510_vm3, %v3267_v19, 0.0  ;;  %vm1066_vm14 = vcmp.eq.s32.totalorder %v5417_v32, 4 }
 0x1d1   :  { %v2823_v29 = vsel %vm2685_vm0, %v3281_v24, %v2777_v25  ;;  %v696_v1 = vsel %vm649_vm6, %v3269_v20, %v557_v9  ;;  %v743_v43 = vsel %vm649_vm6, %v3276_v23, %v604_v49  ;;  %vm1205_vm10 = vcmp.eq.s32.totalorder %v5417_v32, 5 }
 0x1d2   :  { %2868 = vst [vmem:[#allocation11 + $0xd8] sm:$0xff] %v2823_v29  ;;  %v835_v38 = vsel %vm788_vm9, %v3286_v27, %v696_v1  ;;  %v882_v59 = vsel %vm788_vm9, %v3289_v28, %v743_v43  ;;  %v5435_v53 = vcvt.f32.s32 %v198_v11  ;;  %vm1344_vm12 = vcmp.eq.s32.totalorder %v5417_v32, 6 }
 0x1d3   :  { %v974_v2 = vsel %vm927_vm11, %v3295_v30, %v835_v38  ;;  %v1021_v5 = vsel %vm927_vm11, %v3297_v31, %v882_v59  ;;  %vm1483_vm15 = vcmp.eq.s32.totalorder %v5417_v32, 7  ;;  %vm1622_vm13 = vcmp.eq.s32.totalorder %v5417_v32, 8 }
 0x1d4   :  { %v1113_v6 = vsel %vm1066_vm14, %v3306_v34, %v974_v2  ;;  %v1160_v55 = vsel %vm1066_vm14, %v3309_v35, %v1021_v5  ;;  %vm1761_vm2 = vcmp.eq.s32.totalorder %v5417_v32, 9  ;;  %vm1900_vm1 = vcmp.eq.s32.totalorder %v5417_v32, 10 }
 0x1d5   :  { %v1252_v3 = vsel %vm1205_vm10, %v3325_v40, %v1113_v6  ;;  %v1299_v46 = vsel %vm1205_vm10, %v3328_v41, %v1160_v55  ;;  %vm2039_vm5 = vcmp.eq.s32.totalorder %v5417_v32, 11  ;;  %vm2178_vm0 = vcmp.eq.s32.totalorder %v5417_v32, 12 }
 0x1d6   :  { %v1391_v37 = vsel %vm1344_vm12, %v3334_v44, %v1252_v3  ;;  %v1438_v33 = vsel %vm1344_vm12, %v3343_v47, %v1299_v46  ;;  %v361_v13 = vsel %vm360_vm8, %v2941_v45, 0  ;;  %vm2317_vm4 = vcmp.eq.s32.totalorder %v5417_v32, 13 }
 0x1d7   :  { %v1530_v7 = vsel %vm1483_vm15, %v3353_v50, %v1391_v37  ;;  %v1577_v15 = vsel %vm1483_vm15, %v3356_v51, %v1438_v33  ;;  %vm450_vm7 = vcmp.lt.s32.totalorder %v361_v13, 14  ;;  %vm2456_vm3 = vcmp.eq.s32.totalorder %v5417_v32, 14 }
 0x1d8   :  { %v1669_v0 = vsel %vm1622_vm13, %v3365_v54, %v1530_v7  ;;  %v1716_v11 = vsel %vm1622_vm13, %v3373_v57, %v1577_v15  ;;  %vm2732_vm6 = vcmp.lt.f32.partialorder %v5241_v61, %v3265_v17  ;;  %v5461_v25 = vsel %vm450_vm7, %v361_v13, 14 }
 0x1d9   :  { %v1808_v45 = vsel %vm1761_vm2, %v3382_v60, %v1669_v0  ;;  %v1855_v9 = vsel %vm1761_vm2, %v3387_v63, %v1716_v11  ;;  %vm2686_vm9 = vcmp.gt.f32.partialorder %v5241_v61, %v3262_v16  ;;  %vm511_vm8 = vcmp.eq.s32.totalorder %v5461_v25, 0 }
 0x1da   :  { %vm650_vm11 = vcmp.eq.s32.totalorder %v5461_v25, 1  ;;  %v1947_v49 = vsel %vm1900_vm1, %v3394_v8, %v1808_v45  ;;  %v1994_v29 = vsel %vm1900_vm1, %v3400_v10, %v1855_v9  ;;  %v558_v1 = vsel %vm511_vm8, %v3255_v12, 0.0 }
 0x1db   :  { %v605_v43 = vsel %vm511_vm8, %v3267_v19, 0.0  ;;  %v2086_v38 = vsel %vm2039_vm5, %v3409_v14, %v1947_v49  ;;  %v2133_v59 = vsel %vm2039_vm5, %v3415_v18, %v1994_v29  ;;  %v697_v2 = vsel %vm650_vm11, %v3269_v20, %v558_v1 }
 0x1dc   :  { %v744_v5 = vsel %vm650_vm11, %v3276_v23, %v605_v43  ;;  %v2225_v6 = vsel %vm2178_vm0, %v3425_v26, %v2086_v38  ;;  %v2272_v55 = vsel %vm2178_vm0, %v3434_v36, %v2133_v59  ;;  %vm789_vm14 = vcmp.eq.s32.totalorder %v5461_v25, 2 }
 0x1dd   :  { %vm928_vm10 = vcmp.eq.s32.totalorder %v5461_v25, 3  ;;  %v2364_v3 = vsel %vm2317_vm4, %v3441_v42, %v2225_v6  ;;  %v2411_v46 = vsel %vm2317_vm4, %v3448_v48, %v2272_v55  ;;  %v836_v37 = vsel %vm789_vm14, %v3286_v27, %v697_v2 }
 0x1de   :  { %v883_v33 = vsel %vm789_vm14, %v3289_v28, %v744_v5  ;;  %v2503_v13 = vsel %vm2456_vm3, %v3455_v52, %v2364_v3  ;;  %v2550_v7 = vsel %vm2456_vm3, %v3462_v58, %v2411_v46  ;;  %v975_v15 = vsel %vm928_vm10, %v3295_v30, %v836_v37 }
 0x1df   :  { %v1022_v0 = vsel %vm928_vm10, %v3297_v31, %v883_v33  ;;  %v2595_v11 = vmul.f32 %v2503_v13, %v5241_v61  ;;  %vm1067_vm12 = vcmp.eq.s32.totalorder %v5461_v25, 4  ;;  %vm1206_vm15 = vcmp.eq.s32.totalorder %v5461_v25, 5 }
 0x1e0   :  { %vm1345_vm13 = vcmp.eq.s32.totalorder %v5461_v25, 6  ;;  %v1114_v45 = vsel %vm1067_vm12, %v3306_v34, %v975_v15  ;;  %v1161_v9 = vsel %vm1067_vm12, %v3309_v35, %v1022_v0  ;;  %vm1484_vm2 = vcmp.eq.s32.totalorder %v5461_v25, 7 }
 0x1e1   :  { %v2942_v32 = vadd.s32 4294967295, %v5419_v56  ;;  %v2640_v49 = vadd.f32 %v2595_v11, %v2550_v7  ;;  %v1253_v29 = vsel %vm1206_vm15, %v3325_v40, %v1114_v45  ;;  %v1300_v1 = vsel %vm1206_vm15, %v3328_v41, %v1161_v9 }
 0x1e2   :  { %vm1623_vm1 = vcmp.eq.s32.totalorder %v5461_v25, 8  ;;  %v1392_v43 = vsel %vm1345_vm13, %v3334_v44, %v1253_v29  ;;  %v1439_v38 = vsel %vm1345_vm13, %v3343_v47, %v1300_v1  ;;  %vm1762_vm5 = vcmp.eq.s32.totalorder %v5461_v25, 9 }
 0x1e3   :  { %v5528_v59 = vadd.s32 4294967295, %v5435_v53  ;;  %v2778_v56 = vsel %vm2732_vm6, %v3274_v21, %v2640_v49  ;;  %v1531_v2 = vsel %vm1484_vm2, %v3353_v50, %v1392_v43  ;;  %v1578_v5 = vsel %vm1484_vm2, %v3356_v51, %v1439_v38 }
 0x1e4   :  { %vm1901_vm0 = vcmp.eq.s32.totalorder %v5461_v25, 10  ;;  %v2824_v6 = vsel %vm2686_vm9, %v3281_v24, %v2778_v56  ;;  %v1670_v55 = vsel %vm1623_vm1, %v3365_v54, %v1531_v2  ;;  %v1717_v53 = vsel %vm1623_vm1, %v3373_v57, %v1578_v5 }
 0x1e5   :  { %vm2040_vm4 = vcmp.eq.s32.totalorder %v5461_v25, 11  ;;  %vm2733_vm7 = vcmp.lt.f32.partialorder %v5349_v22, %v3265_v17  ;;  %2869 = vst [vmem:[#allocation11 + $0xe0] sm:$0xff] %v2824_v6  ;;  %v1809_v3 = vsel %vm1762_vm5, %v3382_v60, %v1670_v55  ;;  %v1856_v46 = vsel %vm1762_vm5, %v3387_v63, %v1717_v53 }
 0x1e6   :  { %vm2179_vm3 = vcmp.eq.s32.totalorder %v5461_v25, 12  ;;  %vm2687_vm6 = vcmp.gt.f32.partialorder %v5349_v22, %v3262_v16  ;;  %vm362_vm9 = vcmp.gt.s32.totalorder %v2942_v32, 0  ;;  %v1948_v61 = vsel %vm1901_vm0, %v3394_v8, %v1809_v3 }
 0x1e7   :  { %v1995_v37 = vsel %vm1901_vm0, %v3400_v10, %v1856_v46  ;;  %vm2318_vm8 = vcmp.eq.s32.totalorder %v5461_v25, 13  ;;  %v363_v33 = vsel %vm362_vm9, %v2942_v32, 0  ;;  %v2087_v13 = vsel %vm2040_vm4, %v3409_v14, %v1948_v61 }
 0x1e8   :  { %v2134_v7 = vsel %vm2040_vm4, %v3415_v18, %v1995_v37  ;;  %vm2457_vm11 = vcmp.eq.s32.totalorder %v5461_v25, 14  ;;  %vm452_vm14 = vcmp.lt.s32.totalorder %v363_v33, 14  ;;  %v2226_v15 = vsel %vm2179_vm3, %v3425_v26, %v2087_v13 }
 0x1e9   :  { %v2273_v0 = vsel %vm2179_vm3, %v3434_v36, %v2134_v7  ;;  %v5559_v11 = vsel %vm452_vm14, %v363_v33, 14  ;;  %vm364_vm10 = vcmp.gt.s32.totalorder %v5528_v59, 0  ;;  %v2365_v45 = vsel %vm2318_vm8, %v3441_v42, %v2226_v15 }
 0x1ea   :  { %v2412_v9 = vsel %vm2318_vm8, %v3448_v48, %v2273_v0  ;;  %vm512_vm12 = vcmp.eq.s32.totalorder %v5559_v11, 0  ;;  %vm651_vm15 = vcmp.eq.s32.totalorder %v5559_v11, 1  ;;  %v2504_v32 = vsel %vm2457_vm11, %v3455_v52, %v2365_v45 }
 0x1eb   :  { %v2551_v25 = vsel %vm2457_vm11, %v3462_v58, %v2412_v9  ;;  %v559_v49 = vsel %vm512_vm12, %v3255_v12, 0.0  ;;  %v606_v29 = vsel %vm512_vm12, %v3267_v19, 0.0  ;;  %v2596_v1 = vmul.f32 %v2504_v32, %v5349_v22 }
 0x1ec   :  { %v698_v43 = vsel %vm651_vm15, %v3269_v20, %v559_v49  ;;  %v745_v38 = vsel %vm651_vm15, %v3276_v23, %v606_v29  ;;  %vm790_vm13 = vcmp.eq.s32.totalorder %v5559_v11, 2  ;;  %vm929_vm2 = vcmp.eq.s32.totalorder %v5559_v11, 3 }
 0x1ed   :  { %v837_v56 = vsel %vm790_vm13, %v3286_v27, %v698_v43  ;;  %v884_v2 = vsel %vm790_vm13, %v3289_v28, %v745_v38  ;;  %vm1068_vm1 = vcmp.eq.s32.totalorder %v5559_v11, 4  ;;  %v2641_v5 = vadd.f32 %v2596_v1, %v2551_v25 }
 0x1ee   :  { %v976_v6 = vsel %vm929_vm2, %v3295_v30, %v837_v56  ;;  %v1023_v55 = vsel %vm929_vm2, %v3297_v31, %v884_v2  ;;  %vm1207_vm5 = vcmp.eq.s32.totalorder %v5559_v11, 5  ;;  %vm1346_vm0 = vcmp.eq.s32.totalorder %v5559_v11, 6 }
 0x1ef   :  { %v1115_v53 = vsel %vm1068_vm1, %v3306_v34, %v976_v6  ;;  %v1162_v3 = vsel %vm1068_vm1, %v3309_v35, %v1023_v55  ;;  %vm1485_vm4 = vcmp.eq.s32.totalorder %v5559_v11, 7  ;;  %v2779_v46 = vsel %vm2733_vm7, %v3274_v21, %v2641_v5 }
 0x1f0   :  { %v1254_v61 = vsel %vm1207_vm5, %v3325_v40, %v1115_v53  ;;  %v1301_v37 = vsel %vm1207_vm5, %v3328_v41, %v1162_v3  ;;  %vm1624_vm3 = vcmp.eq.s32.totalorder %v5559_v11, 8  ;;  %v2825_v33 = vsel %vm2687_vm6, %v3281_v24, %v2779_v46 }
 0x1f1   :  { %v1393_v13 = vsel %vm1346_vm0, %v3334_v44, %v1254_v61  ;;  %v1440_v7 = vsel %vm1346_vm0, %v3343_v47, %v1301_v37  ;;  %vm1763_vm9 = vcmp.eq.s32.totalorder %v5559_v11, 9  ;;  %2870 = vst [vmem:[#allocation11 + $0xe8] sm:$0xff] %v2825_v33  ;;  %vm1902_vm7 = vcmp.eq.s32.totalorder %v5559_v11, 10 }
 0x1f2   :  { %v1532_v15 = vsel %vm1485_vm4, %v3353_v50, %v1393_v13  ;;  %v1579_v0 = vsel %vm1485_vm4, %v3356_v51, %v1440_v7  ;;  %vm2041_vm8 = vcmp.eq.s32.totalorder %v5559_v11, 11  ;;  %vm2180_vm6 = vcmp.eq.s32.totalorder %v5559_v11, 12 }
 0x1f3   :  { %v1671_v45 = vsel %vm1624_vm3, %v3365_v54, %v1532_v15  ;;  %v1718_v9 = vsel %vm1624_vm3, %v3373_v57, %v1579_v0  ;;  %vm2688_vm11 = vcmp.gt.f32.partialorder %v5392_v62, %v3262_v16  ;;  %v365_v25 = vsel %vm364_vm10, %v5528_v59, 0 }
 0x1f4   :  { %v1810_v22 = vsel %vm1763_vm9, %v3382_v60, %v1671_v45  ;;  %v1857_v32 = vsel %vm1763_vm9, %v3387_v63, %v1718_v9  ;;  %vm2319_vm14 = vcmp.eq.s32.totalorder %v5559_v11, 13  ;;  %vm454_vm12 = vcmp.lt.s32.totalorder %v365_v25, 14 }
 0x1f5   :  { %v1949_v49 = vsel %vm1902_vm7, %v3394_v8, %v1810_v22  ;;  %v1996_v29 = vsel %vm1902_vm7, %v3400_v10, %v1857_v32  ;;  %vm2458_vm15 = vcmp.eq.s32.totalorder %v5559_v11, 14  ;;  %v5619_v38 = vsel %vm454_vm12, %v365_v25, 14  ;;  %v5652_v25 = vld [vmem:[#allocation10 + $0x100] sm:$0xff] }
 0x1f6   :  { %v2088_v1 = vsel %vm2041_vm8, %v3409_v14, %v1949_v49  ;;  %v2135_v43 = vsel %vm2041_vm8, %v3415_v18, %v1996_v29  ;;  %vm513_vm10 = vcmp.eq.s32.totalorder %v5619_v38, 0  ;;  %vm652_vm13 = vcmp.eq.s32.totalorder %v5619_v38, 1 }
 0x1f7   :  { %v2227_v56 = vsel %vm2180_vm6, %v3425_v26, %v2088_v1  ;;  %v2274_v2 = vsel %vm2180_vm6, %v3434_v36, %v2135_v43  ;;  %v560_v6 = vsel %vm513_vm10, %v3255_v12, 0.0  ;;  %v607_v55 = vsel %vm513_vm10, %v3267_v19, 0.0 }
 0x1f8   :  { %v2366_v59 = vsel %vm2319_vm14, %v3441_v42, %v2227_v56  ;;  %v2413_v5 = vsel %vm2319_vm14, %v3448_v48, %v2274_v2  ;;  %v699_v3 = vsel %vm652_vm13, %v3269_v20, %v560_v6  ;;  %v746_v46 = vsel %vm652_vm13, %v3276_v23, %v607_v55  ;;  %v5665_v2 = vld [vmem:[#allocation10 + $0x108] sm:$0xff]  ;;  %v5672_v6 = vld [vmem:[#allocation10 + $0x110] sm:$0xff]  ;;  %v5674_v55 = vld [vmem:[#allocation10 + $0x118] sm:$0xff] }
 0x1f9   :  { %v2505_v11 = vsel %vm2458_vm15, %v3455_v52, %v2366_v59  ;;  %v2552_v53 = vsel %vm2458_vm15, %v3462_v58, %v2413_v5  ;;  %vm791_vm2 = vcmp.eq.s32.totalorder %v5619_v38, 2  ;;  %vm930_vm1 = vcmp.eq.s32.totalorder %v5619_v38, 3 }
 0x1fa   :  { %v2597_v61 = vmul.f32 %v2505_v11, %v5392_v62  ;;  %vm1069_vm5 = vcmp.eq.s32.totalorder %v5619_v38, 4  ;;  %vm2734_vm0 = vcmp.lt.f32.partialorder %v5392_v62, %v3265_v17  ;;  %v838_v37 = vsel %vm791_vm2, %v3286_v27, %v699_v3 }
 0x1fb   :  { %v885_v33 = vsel %vm791_vm2, %v3289_v28, %v746_v46  ;;  %vm1208_vm4 = vcmp.eq.s32.totalorder %v5619_v38, 5  ;;  %v977_v7 = vsel %vm930_vm1, %v3295_v30, %v838_v37  ;;  %vm1347_vm3 = vcmp.eq.s32.totalorder %v5619_v38, 6 }
 0x1fc   :  { %v2642_v13 = vadd.f32 %v2597_v61, %v2552_v53  ;;  %v1024_v15 = vsel %vm930_vm1, %v3297_v31, %v885_v33  ;;  %v1116_v0 = vsel %vm1069_vm5, %v3306_v34, %v977_v7  ;;  %vm1486_vm9 = vcmp.eq.s32.totalorder %v5619_v38, 7 }
 0x1fd   :  { %v1163_v45 = vsel %vm1069_vm5, %v3309_v35, %v1024_v15  ;;  %v1255_v22 = vsel %vm1208_vm4, %v3325_v40, %v1116_v0  ;;  %vm1625_vm7 = vcmp.eq.s32.totalorder %v5619_v38, 8  ;;  %vm1764_vm8 = vcmp.eq.s32.totalorder %v5619_v38, 9 }
 0x1fe   :  { %v2780_v9 = vsel %vm2734_vm0, %v3274_v21, %v2642_v13  ;;  %v1302_v32 = vsel %vm1208_vm4, %v3328_v41, %v1163_v45  ;;  %v1394_v29 = vsel %vm1347_vm3, %v3334_v44, %v1255_v22  ;;  %vm1903_vm6 = vcmp.eq.s32.totalorder %v5619_v38, 10 }
 0x1ff   :  { %v2826_v49 = vsel %vm2688_vm11, %v3281_v24, %v2780_v9  ;;  %v1441_v1 = vsel %vm1347_vm3, %v3343_v47, %v1302_v32  ;;  %v1533_v43 = vsel %vm1486_vm9, %v3353_v50, %v1394_v29  ;;  %vm2042_vm14 = vcmp.eq.s32.totalorder %v5619_v38, 11 }
 0x200   :  { %2871 = vst [vmem:[#allocation11 + $0xf0] sm:$0xff] %v2826_v49  ;;  %v1580_v56 = vsel %vm1486_vm9, %v3356_v51, %v1441_v1  ;;  %v1672_v62 = vsel %vm1625_vm7, %v3365_v54, %v1533_v43  ;;  %vm2181_vm11 = vcmp.eq.s32.totalorder %v5619_v38, 12  ;;  %v154_v5 = vmul.f32 %v3239_v4, %v5652_v25 }
 0x201   :  { %v1719_v59 = vsel %vm1625_vm7, %v3373_v57, %v1580_v56  ;;  %v1811_v11 = vsel %vm1764_vm8, %v3382_v60, %v1672_v62  ;;  %vm2320_vm12 = vcmp.eq.s32.totalorder %v5619_v38, 13  ;;  %vm2459_vm15 = vcmp.eq.s32.totalorder %v5619_v38, 14 }
 0x202   :  { %v1858_v53 = vsel %vm1764_vm8, %v3387_v63, %v1719_v59  ;;  %v1950_v3 = vsel %vm1903_vm6, %v3394_v8, %v1811_v11  ;;  %v199_v61 = vceil.f32 %v154_v5  ;;  %v155_v37 = vmul.f32 %v3239_v4, %v5665_v2 }
 0x203   :  { %v1997_v46 = vsel %vm1903_vm6, %v3400_v10, %v1858_v53  ;;  %v2089_v33 = vsel %vm2042_vm14, %v3409_v14, %v1950_v3  ;;  %v156_v7 = vmul.f32 %v3239_v4, %v5672_v6  ;;  %v157_v15 = vmul.f32 %v3239_v4, %v5674_v55  ;;  %v5711_v3 = vld [vmem:[#allocation10 + $0x120] sm:$0xff] }
 0x204   :  { %v2136_v13 = vsel %vm2042_vm14, %v3415_v18, %v1997_v46  ;;  %v2228_v0 = vsel %vm2181_vm11, %v3425_v26, %v2089_v33  ;;  %v3050_v9 = vcvt.f32.s32 %v199_v61  ;;  %v200_v22 = vceil.f32 %v155_v37 }
 0x205   :  { %v2275_v45 = vsel %vm2181_vm11, %v3434_v36, %v2136_v13  ;;  %v2367_v32 = vsel %vm2320_vm12, %v3441_v42, %v2228_v0  ;;  %v201_v29 = vceil.f32 %v156_v7  ;;  %v202_v1 = vceil.f32 %v157_v15 }
 0x206   :  { %v2414_v49 = vsel %vm2320_vm12, %v3448_v48, %v2275_v45  ;;  %v2506_v43 = vsel %vm2459_vm15, %v3455_v52, %v2367_v32  ;;  %v2944_v62 = vadd.s32 4294967295, %v3050_v9  ;;  %v3052_v59 = vcvt.f32.s32 %v200_v22 }
 0x207   :  { %v2553_v56 = vsel %vm2459_vm15, %v3462_v58, %v2414_v49  ;;  %v2598_v5 = vmul.f32 %v2506_v43, %v5397_v39  ;;  %v3054_v11 = vcvt.f32.s32 %v201_v29  ;;  %vm2735_vm10 = vcmp.lt.f32.partialorder %v5397_v39, %v3265_v17 }
 0x208   :  { %vm366_vm13 = vcmp.gt.s32.totalorder %v2944_v62, 0  ;;  %v2945_v53 = vadd.s32 4294967295, %v3052_v59  ;;  %vm2689_vm2 = vcmp.gt.f32.partialorder %v5397_v39, %v3262_v16  ;;  %v5715_v38 = vcvt.f32.s32 %v202_v1 }
 0x209   :  { %v2643_v46 = vadd.f32 %v2598_v5, %v2553_v56  ;;  %v367_v61 = vsel %vm366_vm13, %v2944_v62, 0  ;;  %v5720_v13 = vadd.s32 4294967295, %v3054_v11  ;;  %v5724_v7 = vmul.f32 %v3239_v4, %v5711_v3 }
 0x20a   :  { %vm456_vm1 = vcmp.lt.s32.totalorder %v367_v61, 14  ;;  %vm368_vm5 = vcmp.gt.s32.totalorder %v2945_v53, 0 }
 0x20b   :  { %v2781_v37 = vsel %vm2735_vm10, %v3274_v21, %v2643_v46  ;;  %v5718_v33 = vsel %vm456_vm1, %v367_v61, 14  ;;  %v369_v45 = vsel %vm368_vm5, %v2945_v53, 0 }
 0x20c   :  { %v2827_v15 = vsel %vm2689_vm2, %v3281_v24, %v2781_v37  ;;  %vm514_vm0 = vcmp.eq.s32.totalorder %v5718_v33, 0  ;;  %vm653_vm4 = vcmp.eq.s32.totalorder %v5718_v33, 1  ;;  %vm792_vm3 = vcmp.eq.s32.totalorder %v5718_v33, 2 }
 0x20d   :  { %2872 = vst [vmem:[#allocation11 + $0xf8] sm:$0xff] %v2827_v15  ;;  %v561_v39 = vsel %vm514_vm0, %v3255_v12, 0.0  ;;  %v608_v0 = vsel %vm514_vm0, %v3267_v19, 0.0  ;;  %vm931_vm9 = vcmp.eq.s32.totalorder %v5718_v33, 3  ;;  %vm1070_vm7 = vcmp.eq.s32.totalorder %v5718_v33, 4 }
 0x20e   :  { %v700_v9 = vsel %vm653_vm4, %v3269_v20, %v561_v39  ;;  %v747_v22 = vsel %vm653_vm4, %v3276_v23, %v608_v0  ;;  %vm1209_vm8 = vcmp.eq.s32.totalorder %v5718_v33, 5  ;;  %vm1348_vm6 = vcmp.eq.s32.totalorder %v5718_v33, 6 }
 0x20f   :  { %v839_v32 = vsel %vm792_vm3, %v3286_v27, %v700_v9  ;;  %v886_v49 = vsel %vm792_vm3, %v3289_v28, %v747_v22  ;;  %vm1487_vm14 = vcmp.eq.s32.totalorder %v5718_v33, 7  ;;  %vm1626_vm11 = vcmp.eq.s32.totalorder %v5718_v33, 8 }
 0x210   :  { %v978_v29 = vsel %vm931_vm9, %v3295_v30, %v839_v32  ;;  %v1025_v1 = vsel %vm931_vm9, %v3297_v31, %v886_v49  ;;  %vm1765_vm12 = vcmp.eq.s32.totalorder %v5718_v33, 9  ;;  %vm1904_vm15 = vcmp.eq.s32.totalorder %v5718_v33, 10 }
 0x211   :  { %v1117_v43 = vsel %vm1070_vm7, %v3306_v34, %v978_v29  ;;  %v1164_v56 = vsel %vm1070_vm7, %v3309_v35, %v1025_v1  ;;  %vm2043_vm10 = vcmp.eq.s32.totalorder %v5718_v33, 11  ;;  %vm2182_vm13 = vcmp.eq.s32.totalorder %v5718_v33, 12 }
 0x212   :  { %v1256_v62 = vsel %vm1209_vm8, %v3325_v40, %v1117_v43  ;;  %v1303_v59 = vsel %vm1209_vm8, %v3328_v41, %v1164_v56  ;;  %vm2321_vm2 = vcmp.eq.s32.totalorder %v5718_v33, 13  ;;  %vm2460_vm1 = vcmp.eq.s32.totalorder %v5718_v33, 14 }
 0x213   :  { %v1395_v5 = vsel %vm1348_vm6, %v3334_v44, %v1256_v62  ;;  %v1442_v11 = vsel %vm1348_vm6, %v3343_v47, %v1303_v59  ;;  %vm458_vm5 = vcmp.lt.s32.totalorder %v369_v45, 14  ;;  %vm370_vm0 = vcmp.gt.s32.totalorder %v5720_v13, 0 }
 0x214   :  { %v1534_v53 = vsel %vm1487_vm14, %v3353_v50, %v1395_v5  ;;  %v1581_v46 = vsel %vm1487_vm14, %v3356_v51, %v1442_v11  ;;  %v5762_v61 = vsel %vm458_vm5, %v369_v45, 14  ;;  %vm2736_vm4 = vcmp.lt.f32.partialorder %v5652_v25, %v3265_v17 }
 0x215   :  { %v1673_v37 = vsel %vm1626_vm11, %v3365_v54, %v1534_v53  ;;  %v1720_v15 = vsel %vm1626_vm11, %v3373_v57, %v1581_v46  ;;  %vm515_vm3 = vcmp.eq.s32.totalorder %v5762_v61, 0  ;;  %vm654_vm9 = vcmp.eq.s32.totalorder %v5762_v61, 1 }
 0x216   :  { %v1812_v39 = vsel %vm1765_vm12, %v3382_v60, %v1673_v37  ;;  %v1859_v0 = vsel %vm1765_vm12, %v3387_v63, %v1720_v15  ;;  %vm2690_vm7 = vcmp.gt.f32.partialorder %v5652_v25, %v3262_v16  ;;  %v562_v45 = vsel %vm515_vm3, %v3255_v12, 0.0 }
 0x217   :  { %v609_v9 = vsel %vm515_vm3, %v3267_v19, 0.0  ;;  %v1951_v22 = vsel %vm1904_vm15, %v3394_v8, %v1812_v39  ;;  %v1998_v32 = vsel %vm1904_vm15, %v3400_v10, %v1859_v0  ;;  %v701_v49 = vsel %vm654_vm9, %v3269_v20, %v562_v45 }
 0x218   :  { %v748_v29 = vsel %vm654_vm9, %v3276_v23, %v609_v9  ;;  %v2090_v1 = vsel %vm2043_vm10, %v3409_v14, %v1951_v22  ;;  %v2137_v43 = vsel %vm2043_vm10, %v3415_v18, %v1998_v32  ;;  %vm793_vm8 = vcmp.eq.s32.totalorder %v5762_v61, 2 }
 0x219   :  { %vm932_vm6 = vcmp.eq.s32.totalorder %v5762_v61, 3  ;;  %v2229_v56 = vsel %vm2182_vm13, %v3425_v26, %v2090_v1  ;;  %v2276_v62 = vsel %vm2182_vm13, %v3434_v36, %v2137_v43  ;;  %v840_v59 = vsel %vm793_vm8, %v3286_v27, %v701_v49 }
 0x21a   :  { %v887_v5 = vsel %vm793_vm8, %v3289_v28, %v748_v29  ;;  %v2368_v11 = vsel %vm2321_vm2, %v3441_v42, %v2229_v56  ;;  %v2415_v53 = vsel %vm2321_vm2, %v3448_v48, %v2276_v62  ;;  %v979_v46 = vsel %vm932_vm6, %v3295_v30, %v840_v59 }
 0x21b   :  { %v1026_v37 = vsel %vm932_vm6, %v3297_v31, %v887_v5  ;;  %v2507_v15 = vsel %vm2460_vm1, %v3455_v52, %v2368_v11  ;;  %v2554_v39 = vsel %vm2460_vm1, %v3462_v58, %v2415_v53  ;;  %vm1071_vm14 = vcmp.eq.s32.totalorder %v5762_v61, 4 }
 0x21c   :  { %vm1210_vm11 = vcmp.eq.s32.totalorder %v5762_v61, 5  ;;  %v2599_v0 = vmul.f32 %v2507_v15, %v5652_v25  ;;  %v1118_v45 = vsel %vm1071_vm14, %v3306_v34, %v979_v46  ;;  %v1165_v9 = vsel %vm1071_vm14, %v3309_v35, %v1026_v37 }
 0x21d   :  { %vm1349_vm12 = vcmp.eq.s32.totalorder %v5762_v61, 6  ;;  %v1257_v22 = vsel %vm1210_vm11, %v3325_v40, %v1118_v45  ;;  %v1304_v32 = vsel %vm1210_vm11, %v3328_v41, %v1165_v9  ;;  %vm1488_vm15 = vcmp.eq.s32.totalorder %v5762_v61, 7 }
 0x21e   :  { %vm1627_vm10 = vcmp.eq.s32.totalorder %v5762_v61, 8  ;;  %v2644_v33 = vadd.f32 %v2599_v0, %v2554_v39  ;;  %v1396_v49 = vsel %vm1349_vm12, %v3334_v44, %v1257_v22  ;;  %v1443_v29 = vsel %vm1349_vm12, %v3343_v47, %v1304_v32 }
 0x21f   :  { %vm1766_vm13 = vcmp.eq.s32.totalorder %v5762_v61, 9  ;;  %v1535_v1 = vsel %vm1488_vm15, %v3353_v50, %v1396_v49  ;;  %v1582_v43 = vsel %vm1488_vm15, %v3356_v51, %v1443_v29  ;;  %vm1905_vm2 = vcmp.eq.s32.totalorder %v5762_v61, 10 }
 0x220   :  { %v371_v56 = vsel %vm370_vm0, %v5720_v13, 0  ;;  %v2782_v62 = vsel %vm2736_vm4, %v3274_v21, %v2644_v33  ;;  %v1674_v59 = vsel %vm1627_vm10, %v3365_v54, %v1535_v1  ;;  %v1721_v5 = vsel %vm1627_vm10, %v3373_v57, %v1582_v43 }
 0x221   :  { %vm2044_vm1 = vcmp.eq.s32.totalorder %v5762_v61, 11  ;;  %v2828_v11 = vsel %vm2690_vm7, %v3281_v24, %v2782_v62  ;;  %v1813_v53 = vsel %vm1766_vm13, %v3382_v60, %v1674_v59  ;;  %v1860_v13 = vsel %vm1766_vm13, %v3387_v63, %v1721_v5 }
 0x222   :  { %vm2183_vm5 = vcmp.eq.s32.totalorder %v5762_v61, 12  ;;  %vm2691_vm0 = vcmp.gt.f32.partialorder %v5665_v2, %v3262_v16  ;;  %2873 = vst [vmem:[#allocation11 + $0x100] sm:$0xff] %v2828_v11  ;;  %v1952_v46 = vsel %vm1905_vm2, %v3394_v8, %v1813_v53  ;;  %v1999_v37 = vsel %vm1905_vm2, %v3400_v10, %v1860_v13 }
 0x223   :  { %vm2322_vm4 = vcmp.eq.s32.totalorder %v5762_v61, 13  ;;  %vm460_vm3 = vcmp.lt.s32.totalorder %v371_v56, 14  ;;  %v2091_v25 = vsel %vm2044_vm1, %v3409_v14, %v1952_v46  ;;  %v2138_v15 = vsel %vm2044_vm1, %v3415_v18, %v1999_v37 }
 0x224   :  { %vm2461_vm9 = vcmp.eq.s32.totalorder %v5762_v61, 14  ;;  %v5864_v39 = vsel %vm460_vm3, %v371_v56, 14  ;;  %v2230_v0 = vsel %vm2183_vm5, %v3425_v26, %v2091_v25  ;;  %v2277_v45 = vsel %vm2183_vm5, %v3434_v36, %v2138_v15 }
 0x225   :  { %vm516_vm7 = vcmp.eq.s32.totalorder %v5864_v39, 0  ;;  %vm655_vm8 = vcmp.eq.s32.totalorder %v5864_v39, 1  ;;  %v2369_v9 = vsel %vm2322_vm4, %v3441_v42, %v2230_v0  ;;  %v2416_v22 = vsel %vm2322_vm4, %v3448_v48, %v2277_v45 }
 0x226   :  { %v563_v32 = vsel %vm516_vm7, %v3255_v12, 0.0  ;;  %v610_v33 = vsel %vm516_vm7, %v3267_v19, 0.0  ;;  %v2508_v61 = vsel %vm2461_vm9, %v3455_v52, %v2369_v9  ;;  %v2555_v49 = vsel %vm2461_vm9, %v3462_v58, %v2416_v22 }
 0x227   :  { %v702_v29 = vsel %vm655_vm8, %v3269_v20, %v563_v32  ;;  %v749_v1 = vsel %vm655_vm8, %v3276_v23, %v610_v33  ;;  %v2600_v43 = vmul.f32 %v2508_v61, %v5665_v2  ;;  %vm794_vm6 = vcmp.eq.s32.totalorder %v5864_v39, 2 }
 0x228   :  { %vm933_vm14 = vcmp.eq.s32.totalorder %v5864_v39, 3  ;;  %vm1072_vm11 = vcmp.eq.s32.totalorder %v5864_v39, 4  ;;  %vm2737_vm12 = vcmp.lt.f32.partialorder %v5665_v2, %v3265_v17  ;;  %v841_v56 = vsel %vm794_vm6, %v3286_v27, %v702_v29 }
 0x229   :  { %v888_v62 = vsel %vm794_vm6, %v3289_v28, %v749_v1  ;;  %vm1211_vm15 = vcmp.eq.s32.totalorder %v5864_v39, 5  ;;  %v2645_v59 = vadd.f32 %v2600_v43, %v2555_v49  ;;  %v980_v5 = vsel %vm933_vm14, %v3295_v30, %v841_v56 }
 0x22a   :  { %v1027_v11 = vsel %vm933_vm14, %v3297_v31, %v888_v62  ;;  %vm1350_vm10 = vcmp.eq.s32.totalorder %v5864_v39, 6  ;;  %v1119_v53 = vsel %vm1072_vm11, %v3306_v34, %v980_v5  ;;  %vm1489_vm13 = vcmp.eq.s32.totalorder %v5864_v39, 7 }
 0x22b   :  { %v1166_v13 = vsel %vm1072_vm11, %v3309_v35, %v1027_v11  ;;  %v2947_v46 = vadd.s32 4294967295, %v5715_v38  ;;  %v2783_v37 = vsel %vm2737_vm12, %v3274_v21, %v2645_v59  ;;  %v1258_v25 = vsel %vm1211_vm15, %v3325_v40, %v1119_v53 }
 0x22c   :  { %v1305_v15 = vsel %vm1211_vm15, %v3328_v41, %v1166_v13  ;;  %vm1628_vm2 = vcmp.eq.s32.totalorder %v5864_v39, 8  ;;  %v2829_v0 = vsel %vm2691_vm0, %v3281_v24, %v2783_v37  ;;  %v1397_v45 = vsel %vm1350_vm10, %v3334_v44, %v1258_v25 }
 0x22d   :  { %v1444_v9 = vsel %vm1350_vm10, %v3343_v47, %v1305_v15  ;;  %vm1767_vm1 = vcmp.eq.s32.totalorder %v5864_v39, 9  ;;  %2874 = vst [vmem:[#allocation11 + $0x108] sm:$0xff] %v2829_v0  ;;  %v1536_v38 = vsel %vm1489_vm13, %v3353_v50, %v1397_v45  ;;  %vm1906_vm5 = vcmp.eq.s32.totalorder %v5864_v39, 10 }
 0x22e   :  { %v1583_v22 = vsel %vm1489_vm13, %v3356_v51, %v1444_v9  ;;  %v203_v32 = vceil.f32 %v5724_v7  ;;  %v1675_v33 = vsel %vm1628_vm2, %v3365_v54, %v1536_v38  ;;  %vm2045_vm0 = vcmp.eq.s32.totalorder %v5864_v39, 11 }
 0x22f   :  { %v1722_v2 = vsel %vm1628_vm2, %v3373_v57, %v1583_v22  ;;  %vm2184_vm4 = vcmp.eq.s32.totalorder %v5864_v39, 12  ;;  %v1814_v61 = vsel %vm1767_vm1, %v3382_v60, %v1675_v33  ;;  %vm2323_vm3 = vcmp.eq.s32.totalorder %v5864_v39, 13 }
 0x230   :  { %v1861_v49 = vsel %vm1767_vm1, %v3387_v63, %v1722_v2  ;;  %vm2692_vm9 = vcmp.gt.f32.partialorder %v5672_v6, %v3262_v16  ;;  %vm372_vm7 = vcmp.gt.s32.totalorder %v2947_v46, 0  ;;  %v1953_v7 = vsel %vm1906_vm5, %v3394_v8, %v1814_v61 }
 0x231   :  { %v2000_v29 = vsel %vm1906_vm5, %v3400_v10, %v1861_v49  ;;  %vm2462_vm8 = vcmp.eq.s32.totalorder %v5864_v39, 14  ;;  %v373_v1 = vsel %vm372_vm7, %v2947_v46, 0  ;;  %v2092_v43 = vsel %vm2045_vm0, %v3409_v14, %v1953_v7 }
 0x232   :  { %v2139_v56 = vsel %vm2045_vm0, %v3415_v18, %v2000_v29  ;;  %vm2738_vm6 = vcmp.lt.f32.partialorder %v5672_v6, %v3265_v17  ;;  %vm462_vm14 = vcmp.lt.s32.totalorder %v373_v1, 14  ;;  %v2231_v62 = vsel %vm2184_vm4, %v3425_v26, %v2092_v43 }
 0x233   :  { %v2278_v59 = vsel %vm2184_vm4, %v3434_v36, %v2139_v56  ;;  %v5927_v5 = vsel %vm462_vm14, %v373_v1, 14  ;;  %v3058_v11 = vcvt.f32.s32 %v203_v32  ;;  %v2370_v53 = vsel %vm2323_vm3, %v3441_v42, %v2231_v62 }
 0x234   :  { %v2417_v13 = vsel %vm2323_vm3, %v3448_v48, %v2278_v59  ;;  %vm517_vm11 = vcmp.eq.s32.totalorder %v5927_v5, 0  ;;  %vm656_vm12 = vcmp.eq.s32.totalorder %v5927_v5, 1  ;;  %v2509_v46 = vsel %vm2462_vm8, %v3455_v52, %v2370_v53  ;;  %v5973_v53 = vld [vmem:[#allocation10 + $0x128] sm:$0xff] }
 0x235   :  { %v2556_v37 = vsel %vm2462_vm8, %v3462_v58, %v2417_v13  ;;  %v564_v25 = vsel %vm517_vm11, %v3255_v12, 0.0  ;;  %v611_v15 = vsel %vm517_vm11, %v3267_v19, 0.0  ;;  %v2601_v0 = vmul.f32 %v2509_v46, %v5672_v6 }
 0x236   :  { %v703_v45 = vsel %vm656_vm12, %v3269_v20, %v564_v25  ;;  %v750_v9 = vsel %vm656_vm12, %v3276_v23, %v611_v15  ;;  %vm795_vm15 = vcmp.eq.s32.totalorder %v5927_v5, 2  ;;  %vm934_vm10 = vcmp.eq.s32.totalorder %v5927_v5, 3 }
 0x237   :  { %v842_v39 = vsel %vm795_vm15, %v3286_v27, %v703_v45  ;;  %v889_v38 = vsel %vm795_vm15, %v3289_v28, %v750_v9  ;;  %vm1073_vm13 = vcmp.eq.s32.totalorder %v5927_v5, 4  ;;  %v2646_v22 = vadd.f32 %v2601_v0, %v2556_v37 }
 0x238   :  { %v981_v32 = vsel %vm934_vm10, %v3295_v30, %v842_v39  ;;  %v1028_v33 = vsel %vm934_vm10, %v3297_v31, %v889_v38  ;;  %vm1212_vm2 = vcmp.eq.s32.totalorder %v5927_v5, 5  ;;  %vm1351_vm1 = vcmp.eq.s32.totalorder %v5927_v5, 6 }
 0x239   :  { %v1120_v2 = vsel %vm1073_vm13, %v3306_v34, %v981_v32  ;;  %v1167_v61 = vsel %vm1073_vm13, %v3309_v35, %v1028_v33  ;;  %vm1490_vm5 = vcmp.eq.s32.totalorder %v5927_v5, 7  ;;  %v2784_v49 = vsel %vm2738_vm6, %v3274_v21, %v2646_v22 }
 0x23a   :  { %v1259_v7 = vsel %vm1212_vm2, %v3325_v40, %v1120_v2  ;;  %v1306_v29 = vsel %vm1212_vm2, %v3328_v41, %v1167_v61  ;;  %vm1629_vm0 = vcmp.eq.s32.totalorder %v5927_v5, 8  ;;  %v2830_v1 = vsel %vm2692_vm9, %v3281_v24, %v2784_v49  ;;  %v5997_v2 = vld [vmem:[#allocation10 + $0x130] sm:$0xff] }
 0x23b   :  { %v1398_v43 = vsel %vm1351_vm1, %v3334_v44, %v1259_v7  ;;  %v1445_v56 = vsel %vm1351_vm1, %v3343_v47, %v1306_v29  ;;  %vm1768_vm4 = vcmp.eq.s32.totalorder %v5927_v5, 9  ;;  %2875 = vst [vmem:[#allocation11 + $0x110] sm:$0xff] %v2830_v1  ;;  %vm1907_vm3 = vcmp.eq.s32.totalorder %v5927_v5, 10 }
 0x23c   :  { %v1537_v62 = vsel %vm1490_vm5, %v3353_v50, %v1398_v43  ;;  %v1584_v59 = vsel %vm1490_vm5, %v3356_v51, %v1445_v56  ;;  %vm2046_vm9 = vcmp.eq.s32.totalorder %v5927_v5, 11  ;;  %vm2185_vm7 = vcmp.eq.s32.totalorder %v5927_v5, 12 }
 0x23d   :  { %v1676_v13 = vsel %vm1629_vm0, %v3365_v54, %v1537_v62  ;;  %v1723_v6 = vsel %vm1629_vm0, %v3373_v57, %v1584_v59  ;;  %v2948_v25 = vadd.s32 4294967295, %v3058_v11  ;;  %vm2324_vm8 = vcmp.eq.s32.totalorder %v5927_v5, 13 }
 0x23e   :  { %v1815_v46 = vsel %vm1768_vm4, %v3382_v60, %v1676_v13  ;;  %v1862_v37 = vsel %vm1768_vm4, %v3387_v63, %v1723_v6  ;;  %v159_v45 = vmul.f32 %v3239_v4, %v5973_v53  ;;  %vm2463_vm6 = vcmp.eq.s32.totalorder %v5927_v5, 14 }
 0x23f   :  { %v1954_v15 = vsel %vm1907_vm3, %v3394_v8, %v1815_v46  ;;  %v2001_v0 = vsel %vm1907_vm3, %v3400_v10, %v1862_v37  ;;  %vm374_vm14 = vcmp.gt.s32.totalorder %v2948_v25, 0  ;;  %vm2693_vm11 = vcmp.gt.f32.partialorder %v5674_v55, %v3262_v16 }
 0x240   :  { %v2093_v9 = vsel %vm2046_vm9, %v3409_v14, %v1954_v15  ;;  %v2140_v39 = vsel %vm2046_vm9, %v3415_v18, %v2001_v0  ;;  %v375_v22 = vsel %vm374_vm14, %v2948_v25, 0  ;;  %vm2739_vm12 = vcmp.lt.f32.partialorder %v5674_v55, %v3265_v17 }
 0x241   :  { %v2232_v38 = vsel %vm2185_vm7, %v3425_v26, %v2093_v9  ;;  %v2279_v11 = vsel %vm2185_vm7, %v3434_v36, %v2140_v39  ;;  %vm464_vm15 = vcmp.lt.s32.totalorder %v375_v22, 14  ;;  %v204_v7 = vceil.f32 %v159_v45 }
 0x242   :  { %v2371_v32 = vsel %vm2324_vm8, %v3441_v42, %v2232_v38  ;;  %v2418_v33 = vsel %vm2324_vm8, %v3448_v48, %v2279_v11  ;;  %v6001_v49 = vsel %vm464_vm15, %v375_v22, 14  ;;  %v160_v56 = vmul.f32 %v3239_v4, %v5997_v2 }
 0x243   :  { %v2510_v5 = vsel %vm2463_vm6, %v3455_v52, %v2371_v32  ;;  %v2557_v61 = vsel %vm2463_vm6, %v3462_v58, %v2418_v33  ;;  %vm518_vm10 = vcmp.eq.s32.totalorder %v6001_v49, 0  ;;  %vm657_vm13 = vcmp.eq.s32.totalorder %v6001_v49, 1 }
 0x244   :  { %v2602_v29 = vmul.f32 %v2510_v5, %v5674_v55  ;;  %vm796_vm2 = vcmp.eq.s32.totalorder %v6001_v49, 2  ;;  %v565_v1 = vsel %vm518_vm10, %v3255_v12, 0.0  ;;  %v612_v43 = vsel %vm518_vm10, %v3267_v19, 0.0 }
 0x245   :  { %vm935_vm1 = vcmp.eq.s32.totalorder %v6001_v49, 3  ;;  %v704_v59 = vsel %vm657_vm13, %v3269_v20, %v565_v1  ;;  %v751_v13 = vsel %vm657_vm13, %v3276_v23, %v612_v43  ;;  %vm1074_vm5 = vcmp.eq.s32.totalorder %v6001_v49, 4  ;;  %v6048_v1 = vld [vmem:[#allocation10 + $0x138] sm:$0xff] }
 0x246   :  { %v2647_v62 = vadd.f32 %v2602_v29, %v2557_v61  ;;  %v843_v6 = vsel %vm796_vm2, %v3286_v27, %v704_v59  ;;  %v890_v46 = vsel %vm796_vm2, %v3289_v28, %v751_v13  ;;  %vm1213_vm0 = vcmp.eq.s32.totalorder %v6001_v49, 5 }
 0x247   :  { %v3060_v37 = vcvt.f32.s32 %v204_v7  ;;  %v982_v15 = vsel %vm935_vm1, %v3295_v30, %v843_v6  ;;  %v1029_v0 = vsel %vm935_vm1, %v3297_v31, %v890_v46  ;;  %vm1352_vm4 = vcmp.eq.s32.totalorder %v6001_v49, 6 }
 0x248   :  { %v2785_v25 = vsel %vm2739_vm12, %v3274_v21, %v2647_v62  ;;  %v1121_v9 = vsel %vm1074_vm5, %v3306_v34, %v982_v15  ;;  %v1168_v39 = vsel %vm1074_vm5, %v3309_v35, %v1029_v0  ;;  %vm1491_vm3 = vcmp.eq.s32.totalorder %v6001_v49, 7 }
 0x249   :  { %v2831_v45 = vsel %vm2693_vm11, %v3281_v24, %v2785_v25  ;;  %v1260_v38 = vsel %vm1213_vm0, %v3325_v40, %v1121_v9  ;;  %v1307_v11 = vsel %vm1213_vm0, %v3328_v41, %v1168_v39  ;;  %vm1630_vm9 = vcmp.eq.s32.totalorder %v6001_v49, 8 }
 0x24a   :  { %2876 = vst [vmem:[#allocation11 + $0x118] sm:$0xff] %v2831_v45  ;;  %v205_v22 = vceil.f32 %v160_v56  ;;  %v1399_v32 = vsel %vm1352_vm4, %v3334_v44, %v1260_v38  ;;  %v1446_v33 = vsel %vm1352_vm4, %v3343_v47, %v1307_v11  ;;  %vm1769_vm7 = vcmp.eq.s32.totalorder %v6001_v49, 9 }
 0x24b   :  { %vm1908_vm8 = vcmp.eq.s32.totalorder %v6001_v49, 10  ;;  %v1538_v55 = vsel %vm1491_vm3, %v3353_v50, %v1399_v32  ;;  %v1585_v5 = vsel %vm1491_vm3, %v3356_v51, %v1446_v33  ;;  %vm2047_vm6 = vcmp.eq.s32.totalorder %v6001_v49, 11 }
 0x24c   :  { %v2949_v61 = vadd.s32 4294967295, %v3060_v37  ;;  %v1677_v7 = vsel %vm1630_vm9, %v3365_v54, %v1538_v55  ;;  %v1724_v29 = vsel %vm1630_vm9, %v3373_v57, %v1585_v5  ;;  %vm2186_vm14 = vcmp.eq.s32.totalorder %v6001_v49, 12 }
 0x24d   :  { %vm2325_vm11 = vcmp.eq.s32.totalorder %v6001_v49, 13  ;;  %vm2740_vm12 = vcmp.lt.f32.partialorder %v5711_v3, %v3265_v17  ;;  %v1816_v43 = vsel %vm1769_vm7, %v3382_v60, %v1677_v7  ;;  %v1863_v56 = vsel %vm1769_vm7, %v3387_v63, %v1724_v29 }
 0x24e   :  { %vm2694_vm15 = vcmp.gt.f32.partialorder %v5711_v3, %v3262_v16  ;;  %vm376_vm10 = vcmp.gt.s32.totalorder %v2949_v61, 0  ;;  %v3062_v62 = vcvt.f32.s32 %v205_v22  ;;  %v1955_v59 = vsel %vm1908_vm8, %v3394_v8, %v1816_v43 }
 0x24f   :  { %v2002_v13 = vsel %vm1908_vm8, %v3400_v10, %v1863_v56  ;;  %vm2464_vm13 = vcmp.eq.s32.totalorder %v6001_v49, 14  ;;  %v377_v6 = vsel %vm376_vm10, %v2949_v61, 0  ;;  %v2094_v46 = vsel %vm2047_vm6, %v3409_v14, %v1955_v59 }
 0x250   :  { %v2141_v37 = vsel %vm2047_vm6, %v3415_v18, %v2002_v13  ;;  %vm466_vm2 = vcmp.lt.s32.totalorder %v377_v6, 14  ;;  %v161_v25 = vmul.f32 %v3239_v4, %v6048_v1  ;;  %v2233_v15 = vsel %vm2186_vm14, %v3425_v26, %v2094_v46 }
 0x251   :  { %v2280_v0 = vsel %vm2186_vm14, %v3434_v36, %v2141_v37  ;;  %v6075_v45 = vsel %vm466_vm2, %v377_v6, 14  ;;  %v2950_v9 = vadd.s32 4294967295, %v3062_v62  ;;  %v2372_v39 = vsel %vm2325_vm11, %v3441_v42, %v2233_v15 }
 0x252   :  { %v2419_v38 = vsel %vm2325_vm11, %v3448_v48, %v2280_v0  ;;  %vm519_vm1 = vcmp.eq.s32.totalorder %v6075_v45, 0  ;;  %vm658_vm5 = vcmp.eq.s32.totalorder %v6075_v45, 1  ;;  %v2511_v11 = vsel %vm2464_vm13, %v3455_v52, %v2372_v39 }
 0x253   :  { %v2558_v22 = vsel %vm2464_vm13, %v3462_v58, %v2419_v38  ;;  %v566_v32 = vsel %vm519_vm1, %v3255_v12, 0.0  ;;  %v613_v33 = vsel %vm519_vm1, %v3267_v19, 0.0  ;;  %v2603_v55 = vmul.f32 %v2511_v11, %v5711_v3 }
 0x254   :  { %v705_v5 = vsel %vm658_vm5, %v3269_v20, %v566_v32  ;;  %v752_v61 = vsel %vm658_vm5, %v3276_v23, %v613_v33  ;;  %vm797_vm0 = vcmp.eq.s32.totalorder %v6075_v45, 2  ;;  %vm936_vm4 = vcmp.eq.s32.totalorder %v6075_v45, 3 }
 0x255   :  { %v844_v49 = vsel %vm797_vm0, %v3286_v27, %v705_v5  ;;  %v891_v7 = vsel %vm797_vm0, %v3289_v28, %v752_v61  ;;  %vm1075_vm3 = vcmp.eq.s32.totalorder %v6075_v45, 4  ;;  %v2648_v29 = vadd.f32 %v2603_v55, %v2558_v22 }
 0x256   :  { %v983_v43 = vsel %vm936_vm4, %v3295_v30, %v844_v49  ;;  %v1030_v56 = vsel %vm936_vm4, %v3297_v31, %v891_v7  ;;  %vm1214_vm9 = vcmp.eq.s32.totalorder %v6075_v45, 5  ;;  %vm1353_vm7 = vcmp.eq.s32.totalorder %v6075_v45, 6 }
 0x257   :  { %v1122_v62 = vsel %vm1075_vm3, %v3306_v34, %v983_v43  ;;  %v1169_v59 = vsel %vm1075_vm3, %v3309_v35, %v1030_v56  ;;  %vm1492_vm8 = vcmp.eq.s32.totalorder %v6075_v45, 7  ;;  %v2786_v13 = vsel %vm2740_vm12, %v3274_v21, %v2648_v29 }
 0x258   :  { %v1261_v6 = vsel %vm1214_vm9, %v3325_v40, %v1122_v62  ;;  %v1308_v46 = vsel %vm1214_vm9, %v3328_v41, %v1169_v59  ;;  %vm1631_vm6 = vcmp.eq.s32.totalorder %v6075_v45, 8  ;;  %v2832_v37 = vsel %vm2694_vm15, %v3281_v24, %v2786_v13 }
 0x259   :  { %v1400_v15 = vsel %vm1353_vm7, %v3334_v44, %v1261_v6  ;;  %v1447_v0 = vsel %vm1353_vm7, %v3343_v47, %v1308_v46  ;;  %vm1770_vm14 = vcmp.eq.s32.totalorder %v6075_v45, 9  ;;  %2877 = vst [vmem:[#allocation11 + $0x120] sm:$0xff] %v2832_v37  ;;  %vm1909_vm11 = vcmp.eq.s32.totalorder %v6075_v45, 10 }
 0x25a   :  { %v1539_v39 = vsel %vm1492_vm8, %v3353_v50, %v1400_v15  ;;  %v1586_v38 = vsel %vm1492_vm8, %v3356_v51, %v1447_v0  ;;  %vm2048_vm12 = vcmp.eq.s32.totalorder %v6075_v45, 11  ;;  %vm2741_vm15 = vcmp.lt.f32.partialorder %v5973_v53, %v3265_v17 }
 0x25b   :  { %v1678_v11 = vsel %vm1631_vm6, %v3365_v54, %v1539_v39  ;;  %v1725_v22 = vsel %vm1631_vm6, %v3373_v57, %v1586_v38  ;;  %v206_v3 = vceil.f32 %v161_v25  ;;  %vm2187_vm10 = vcmp.eq.s32.totalorder %v6075_v45, 12 }
 0x25c   :  { %v1817_v32 = vsel %vm1770_vm14, %v3382_v60, %v1678_v11  ;;  %v1864_v33 = vsel %vm1770_vm14, %v3387_v63, %v1725_v22  ;;  %vm2695_vm13 = vcmp.gt.f32.partialorder %v5973_v53, %v3262_v16  ;;  %vm378_vm2 = vcmp.gt.s32.totalorder %v2950_v9, 0 }
 0x25d   :  { %v1956_v55 = vsel %vm1909_vm11, %v3394_v8, %v1817_v32  ;;  %v2003_v5 = vsel %vm1909_vm11, %v3400_v10, %v1864_v33  ;;  %vm2326_vm1 = vcmp.eq.s32.totalorder %v6075_v45, 13  ;;  %v379_v61 = vsel %vm378_vm2, %v2950_v9, 0 }
 0x25e   :  { %v2095_v49 = vsel %vm2048_vm12, %v3409_v14, %v1956_v55  ;;  %v2142_v25 = vsel %vm2048_vm12, %v3415_v18, %v2003_v5  ;;  %vm2465_vm5 = vcmp.eq.s32.totalorder %v6075_v45, 14  ;;  %vm468_vm0 = vcmp.lt.s32.totalorder %v379_v61, 14 }
 0x25f   :  { %v2234_v7 = vsel %vm2187_vm10, %v3425_v26, %v2095_v49  ;;  %v2281_v29 = vsel %vm2187_vm10, %v3434_v36, %v2142_v25  ;;  %v6139_v43 = vsel %vm468_vm0, %v379_v61, 14  ;;  %v3064_v56 = vcvt.f32.s32 %v206_v3 }
 0x260   :  { %v2373_v62 = vsel %vm2326_vm1, %v3441_v42, %v2234_v7  ;;  %v2420_v59 = vsel %vm2326_vm1, %v3448_v48, %v2281_v29  ;;  %vm520_vm4 = vcmp.eq.s32.totalorder %v6139_v43, 0  ;;  %vm659_vm3 = vcmp.eq.s32.totalorder %v6139_v43, 1 }
 0x261   :  { %v2512_v9 = vsel %vm2465_vm5, %v3455_v52, %v2373_v62  ;;  %v2559_v45 = vsel %vm2465_vm5, %v3462_v58, %v2420_v59  ;;  %v567_v13 = vsel %vm520_vm4, %v3255_v12, 0.0  ;;  %v614_v6 = vsel %vm520_vm4, %v3267_v19, 0.0 }
 0x262   :  { %v2604_v46 = vmul.f32 %v2512_v9, %v5973_v53  ;;  %v706_v37 = vsel %vm659_vm3, %v3269_v20, %v567_v13  ;;  %v753_v15 = vsel %vm659_vm3, %v3276_v23, %v614_v6  ;;  %vm798_vm9 = vcmp.eq.s32.totalorder %v6139_v43, 2 }
 0x263   :  { %v845_v0 = vsel %vm798_vm9, %v3286_v27, %v706_v37  ;;  %v892_v39 = vsel %vm798_vm9, %v3289_v28, %v753_v15  ;;  %vm937_vm7 = vcmp.eq.s32.totalorder %v6139_v43, 3  ;;  %vm1076_vm8 = vcmp.eq.s32.totalorder %v6139_v43, 4  ;;  %v6193_v15 = vld [vmem:[#allocation10 + $0x140] sm:$0xff] }
 0x264   :  { %v2649_v38 = vadd.f32 %v2604_v46, %v2559_v45  ;;  %v984_v11 = vsel %vm937_vm7, %v3295_v30, %v845_v0  ;;  %v1031_v22 = vsel %vm937_vm7, %v3297_v31, %v892_v39  ;;  %vm1215_vm6 = vcmp.eq.s32.totalorder %v6139_v43, 5 }
 0x265   :  { %v1123_v3 = vsel %vm1076_vm8, %v3306_v34, %v984_v11  ;;  %v1170_v32 = vsel %vm1076_vm8, %v3309_v35, %v1031_v22  ;;  %vm1354_vm14 = vcmp.eq.s32.totalorder %v6139_v43, 6  ;;  %vm1493_vm11 = vcmp.eq.s32.totalorder %v6139_v43, 7 }
 0x266   :  { %v2787_v33 = vsel %vm2741_vm15, %v3274_v21, %v2649_v38  ;;  %v1262_v55 = vsel %vm1215_vm6, %v3325_v40, %v1123_v3  ;;  %v1309_v5 = vsel %vm1215_vm6, %v3328_v41, %v1170_v32  ;;  %vm1632_vm12 = vcmp.eq.s32.totalorder %v6139_v43, 8 }
 0x267   :  { %v2833_v61 = vsel %vm2695_vm13, %v3281_v24, %v2787_v33  ;;  %v1401_v49 = vsel %vm1354_vm14, %v3334_v44, %v1262_v55  ;;  %v1448_v25 = vsel %vm1354_vm14, %v3343_v47, %v1309_v5  ;;  %vm1771_vm10 = vcmp.eq.s32.totalorder %v6139_v43, 9 }
 0x268   :  { %2878 = vst [vmem:[#allocation11 + $0x128] sm:$0xff] %v2833_v61  ;;  %v1540_v7 = vsel %vm1493_vm11, %v3353_v50, %v1401_v49  ;;  %v1587_v29 = vsel %vm1493_vm11, %v3356_v51, %v1448_v25  ;;  %vm1910_vm15 = vcmp.eq.s32.totalorder %v6139_v43, 10  ;;  %vm2049_vm2 = vcmp.eq.s32.totalorder %v6139_v43, 11 }
 0x269   :  { %v1679_v62 = vsel %vm1632_vm12, %v3365_v54, %v1540_v7  ;;  %v1726_v59 = vsel %vm1632_vm12, %v3373_v57, %v1587_v29  ;;  %vm2188_vm13 = vcmp.eq.s32.totalorder %v6139_v43, 12  ;;  %v2951_v45 = vadd.s32 4294967295, %v3064_v56 }
 0x26a   :  { %v1818_v53 = vsel %vm1771_vm10, %v3382_v60, %v1679_v62  ;;  %v1865_v9 = vsel %vm1771_vm10, %v3387_v63, %v1726_v59  ;;  %vm2327_vm1 = vcmp.eq.s32.totalorder %v6139_v43, 13  ;;  %vm2466_vm5 = vcmp.eq.s32.totalorder %v6139_v43, 14  ;;  %v6203_v43 = vld [vmem:[#allocation10 + $0x148] sm:$0xff] }
 0x26b   :  { %v1957_v13 = vsel %vm1910_vm15, %v3394_v8, %v1818_v53  ;;  %v2004_v6 = vsel %vm1910_vm15, %v3400_v10, %v1865_v9  ;;  %vm380_vm0 = vcmp.gt.s32.totalorder %v2951_v45, 0  ;;  %vm2696_vm4 = vcmp.gt.f32.partialorder %v5997_v2, %v3262_v16 }
 0x26c   :  { %v2096_v46 = vsel %vm2049_vm2, %v3409_v14, %v1957_v13  ;;  %v2143_v37 = vsel %vm2049_vm2, %v3415_v18, %v2004_v6  ;;  %v381_v56 = vsel %vm380_vm0, %v2951_v45, 0  ;;  %vm2742_vm3 = vcmp.lt.f32.partialorder %v5997_v2, %v3265_v17 }
 0x26d   :  { %v2235_v0 = vsel %vm2188_vm13, %v3425_v26, %v2096_v46  ;;  %v2282_v39 = vsel %vm2188_vm13, %v3434_v36, %v2143_v37  ;;  %vm470_vm9 = vcmp.lt.s32.totalorder %v381_v56, 14  ;;  %v162_v33 = vmul.f32 %v3239_v4, %v6193_v15 }
 0x26e   :  { %v2374_v38 = vsel %vm2327_vm1, %v3441_v42, %v2235_v0  ;;  %v2421_v11 = vsel %vm2327_vm1, %v3448_v48, %v2282_v39  ;;  %v6207_v32 = vsel %vm470_vm9, %v381_v56, 14  ;;  %v163_v49 = vmul.f32 %v3239_v4, %v6203_v43 }
 0x26f   :  { %v2513_v22 = vsel %vm2466_vm5, %v3455_v52, %v2374_v38  ;;  %v2560_v3 = vsel %vm2466_vm5, %v3462_v58, %v2421_v11  ;;  %vm521_vm7 = vcmp.eq.s32.totalorder %v6207_v32, 0  ;;  %vm660_vm8 = vcmp.eq.s32.totalorder %v6207_v32, 1 }
 0x270   :  { %v2605_v55 = vmul.f32 %v2513_v22, %v5997_v2  ;;  %vm799_vm6 = vcmp.eq.s32.totalorder %v6207_v32, 2  ;;  %v568_v5 = vsel %vm521_vm7, %v3255_v12, 0.0  ;;  %v615_v61 = vsel %vm521_vm7, %v3267_v19, 0.0 }
 0x271   :  { %vm938_vm14 = vcmp.eq.s32.totalorder %v6207_v32, 3  ;;  %v707_v7 = vsel %vm660_vm8, %v3269_v20, %v568_v5  ;;  %v754_v29 = vsel %vm660_vm8, %v3276_v23, %v615_v61  ;;  %vm1077_vm11 = vcmp.eq.s32.totalorder %v6207_v32, 4 }
 0x272   :  { %v2650_v25 = vadd.f32 %v2605_v55, %v2560_v3  ;;  %v846_v62 = vsel %vm799_vm6, %v3286_v27, %v707_v7  ;;  %v893_v59 = vsel %vm799_vm6, %v3289_v28, %v754_v29  ;;  %vm1216_vm12 = vcmp.eq.s32.totalorder %v6207_v32, 5 }
 0x273   :  { %v207_v53 = vceil.f32 %v162_v33  ;;  %v985_v45 = vsel %vm938_vm14, %v3295_v30, %v846_v62  ;;  %v1032_v13 = vsel %vm938_vm14, %v3297_v31, %v893_v59  ;;  %vm1355_vm10 = vcmp.eq.s32.totalorder %v6207_v32, 6 }
 0x274   :  { %v2788_v9 = vsel %vm2742_vm3, %v3274_v21, %v2650_v25  ;;  %v1124_v46 = vsel %vm1077_vm11, %v3306_v34, %v985_v45  ;;  %v1171_v37 = vsel %vm1077_vm11, %v3309_v35, %v1032_v13  ;;  %vm1494_vm15 = vcmp.eq.s32.totalorder %v6207_v32, 7 }
 0x275   :  { %v2834_v6 = vsel %vm2696_vm4, %v3281_v24, %v2788_v9  ;;  %v1263_v0 = vsel %vm1216_vm12, %v3325_v40, %v1124_v46  ;;  %v1310_v39 = vsel %vm1216_vm12, %v3328_v41, %v1171_v37  ;;  %vm1633_vm2 = vcmp.eq.s32.totalorder %v6207_v32, 8  ;;  %v6263_v9 = vld [vmem:[#allocation10 + $0x150] sm:$0xff] }
 0x276   :  { %2879 = vst [vmem:[#allocation11 + $0x130] sm:$0xff] %v2834_v6  ;;  %v208_v56 = vceil.f32 %v163_v49  ;;  %v1402_v38 = vsel %vm1355_vm10, %v3334_v44, %v1263_v0  ;;  %v1449_v11 = vsel %vm1355_vm10, %v3343_v47, %v1310_v39  ;;  %vm1772_vm13 = vcmp.eq.s32.totalorder %v6207_v32, 9 }
 0x277   :  { %v1541_v2 = vsel %vm1494_vm15, %v3353_v50, %v1402_v38  ;;  %v1588_v22 = vsel %vm1494_vm15, %v3356_v51, %v1449_v11  ;;  %vm1911_vm1 = vcmp.eq.s32.totalorder %v6207_v32, 10  ;;  %v3066_v3 = vcvt.f32.s32 %v207_v53 }
 0x278   :  { %v1680_v33 = vsel %vm1633_vm2, %v3365_v54, %v1541_v2  ;;  %v1727_v55 = vsel %vm1633_vm2, %v3373_v57, %v1588_v22  ;;  %vm2050_vm5 = vcmp.eq.s32.totalorder %v6207_v32, 11  ;;  %vm2189_vm0 = vcmp.eq.s32.totalorder %v6207_v32, 12 }
 0x279   :  { %v1819_v5 = vsel %vm1772_vm13, %v3382_v60, %v1680_v33  ;;  %v1866_v61 = vsel %vm1772_vm13, %v3387_v63, %v1727_v55  ;;  %vm2697_vm4 = vcmp.gt.f32.partialorder %v6048_v1, %v3262_v16  ;;  %v2952_v49 = vadd.s32 4294967295, %v3066_v3 }
 0x27a   :  { %v3068_v25 = vcvt.f32.s32 %v208_v56  ;;  %v1958_v7 = vsel %vm1911_vm1, %v3394_v8, %v1819_v5  ;;  %v2005_v29 = vsel %vm1911_vm1, %v3400_v10, %v1866_v61  ;;  %vm2328_vm3 = vcmp.eq.s32.totalorder %v6207_v32, 13 }
 0x27b   :  { %vm2467_vm9 = vcmp.eq.s32.totalorder %v6207_v32, 14  ;;  %v2097_v62 = vsel %vm2050_vm5, %v3409_v14, %v1958_v7  ;;  %v2144_v59 = vsel %vm2050_vm5, %v3415_v18, %v2005_v29  ;;  %vm382_vm7 = vcmp.gt.s32.totalorder %v2952_v49, 0 }
 0x27c   :  { %v2953_v53 = vadd.s32 4294967295, %v3068_v25  ;;  %v2236_v45 = vsel %vm2189_vm0, %v3425_v26, %v2097_v62  ;;  %v2283_v13 = vsel %vm2189_vm0, %v3434_v36, %v2144_v59  ;;  %vm2743_vm8 = vcmp.lt.f32.partialorder %v6048_v1, %v3265_v17 }
 0x27d   :  { %v383_v6 = vsel %vm382_vm7, %v2952_v49, 0  ;;  %v2375_v46 = vsel %vm2328_vm3, %v3441_v42, %v2236_v45  ;;  %v2422_v37 = vsel %vm2328_vm3, %v3448_v48, %v2283_v13  ;;  %v6281_v32 = vmul.f32 %v3239_v4, %v6263_v9 }
 0x27e   :  { %vm472_vm6 = vcmp.lt.s32.totalorder %v383_v6, 14  ;;  %vm384_vm14 = vcmp.gt.s32.totalorder %v2953_v53, 0  ;;  %v2514_v0 = vsel %vm2467_vm9, %v3455_v52, %v2375_v46  ;;  %v2561_v39 = vsel %vm2467_vm9, %v3462_v58, %v2422_v37 }
 0x27f   :  { %v6277_v56 = vsel %vm472_vm6, %v383_v6, 14  ;;  %v2606_v38 = vmul.f32 %v2514_v0, %v6048_v1  ;;  %v385_v22 = vsel %vm384_vm14, %v2953_v53, 0 }
 0x280   :  { %vm522_vm11 = vcmp.eq.s32.totalorder %v6277_v56, 0  ;;  %vm661_vm12 = vcmp.eq.s32.totalorder %v6277_v56, 1  ;;  %vm800_vm10 = vcmp.eq.s32.totalorder %v6277_v56, 2  ;;  %vm939_vm15 = vcmp.eq.s32.totalorder %v6277_v56, 3 }
 0x281   :  { %v569_v11 = vsel %vm522_vm11, %v3255_v12, 0.0  ;;  %v616_v2 = vsel %vm522_vm11, %v3267_v19, 0.0  ;;  %v2651_v3 = vadd.f32 %v2606_v38, %v2561_v39  ;;  %vm1078_vm2 = vcmp.eq.s32.totalorder %v6277_v56, 4 }
 0x282   :  { %v708_v33 = vsel %vm661_vm12, %v3269_v20, %v569_v11  ;;  %v755_v55 = vsel %vm661_vm12, %v3276_v23, %v616_v2  ;;  %vm1217_vm13 = vcmp.eq.s32.totalorder %v6277_v56, 5  ;;  %vm1356_vm1 = vcmp.eq.s32.totalorder %v6277_v56, 6 }
 0x283   :  { %v847_v5 = vsel %vm800_vm10, %v3286_v27, %v708_v33  ;;  %v894_v61 = vsel %vm800_vm10, %v3289_v28, %v755_v55  ;;  %v2789_v49 = vsel %vm2743_vm8, %v3274_v21, %v2651_v3  ;;  %vm1495_vm5 = vcmp.eq.s32.totalorder %v6277_v56, 7 }
 0x284   :  { %v986_v25 = vsel %vm939_vm15, %v3295_v30, %v847_v5  ;;  %v1033_v7 = vsel %vm939_vm15, %v3297_v31, %v894_v61  ;;  %v2835_v29 = vsel %vm2697_vm4, %v3281_v24, %v2789_v49  ;;  %vm1634_vm0 = vcmp.eq.s32.totalorder %v6277_v56, 8 }
 0x285   :  { %v1125_v62 = vsel %vm1078_vm2, %v3306_v34, %v986_v25  ;;  %v1172_v59 = vsel %vm1078_vm2, %v3309_v35, %v1033_v7  ;;  %2880 = vst [vmem:[#allocation11 + $0x138] sm:$0xff] %v2835_v29  ;;  %vm1773_vm3 = vcmp.eq.s32.totalorder %v6277_v56, 9  ;;  %vm1912_vm9 = vcmp.eq.s32.totalorder %v6277_v56, 10 }
 0x286   :  { %v1264_v53 = vsel %vm1217_vm13, %v3325_v40, %v1125_v62  ;;  %v1311_v45 = vsel %vm1217_vm13, %v3328_v41, %v1172_v59  ;;  %vm2051_vm4 = vcmp.eq.s32.totalorder %v6277_v56, 11  ;;  %vm2190_vm7 = vcmp.eq.s32.totalorder %v6277_v56, 12 }
 0x287   :  { %v1403_v13 = vsel %vm1356_vm1, %v3334_v44, %v1264_v53  ;;  %v1450_v1 = vsel %vm1356_vm1, %v3343_v47, %v1311_v45  ;;  %vm2329_vm8 = vcmp.eq.s32.totalorder %v6277_v56, 13  ;;  %vm474_vm6 = vcmp.lt.s32.totalorder %v385_v22, 14  ;;  %v6371_v45 = vld [vmem:[#allocation10 + $0x158] sm:$0xff] }
 0x288   :  { %v1542_v6 = vsel %vm1495_vm5, %v3353_v50, %v1403_v13  ;;  %v1589_v46 = vsel %vm1495_vm5, %v3356_v51, %v1450_v1  ;;  %vm2468_vm14 = vcmp.eq.s32.totalorder %v6277_v56, 14  ;;  %vm2744_vm11 = vcmp.lt.f32.partialorder %v6193_v15, %v3265_v17 }
 0x289   :  { %v1681_v37 = vsel %vm1634_vm0, %v3365_v54, %v1542_v6  ;;  %v1728_v0 = vsel %vm1634_vm0, %v3373_v57, %v1589_v46  ;;  %v6327_v39 = vsel %vm474_vm6, %v385_v22, 14  ;;  %vm2698_vm12 = vcmp.gt.f32.partialorder %v6193_v15, %v3262_v16 }
 0x28a   :  { %v1820_v38 = vsel %vm1773_vm3, %v3382_v60, %v1681_v37  ;;  %v1867_v11 = vsel %vm1773_vm3, %v3387_v63, %v1728_v0  ;;  %vm523_vm10 = vcmp.eq.s32.totalorder %v6327_v39, 0  ;;  %vm662_vm15 = vcmp.eq.s32.totalorder %v6327_v39, 1 }
 0x28b   :  { %v1959_v2 = vsel %vm1912_vm9, %v3394_v8, %v1820_v38  ;;  %v2006_v22 = vsel %vm1912_vm9, %v3400_v10, %v1867_v11  ;;  %v570_v3 = vsel %vm523_vm10, %v3255_v12, 0.0  ;;  %v617_v33 = vsel %vm523_vm10, %v3267_v19, 0.0 }
 0x28c   :  { %v2098_v55 = vsel %vm2051_vm4, %v3409_v14, %v1959_v2  ;;  %v2145_v5 = vsel %vm2051_vm4, %v3415_v18, %v2006_v22  ;;  %v709_v61 = vsel %vm662_vm15, %v3269_v20, %v570_v3  ;;  %v756_v49 = vsel %vm662_vm15, %v3276_v23, %v617_v33 }
 0x28d   :  { %v2237_v25 = vsel %vm2190_vm7, %v3425_v26, %v2098_v55  ;;  %v2284_v7 = vsel %vm2190_vm7, %v3434_v36, %v2145_v5  ;;  %vm801_vm2 = vcmp.eq.s32.totalorder %v6327_v39, 2  ;;  %vm940_vm13 = vcmp.eq.s32.totalorder %v6327_v39, 3 }
 0x28e   :  { %v2376_v29 = vsel %vm2329_vm8, %v3441_v42, %v2237_v25  ;;  %v2423_v62 = vsel %vm2329_vm8, %v3448_v48, %v2284_v7  ;;  %v848_v59 = vsel %vm801_vm2, %v3286_v27, %v709_v61  ;;  %v895_v53 = vsel %vm801_vm2, %v3289_v28, %v756_v49 }
 0x28f   :  { %v2515_v13 = vsel %vm2468_vm14, %v3455_v52, %v2376_v29  ;;  %v2562_v1 = vsel %vm2468_vm14, %v3462_v58, %v2423_v62  ;;  %v987_v6 = vsel %vm940_vm13, %v3295_v30, %v848_v59  ;;  %v1034_v46 = vsel %vm940_vm13, %v3297_v31, %v895_v53  ;;  %v6414_v59 = vld [vmem:[#allocation10 + $0x160] sm:$0xff] }
 0x290   :  { %v2607_v37 = vmul.f32 %v2515_v13, %v6193_v15  ;;  %vm1079_vm1 = vcmp.eq.s32.totalorder %v6327_v39, 4  ;;  %vm1218_vm5 = vcmp.eq.s32.totalorder %v6327_v39, 5  ;;  %vm1357_vm0 = vcmp.eq.s32.totalorder %v6327_v39, 6 }
 0x291   :  { %v1126_v0 = vsel %vm1079_vm1, %v3306_v34, %v987_v6  ;;  %v1173_v38 = vsel %vm1079_vm1, %v3309_v35, %v1034_v46  ;;  %vm1496_vm3 = vcmp.eq.s32.totalorder %v6327_v39, 7  ;;  %v165_v56 = vmul.f32 %v3239_v4, %v6371_v45 }
 0x292   :  { %v2652_v11 = vadd.f32 %v2607_v37, %v2562_v1  ;;  %v1265_v2 = vsel %vm1218_vm5, %v3325_v40, %v1126_v0  ;;  %v1312_v22 = vsel %vm1218_vm5, %v3328_v41, %v1173_v38  ;;  %vm1635_vm9 = vcmp.eq.s32.totalorder %v6327_v39, 8 }
 0x293   :  { %v1404_v3 = vsel %vm1357_vm0, %v3334_v44, %v1265_v2  ;;  %v1451_v33 = vsel %vm1357_vm0, %v3343_v47, %v1312_v22  ;;  %vm1774_vm4 = vcmp.eq.s32.totalorder %v6327_v39, 9  ;;  %v209_v55 = vceil.f32 %v6281_v32 }
 0x294   :  { %v2790_v5 = vsel %vm2744_vm11, %v3274_v21, %v2652_v11  ;;  %v1543_v61 = vsel %vm1496_vm3, %v3353_v50, %v1404_v3  ;;  %v1590_v49 = vsel %vm1496_vm3, %v3356_v51, %v1451_v33  ;;  %vm1913_vm7 = vcmp.eq.s32.totalorder %v6327_v39, 10 }
 0x295   :  { %v2836_v25 = vsel %vm2698_vm12, %v3281_v24, %v2790_v5  ;;  %v1682_v7 = vsel %vm1635_vm9, %v3365_v54, %v1543_v61  ;;  %v1729_v32 = vsel %vm1635_vm9, %v3373_v57, %v1590_v49  ;;  %vm2052_vm8 = vcmp.eq.s32.totalorder %v6327_v39, 11 }
 0x296   :  { %2881 = vst [vmem:[#allocation11 + $0x140] sm:$0xff] %v2836_v25  ;;  %v1821_v29 = vsel %vm1774_vm4, %v3382_v60, %v1682_v7  ;;  %v1868_v62 = vsel %vm1774_vm4, %v3387_v63, %v1729_v32  ;;  %vm2191_vm6 = vcmp.eq.s32.totalorder %v6327_v39, 12  ;;  %vm2330_vm14 = vcmp.eq.s32.totalorder %v6327_v39, 13 }
 0x297   :  { %v1960_v53 = vsel %vm1913_vm7, %v3394_v8, %v1821_v29  ;;  %v2007_v15 = vsel %vm1913_vm7, %v3400_v10, %v1868_v62  ;;  %v3070_v13 = vcvt.f32.s32 %v209_v55  ;;  %vm2469_vm11 = vcmp.eq.s32.totalorder %v6327_v39, 14 }
 0x298   :  { %v2099_v1 = vsel %vm2052_vm8, %v3409_v14, %v1960_v53  ;;  %v2146_v6 = vsel %vm2052_vm8, %v3415_v18, %v2007_v15  ;;  %v210_v46 = vceil.f32 %v165_v56  ;;  %v166_v11 = vmul.f32 %v3239_v4, %v6414_v59 }
 0x299   :  { %v2238_v37 = vsel %vm2191_vm6, %v3425_v26, %v2099_v1  ;;  %v2285_v0 = vsel %vm2191_vm6, %v3434_v36, %v2146_v6  ;;  %v2954_v38 = vadd.s32 4294967295, %v3070_v13  ;;  %vm2745_vm10 = vcmp.lt.f32.partialorder %v6203_v43, %v3265_v17 }
 0x29a   :  { %v2377_v2 = vsel %vm2330_vm14, %v3441_v42, %v2238_v37  ;;  %v2424_v22 = vsel %vm2330_vm14, %v3448_v48, %v2285_v0  ;;  %v3072_v3 = vcvt.f32.s32 %v210_v46  ;;  %v211_v39 = vceil.f32 %v166_v11 }
 0x29b   :  { %v2516_v33 = vsel %vm2469_vm11, %v3455_v52, %v2377_v2  ;;  %v2563_v55 = vsel %vm2469_vm11, %v3462_v58, %v2424_v22  ;;  %vm386_vm12 = vcmp.gt.s32.totalorder %v2954_v38, 0  ;;  %vm2699_vm2 = vcmp.gt.f32.partialorder %v6203_v43, %v3262_v16 }
 0x29c   :  { %v2608_v56 = vmul.f32 %v2516_v33, %v6203_v43  ;;  %v387_v5 = vsel %vm386_vm12, %v2954_v38, 0  ;;  %v2955_v49 = vadd.s32 4294967295, %v3072_v3  ;;  %v6440_v25 = vcvt.f32.s32 %v211_v39 }
 0x29d   :  { %vm476_vm15 = vcmp.lt.s32.totalorder %v387_v5, 14 }
 0x29e   :  { %v2653_v61 = vadd.f32 %v2608_v56, %v2563_v55  ;;  %v6435_v4 = vsel %vm476_vm15, %v387_v5, 14  ;;  %vm388_vm4 = vcmp.gt.s32.totalorder %v2955_v49, 0 }
 0x29f   :  { %vm524_vm13 = vcmp.eq.s32.totalorder %v6435_v4, 0  ;;  %vm663_vm1 = vcmp.eq.s32.totalorder %v6435_v4, 1  ;;  %vm802_vm5 = vcmp.eq.s32.totalorder %v6435_v4, 2  ;;  %vm941_vm0 = vcmp.eq.s32.totalorder %v6435_v4, 3 }
 0x2a0   :  { %v2791_v7 = vsel %vm2745_vm10, %v3274_v21, %v2653_v61  ;;  %v571_v32 = vsel %vm524_vm13, %v3255_v12, 0.0  ;;  %v618_v29 = vsel %vm524_vm13, %v3267_v19, 0.0  ;;  %vm1080_vm3 = vcmp.eq.s32.totalorder %v6435_v4, 4 }
 0x2a1   :  { %v2837_v43 = vsel %vm2699_vm2, %v3281_v24, %v2791_v7  ;;  %v710_v62 = vsel %vm663_vm1, %v3269_v20, %v571_v32  ;;  %v757_v53 = vsel %vm663_vm1, %v3276_v23, %v618_v29  ;;  %vm1219_vm9 = vcmp.eq.s32.totalorder %v6435_v4, 5 }
 0x2a2   :  { %2882 = vst [vmem:[#allocation11 + $0x148] sm:$0xff] %v2837_v43  ;;  %v849_v15 = vsel %vm802_vm5, %v3286_v27, %v710_v62  ;;  %v896_v13 = vsel %vm802_vm5, %v3289_v28, %v757_v53  ;;  %vm1358_vm7 = vcmp.eq.s32.totalorder %v6435_v4, 6  ;;  %vm1497_vm8 = vcmp.eq.s32.totalorder %v6435_v4, 7 }
 0x2a3   :  { %v988_v1 = vsel %vm941_vm0, %v3295_v30, %v849_v15  ;;  %v1035_v6 = vsel %vm941_vm0, %v3297_v31, %v896_v13  ;;  %vm1636_vm6 = vcmp.eq.s32.totalorder %v6435_v4, 8  ;;  %vm1775_vm14 = vcmp.eq.s32.totalorder %v6435_v4, 9 }
 0x2a4   :  { %v1127_v46 = vsel %vm1080_vm3, %v3306_v34, %v988_v1  ;;  %v1174_v37 = vsel %vm1080_vm3, %v3309_v35, %v1035_v6  ;;  %vm1914_vm11 = vcmp.eq.s32.totalorder %v6435_v4, 10  ;;  %vm2053_vm12 = vcmp.eq.s32.totalorder %v6435_v4, 11 }
 0x2a5   :  { %v1266_v0 = vsel %vm1219_vm9, %v3325_v40, %v1127_v46  ;;  %v1313_v38 = vsel %vm1219_vm9, %v3328_v41, %v1174_v37  ;;  %vm2192_vm10 = vcmp.eq.s32.totalorder %v6435_v4, 12  ;;  %v389_v22 = vsel %vm388_vm4, %v2955_v49, 0 }
 0x2a6   :  { %v1405_v11 = vsel %vm1358_vm7, %v3334_v44, %v1266_v0  ;;  %v1452_v2 = vsel %vm1358_vm7, %v3343_v47, %v1313_v38  ;;  %vm2331_vm15 = vcmp.eq.s32.totalorder %v6435_v4, 13  ;;  %vm478_vm2 = vcmp.lt.s32.totalorder %v389_v22, 14 }
 0x2a7   :  { %v1544_v3 = vsel %vm1497_vm8, %v3353_v50, %v1405_v11  ;;  %v1591_v33 = vsel %vm1497_vm8, %v3356_v51, %v1452_v2  ;;  %vm2470_vm13 = vcmp.eq.s32.totalorder %v6435_v4, 14  ;;  %vm2746_vm1 = vcmp.lt.f32.partialorder %v6263_v9, %v3265_v17 }
 0x2a8   :  { %v1683_v55 = vsel %vm1636_vm6, %v3365_v54, %v1544_v3  ;;  %v1730_v39 = vsel %vm1636_vm6, %v3373_v57, %v1591_v33  ;;  %v6477_v56 = vsel %vm478_vm2, %v389_v22, 14  ;;  %vm2700_vm5 = vcmp.gt.f32.partialorder %v6263_v9, %v3262_v16 }
 0x2a9   :  { %v1822_v5 = vsel %vm1775_vm14, %v3382_v60, %v1683_v55  ;;  %v1869_v61 = vsel %vm1775_vm14, %v3387_v63, %v1730_v39  ;;  %vm525_vm0 = vcmp.eq.s32.totalorder %v6477_v56, 0  ;;  %vm664_vm3 = vcmp.eq.s32.totalorder %v6477_v56, 1 }
 0x2aa   :  { %v1961_v49 = vsel %vm1914_vm11, %v3394_v8, %v1822_v5  ;;  %v2008_v7 = vsel %vm1914_vm11, %v3400_v10, %v1869_v61  ;;  %v572_v32 = vsel %vm525_vm0, %v3255_v12, 0.0  ;;  %v619_v29 = vsel %vm525_vm0, %v3267_v19, 0.0 }
 0x2ab   :  { %v2100_v43 = vsel %vm2053_vm12, %v3409_v14, %v1961_v49  ;;  %v2147_v62 = vsel %vm2053_vm12, %v3415_v18, %v2008_v7  ;;  %v711_v53 = vsel %vm664_vm3, %v3269_v20, %v572_v32  ;;  %v758_v15 = vsel %vm664_vm3, %v3276_v23, %v619_v29 }
 0x2ac   :  { %v2239_v13 = vsel %vm2192_vm10, %v3425_v26, %v2100_v43  ;;  %v2286_v1 = vsel %vm2192_vm10, %v3434_v36, %v2147_v62  ;;  %vm803_vm9 = vcmp.eq.s32.totalorder %v6477_v56, 2  ;;  %vm942_vm4 = vcmp.eq.s32.totalorder %v6477_v56, 3 }
 0x2ad   :  { %v2378_v6 = vsel %vm2331_vm15, %v3441_v42, %v2239_v13  ;;  %v2425_v46 = vsel %vm2331_vm15, %v3448_v48, %v2286_v1  ;;  %v850_v37 = vsel %vm803_vm9, %v3286_v27, %v711_v53  ;;  %v897_v0 = vsel %vm803_vm9, %v3289_v28, %v758_v15 }
 0x2ae   :  { %v2517_v38 = vsel %vm2470_vm13, %v3455_v52, %v2378_v6  ;;  %v2564_v11 = vsel %vm2470_vm13, %v3462_v58, %v2425_v46  ;;  %v989_v2 = vsel %vm942_vm4, %v3295_v30, %v850_v37  ;;  %v1036_v22 = vsel %vm942_vm4, %v3297_v31, %v897_v0 }
 0x2af   :  { %v2609_v3 = vmul.f32 %v2517_v38, %v6263_v9  ;;  %vm1081_vm7 = vcmp.eq.s32.totalorder %v6477_v56, 4  ;;  %vm1220_vm8 = vcmp.eq.s32.totalorder %v6477_v56, 5  ;;  %vm1359_vm6 = vcmp.eq.s32.totalorder %v6477_v56, 6 }
 0x2b0   :  { %v1128_v33 = vsel %vm1081_vm7, %v3306_v34, %v989_v2  ;;  %v1175_v55 = vsel %vm1081_vm7, %v3309_v35, %v1036_v22  ;;  %vm1498_vm14 = vcmp.eq.s32.totalorder %v6477_v56, 7  ;;  %v2956_v4 = vadd.s32 4294967295, %v6440_v25 }
 0x2b1   :  { %v2654_v39 = vadd.f32 %v2609_v3, %v2564_v11  ;;  %v1267_v5 = vsel %vm1220_vm8, %v3325_v40, %v1128_v33  ;;  %v1314_v61 = vsel %vm1220_vm8, %v3328_v41, %v1175_v55  ;;  %vm1637_vm11 = vcmp.eq.s32.totalorder %v6477_v56, 8 }
 0x2b2   :  { %v1406_v49 = vsel %vm1359_vm6, %v3334_v44, %v1267_v5  ;;  %v1453_v7 = vsel %vm1359_vm6, %v3343_v47, %v1314_v61  ;;  %vm1776_vm12 = vcmp.eq.s32.totalorder %v6477_v56, 9  ;;  %vm1915_vm10 = vcmp.eq.s32.totalorder %v6477_v56, 10 }
 0x2b3   :  { %v2792_v32 = vsel %vm2746_vm1, %v3274_v21, %v2654_v39  ;;  %v1545_v25 = vsel %vm1498_vm14, %v3353_v50, %v1406_v49  ;;  %v1592_v29 = vsel %vm1498_vm14, %v3356_v51, %v1453_v7  ;;  %vm2054_vm15 = vcmp.eq.s32.totalorder %v6477_v56, 11 }
 0x2b4   :  { %v2838_v43 = vsel %vm2700_vm5, %v3281_v24, %v2792_v32  ;;  %v1684_v62 = vsel %vm1637_vm11, %v3365_v54, %v1545_v25  ;;  %v1731_v53 = vsel %vm1637_vm11, %v3373_v57, %v1592_v29  ;;  %vm2193_vm2 = vcmp.eq.s32.totalorder %v6477_v56, 12 }
 0x2b5   :  { %2883 = vst [vmem:[#allocation11 + $0x150] sm:$0xff] %v2838_v43  ;;  %v1823_v15 = vsel %vm1776_vm12, %v3382_v60, %v1684_v62  ;;  %v1870_v13 = vsel %vm1776_vm12, %v3387_v63, %v1731_v53  ;;  %vm2701_vm13 = vcmp.gt.f32.partialorder %v6371_v45, %v3262_v16  ;;  %vm390_vm1 = vcmp.gt.s32.totalorder %v2956_v4, 0 }
 0x2b6   :  { %v1962_v9 = vsel %vm1915_vm10, %v3394_v8, %v1823_v15  ;;  %v2009_v1 = vsel %vm1915_vm10, %v3400_v10, %v1870_v13  ;;  %vm2332_vm5 = vcmp.eq.s32.totalorder %v6477_v56, 13  ;;  %v391_v6 = vsel %vm390_vm1, %v2956_v4, 0 }
 0x2b7   :  { %v2101_v46 = vsel %vm2054_vm15, %v3409_v14, %v1962_v9  ;;  %v2148_v37 = vsel %vm2054_vm15, %v3415_v18, %v2009_v1  ;;  %vm2471_vm0 = vcmp.eq.s32.totalorder %v6477_v56, 14  ;;  %vm480_vm3 = vcmp.lt.s32.totalorder %v391_v6, 14 }
 0x2b8   :  { %v2240_v0 = vsel %vm2193_vm2, %v3425_v26, %v2101_v46  ;;  %v2287_v38 = vsel %vm2193_vm2, %v3434_v36, %v2148_v37  ;;  %vm2747_vm9 = vcmp.lt.f32.partialorder %v6371_v45, %v3265_v17  ;;  %v481_v11 = vsel %vm480_vm3, %v391_v6, 14 }
 0x2b9   :  { %v2379_v2 = vsel %vm2332_vm5, %v3441_v42, %v2240_v0  ;;  %v2426_v22 = vsel %vm2332_vm5, %v3448_v48, %v2287_v38  ;;  %vm526_vm4 = vcmp.eq.s32.totalorder %v481_v11, 0  ;;  %vm665_vm7 = vcmp.eq.s32.totalorder %v481_v11, 1 }
 0x2ba   :  { %v2518_v3 = vsel %vm2471_vm0, %v3455_v52, %v2379_v2  ;;  %v2565_v33 = vsel %vm2471_vm0, %v3462_v58, %v2426_v22  ;;  %v573_v56 = vsel %vm526_vm4, %v3255_v12, 0.0  ;;  %v620_v55 = vsel %vm526_vm4, %v3267_v19, 0.0 }
 0x2bb   :  { %v2610_v4 = vmul.f32 %v2518_v3, %v6371_v45  ;;  %v712_v39 = vsel %vm665_vm7, %v3269_v20, %v573_v56  ;;  %v759_v5 = vsel %vm665_vm7, %v3276_v23, %v620_v55  ;;  %vm804_vm8 = vcmp.eq.s32.totalorder %v481_v11, 2 }
 0x2bc   :  { %v851_v61 = vsel %vm804_vm8, %v3286_v27, %v712_v39  ;;  %v898_v49 = vsel %vm804_vm8, %v3289_v28, %v759_v5  ;;  %vm943_vm6 = vcmp.eq.s32.totalorder %v481_v11, 3  ;;  %vm1082_vm14 = vcmp.eq.s32.totalorder %v481_v11, 4 }
 0x2bd   :  { %v2655_v7 = vadd.f32 %v2610_v4, %v2565_v33  ;;  %v990_v32 = vsel %vm943_vm6, %v3295_v30, %v851_v61  ;;  %v1037_v12 = vsel %vm943_vm6, %v3297_v31, %v898_v49  ;;  %vm1221_vm11 = vcmp.eq.s32.totalorder %v481_v11, 5 }
 0x2be   :  { %v1129_v19 = vsel %vm1082_vm14, %v3306_v34, %v990_v32  ;;  %v1176_v25 = vsel %vm1082_vm14, %v3309_v35, %v1037_v12  ;;  %vm1360_vm12 = vcmp.eq.s32.totalorder %v481_v11, 6  ;;  %vm1499_vm10 = vcmp.eq.s32.totalorder %v481_v11, 7 }
 0x2bf   :  { %v2793_v20 = vsel %vm2747_vm9, %v3274_v21, %v2655_v7  ;;  %v1268_v23 = vsel %vm1221_vm11, %v3325_v40, %v1129_v19  ;;  %v1315_v27 = vsel %vm1221_vm11, %v3328_v41, %v1176_v25  ;;  %vm1638_vm15 = vcmp.eq.s32.totalorder %v481_v11, 8 }
 0x2c0   :  { %v2839_v28 = vsel %vm2701_vm13, %v3281_v24, %v2793_v20  ;;  %v1407_v30 = vsel %vm1360_vm12, %v3334_v44, %v1268_v23  ;;  %v1454_v31 = vsel %vm1360_vm12, %v3343_v47, %v1315_v27  ;;  %vm1777_vm2 = vcmp.eq.s32.totalorder %v481_v11, 9 }
 0x2c1   :  { %2884 = vst [vmem:[#allocation11 + $0x158] sm:$0xff] %v2839_v28  ;;  %v1546_v34 = vsel %vm1499_vm10, %v3353_v50, %v1407_v30  ;;  %v1593_v35 = vsel %vm1499_vm10, %v3356_v51, %v1454_v31  ;;  %vm1916_vm1 = vcmp.eq.s32.totalorder %v481_v11, 10  ;;  %vm2055_vm5 = vcmp.eq.s32.totalorder %v481_v11, 11 }
 0x2c2   :  { %v1685_v40 = vsel %vm1638_vm15, %v3365_v54, %v1546_v34  ;;  %v1732_v41 = vsel %vm1638_vm15, %v3373_v57, %v1593_v35  ;;  %vm2194_vm13 = vcmp.eq.s32.totalorder %v481_v11, 12  ;;  %vm2333_vm0 = vcmp.eq.s32.totalorder %v481_v11, 13 }
 0x2c3   :  { %v1824_v29 = vsel %vm1777_vm2, %v3382_v60, %v1685_v40  ;;  %v1871_v45 = vsel %vm1777_vm2, %v3387_v63, %v1732_v41  ;;  %vm2472_vm3 = vcmp.eq.s32.totalorder %v481_v11, 14  ;;  %vm2748_vm9 = vcmp.lt.f32.partialorder %v6414_v59, %v3265_v17 }
 0x2c4   :  { %v1963_v44 = vsel %vm1916_vm1, %v3394_v8, %v1824_v29  ;;  %v2010_v47 = vsel %vm1916_vm1, %v3400_v10, %v1871_v45  ;;  %vm2702_vm4 = vcmp.gt.f32.partialorder %v6414_v59, %v3262_v16 }
 0x2c5   :  { %v2102_v50 = vsel %vm2055_vm5, %v3409_v14, %v1963_v44  ;;  %v2149_v51 = vsel %vm2055_vm5, %v3415_v18, %v2010_v47 }
 0x2c6   :  { %v2241_v54 = vsel %vm2194_vm13, %v3425_v26, %v2102_v50  ;;  %v2288_v57 = vsel %vm2194_vm13, %v3434_v36, %v2149_v51 }
 0x2c7   :  { %v2380_v43 = vsel %vm2333_vm0, %v3441_v42, %v2241_v54  ;;  %v2427_v60 = vsel %vm2333_vm0, %v3448_v48, %v2288_v57 }
 0x2c8   :  { %v2519_v63 = vsel %vm2472_vm3, %v3455_v52, %v2380_v43  ;;  %v2566_v8 = vsel %vm2472_vm3, %v3462_v58, %v2427_v60 }
 0x2c9   :  { %v2611_v10 = vmul.f32 %v2519_v63, %v6414_v59 }
 0x2cb   :  { %v2656_v14 = vadd.f32 %v2611_v10, %v2566_v8 }
 0x2cd   :  { %v2794_v18 = vsel %vm2748_vm9, %v3274_v21, %v2656_v14 }
 0x2ce   :  { %v2840_v26 = vsel %vm2702_vm4, %v3281_v24, %v2794_v18 }
 0x2cf   :  { %2885 = vst [vmem:[#allocation11 + $0x160] sm:$0xff] %v2840_v26 }
 0x2d0   :  { %2898 = dma.vmem_to_hbm [thread:$0]  %s2891_s12, 5760, %s2893_s15, [#allocation4], %s3180_s1, %s3180_s1, %s3181_s5  }
 0x2d1   :  { %3174 = dma.done.wait [#allocation4], 5760  }
 0x2d2   :  { %3175 = vsyncadd [#allocation4], 4294961536 }
 0x2d3   :  { %2903 = vsyncpa [#allocation3], 1 }
 0x2d4   :  { %2904 = vsyncpa [#allocation4], 1 }
 0x2d5   :  { %2905 = vsyncpa [#allocation5], 1 }
 0x2d6   :  { %2906 = vsyncpa [#allocation8], 1 }
 0x2d7   :  { %2907 = vsyncpa [#allocation6], 1 }

</bundles_post_ra>
